<compile_context>
chip_gen: v6e
topology: v6e:2x2x1
jax: 0.10.0
libtpu: 0.0.40
codegen_flags: <defaults>
</compile_context>

<pallas_src>
import jax
import jax.numpy as jnp
from jax import lax
from jax.experimental import pallas as pl
from jax.experimental.pallas import tpu as pltpu


STRIDES = (1, 1, 2, 1, 2, 1, 2, 1, 2, 1)   # conv strides in the nn.Sequential

_MAX_SINGLE_K = 2304                        # largest K done as one MXU block
_MAX_TK = 4096                              # cap on K block for the reduction path
_VMEM_TILE_BUDGET = 12 * 1024 * 1024        # fits every generation's scoped VMEM
_VMEM_LIMIT_BYTES = 32 * 1024 * 1024        # explicit scoped-VMEM limit

_TN_PREF = None
_RAGGED_K_OK = None


def _round_up(x, m):
    return ((x + m - 1) // m) * m


def _preferred_tn():
    """256-wide N tiles on the 2x256x256 MXUs (v6e/v7x); 128 elsewhere."""
    global _TN_PREF
    if _TN_PREF is None:
        kind = ""
        try:
            kind = jax.devices()[0].device_kind.lower()
        except Exception:
            pass
        _TN_PREF = 256 if ("v6" in kind or "v7" in kind or "tpu7" in kind) else 128
    return _TN_PREF


def _pick_max_tm(k_block, tn, out_itemsize, with_scratch):
    """Largest tm (multiple of 16, <=2048) whose double-buffered A/B/out blocks
    (+ optional f32 scratch) stay inside the per-kernel VMEM budget."""
    fixed = 2 * (k_block * tn * 2) + 2 * (tn * 4)            # B blocks + bias
    per_row = 2 * (k_block * 2) + 2 * (tn * out_itemsize)    # A blocks + out
    if with_scratch:
        per_row += tn * 4
    tm = max(_VMEM_TILE_BUDGET - fixed, 0) // max(per_row, 1)
    tm = max(16, min(int(tm), 2048))
    return (tm // 16) * 16


def _pick_m_tile(m, max_tm):
    """tm multiple of 16 (bf16 packs 2 rows/sublane), <= max_tm, and chosen so
    the 'parallel' M axis has >=2 blocks when m allows (v7x dual TensorCore).
    Uneven trailing blocks are fine: Pallas masks the partial writeback."""
    if m <= 16:
        return m                            # one tiny ragged full-dim block
    return min(max_tm, _round_up((m + 1) // 2, 16))


def _pick_tk(K):
    """Largest 128-multiple divisor of K <= _MAX_TK (no K padding, few k-steps);
    fall back to tk=512 with explicit zero padding if none exists."""
    best = 0
    for t in range(128, _MAX_TK + 1, 128):
        if K % t == 0:
            best = t
    if best:
        return best, K
    return 512, _round_up(K, 512)


# ----------------------------------------------------------------------------
# Pallas kernels: fused matmul + bias + ReLU (bf16 in, f32 accumulate)
# ----------------------------------------------------------------------------
def _matmul_bias_relu_kernel(a_ref, b_ref, bias_ref, o_ref):
    # Single K step: one MXU matmul, bias broadcast-add, ReLU, cast, store.
    acc = jnp.dot(a_ref[...], b_ref[...], preferred_element_type=jnp.float32)
    o_ref[...] = jnp.maximum(acc + bias_ref[...], 0.0).astype(o_ref.dtype)


def _matmul_bias_relu_kacc_kernel(a_ref, b_ref, bias_ref, o_ref, acc_ref):
    # K-reduction variant (large K): accumulate in a f32 VMEM scratch, write
    # the (possibly bf16) output exactly once on the last k step.
    k = pl.program_id(2)

    @pl.when(k == 0)
    def _():
        acc_ref[...] = jnp.zeros_like(acc_ref)

    acc_ref[...] += jnp.dot(a_ref[...], b_ref[...],
                            preferred_element_type=jnp.float32)

    @pl.when(k == pl.num_programs(2) - 1)
    def _():
        o_ref[...] = jnp.maximum(acc_ref[...] + bias_ref[...],
                                 0.0).astype(o_ref.dtype)


def _matmul_bias_relu_impl(a, b, bias, *, out_dtype, allow_ragged_k):
    M, K = a.shape
    K2, N = b.shape
    assert K == K2 and bias.shape == (N,)

    a = a.astype(jnp.bfloat16)
    b = b.astype(jnp.bfloat16)
    bias2 = bias.astype(jnp.float32).reshape(1, N)
    out_itemsize = jnp.dtype(out_dtype).itemsize

    tn_pref = _preferred_tn()
    tn = N if N <= tn_pref else tn_pref      # ragged full-dim or 128/256 tiles

    single_k = K <= _MAX_SINGLE_K
    if single_k:
        if K % 128 == 0 or allow_ragged_k:
            Kp = K                           # no zero-padding of the K axis
        else:
            Kp = _round_up(K, 128)           # conservative fallback: true zeros
            a = jnp.pad(a, ((0, 0), (0, Kp - K)))
            b = jnp.pad(b, ((0, Kp - K), (0, 0)))
        k_block = Kp
    else:
        tk, Kp = _pick_tk(K)
        if Kp != K:
            a = jnp.pad(a, ((0, 0), (0, Kp - K)))
            b = jnp.pad(b, ((0, Kp - K), (0, 0)))
        k_block = tk

    max_tm = _pick_max_tm(k_block, tn, out_itemsize, with_scratch=not single_k)
    tm = _pick_m_tile(M, max_tm)
    grid_m = pl.cdiv(M, tm)
    grid_n = pl.cdiv(N, tn)

    if single_k:
        grid = (grid_m, grid_n)
        kernel = _matmul_bias_relu_kernel
        in_specs = [
            pl.BlockSpec((tm, Kp), lambda i, j: (i, 0)),
            pl.BlockSpec((Kp, tn), lambda i, j: (0, j)),
            pl.BlockSpec((1, tn), lambda i, j: (0, j)),
        ]
        out_spec = pl.BlockSpec((tm, tn), lambda i, j: (i, j))
        scratch = ()
        dims = ("parallel", "parallel")
    else:
        grid = (grid_m, grid_n, Kp // tk)
        kernel = _matmul_bias_relu_kacc_kernel
        in_specs = [
            pl.BlockSpec((tm, tk), lambda i, j, k: (i, k)),
            pl.BlockSpec((tk, tn), lambda i, j, k: (k, j)),
            pl.BlockSpec((1, tn), lambda i, j, k: (0, j)),
        ]
        out_spec = pl.BlockSpec((tm, tn), lambda i, j, k: (i, j))
        scratch = (pltpu.VMEM((tm, tn), jnp.float32),)
        dims = ("parallel", "parallel", "arbitrary")

    return pl.pallas_call(
        kernel,
        out_shape=jax.ShapeDtypeStruct((M, N), out_dtype),
        grid_spec=pltpu.PrefetchScalarGridSpec(
            num_scalar_prefetch=0,
            grid=grid,
            in_specs=in_specs,
            out_specs=out_spec,
            scratch_shapes=scratch,
        ),
        compiler_params=pltpu.CompilerParams(
            dimension_semantics=dims,
            vmem_limit_bytes=_VMEM_LIMIT_BYTES,
        ),
    )(a, b, bias2)


def _probe_ragged_k():
    """One-time eager probe: does Mosaic mask a ragged (non-128-aligned)
    contraction dim correctly?  Must run OUTSIDE jit (uses concrete values)."""
    try:
        ka, kb, kc = jax.random.split(jax.random.PRNGKey(42), 3)
        M, K, N = 32, 27, 24
        a = jax.random.normal(ka, (M, K), jnp.float32)
        b = jax.random.normal(kb, (K, N), jnp.float32)
        c = jax.random.normal(kc, (N,), jnp.float32)
        out = _matmul_bias_relu_impl(a, b, c, out_dtype=jnp.float32,
                                     allow_ragged_k=True)
        ref = jnp.maximum(
            jnp.dot(a.astype(jnp.bfloat16).astype(jnp.float32),
                    b.astype(jnp.bfloat16).astype(jnp.float32),
                    precision=lax.Precision.HIGHEST) + c, 0.0)
        return bool(jnp.max(jnp.abs(out - ref)) < 5e-3)
    except Exception:
        return False        # lowering rejected (or called under jit) -> pad K


def ragged_k_supported():
    global _RAGGED_K_OK
    if _RAGGED_K_OK is None:
        _RAGGED_K_OK = _probe_ragged_k()
    return _RAGGED_K_OK


def matmul_bias_relu(a, b, bias, out_dtype=jnp.float32):
    """ReLU(a @ b + bias) on the MXU.  a:(M,K), b:(K,N), bias:(N,) -> (M,N)."""
    return _matmul_bias_relu_impl(a, b, bias, out_dtype=out_dtype,
                                  allow_ragged_k=ragged_k_supported())


# ----------------------------------------------------------------------------
# Conv2d(3x3, padding=1, stride s) + ReLU via bf16 patch gather + Pallas matmul
# ----------------------------------------------------------------------------
def conv3x3_relu(x_nhwc, w_mat, bias, stride):
    """x_nhwc: (N,H,W,Cin); w_mat: (9*Cin, Cout) bf16, rows ordered (dy,dx,cin);
    bias: (Cout,) f32.  Returns bf16 NHWC."""
    n, H, W, Cin = x_nhwc.shape
    K, Cout = w_mat.shape
    assert K == 9 * Cin
    Ho = (H - 1) // stride + 1
    Wo = (W - 1) // stride + 1

    xp = jnp.pad(x_nhwc.astype(jnp.bfloat16), ((0, 0), (1, 1), (1, 1), (0, 0)))
    cols = [
        xp[:, dy:dy + stride * (Ho - 1) + 1:stride,
              dx:dx + stride * (Wo - 1) + 1:stride, :]
        for dy in range(3) for dx in range(3)
    ]
    patches = jnp.concatenate(cols, axis=-1).reshape(n * Ho * Wo, K)

    y = matmul_bias_relu(patches, w_mat, bias, out_dtype=jnp.bfloat16)
    return y.reshape(n, Ho, Wo, Cout)


# ----------------------------------------------------------------------------
# Encoder parameters (PyTorch layer shapes) + one-time Pallas preparation
# ----------------------------------------------------------------------------
def _conv_defs(in_channels, oc):
    return [
        (in_channels, oc), (oc, oc),
        (oc, 2 * oc), (2 * oc, 2 * oc),
        (2 * oc, 4 * oc), (4 * oc, 4 * oc),
        (4 * oc, 8 * oc), (8 * oc, 8 * oc),
        (8 * oc, 16 * oc), (16 * oc, 16 * oc),
    ]


def make_encoder_params(key, in_channels, oc, latent_dim, final_spatial):
    """Synthetic parameters matching the nn.Module layer shapes (f32, OIHW)."""
    params = {"convs": []}
    for cin, cout in _conv_defs(in_channels, oc):
        key, kw, kb = jax.random.split(key, 3)
        scale = 1.0 / jnp.sqrt(9.0 * cin)
        w = jax.random.normal(kw, (cout, cin, 3, 3), jnp.float32) * scale
        b = jax.random.normal(kb, (cout,), jnp.float32) * 0.01
        params["convs"].append((w, b))

    lin_in = 16 * oc * final_spatial * final_spatial
    key, kw, kb = jax.random.split(key, 3)
    wl = jax.random.normal(kw, (lin_in, latent_dim), jnp.float32) / jnp.sqrt(
        float(lin_in))                      # rows in PyTorch NCHW-flatten order
    bl = jax.random.normal(kb, (latent_dim,), jnp.float32) * 0.01
    params["linear"] = (wl, bl)
    return params


def prepare_pallas_params(params):
    """One-time weight repacking: (Cout,Cin,3,3) -> (9*Cin, Cout) bf16 matrices
    (no K padding), and Linear rows permuted from NCHW- to NHWC-flatten order.
    Also resolves the ragged-K probe eagerly (must happen outside jit)."""
    ragged_k_supported()

    pp = {"convs": []}
    for w, b in params["convs"]:
        cout, cin, _, _ = w.shape
        wm = jnp.transpose(w, (2, 3, 1, 0)).reshape(9 * cin, cout)
        pp["convs"].append((wm.astype(jnp.bfloat16), b.astype(jnp.float32)))

    wl, bl = params["linear"]
    C = params["convs"][-1][0].shape[0]                      # 16*oc channels
    lin_in, latent = wl.shape
    fs = int(round((lin_in // C) ** 0.5))                    # final spatial
    wl_nhwc = (wl.reshape(C, fs, fs, latent)
                 .transpose(1, 2, 0, 3)
                 .reshape(lin_in, latent)
                 .astype(jnp.bfloat16))
    pp["linear"] = (wl_nhwc, bl.astype(jnp.float32))
    return pp


def encoder_forward(pp, x_nchw):
    """Equivalent of Encoder.forward; x_nchw: (N, Cin, H, W) -> (N, latent) f32."""
    x = jnp.transpose(x_nchw, (0, 2, 3, 1))                  # NCHW -> NHWC
    for (wm, b), s in zip(pp["convs"], STRIDES):
        x = conv3x3_relu(x, wm, b, s)                        # bf16 activations
    flat = x.reshape(x.shape[0], -1)                         # NHWC flatten
    wl, bl = pp["linear"]                                    # pre-permuted
    return matmul_bias_relu(flat, wl, bl, out_dtype=jnp.float32)


# Pure-JAX reference (lax convolutions).  quantize=True rounds the operands to
# bf16 exactly where the Pallas path does, isolating kernel-math correctness.
def encoder_reference(params, x_nchw, quantize):
    def q(t):
        return t.astype(jnp.bfloat16).astype(jnp.float32) if quantize else t

    x = x_nchw
    for (w, b), s in zip(params["convs"], STRIDES):
        y = lax.conv_general_dilated(
            q(x), q(w), window_strides=(s, s), padding=((1, 1), (1, 1)),
            dimension_numbers=("NCHW", "OIHW", "NCHW"),
            precision=lax.Precision.HIGHEST)
        x = jnp.maximum(y + b.reshape(1, -1, 1, 1), 0.0)
    flat = x.reshape(x.shape[0], -1)                         # NCHW flatten
    wl, bl = params["linear"]
    return jnp.maximum(
        jnp.dot(q(flat), q(wl), precision=lax.Precision.HIGHEST) + bl, 0.0)


if __name__ == "__main__":
    # Scaled-down config (structure identical to the PyTorch module).
    batch, in_channels, spatial = 2, 3, 32
    oc, latent_dim = 4, 32
    final_spatial = spatial // 16                            # 4 stride-2 convs

    key = jax.random.PRNGKey(0)
    key, kx = jax.random.split(key)
    x = jax.random.normal(kx, (batch, in_channels, spatial, spatial), jnp.float32)

    params = make_encoder_params(key, in_channels, oc, latent_dim, final_spatial)
    pp = prepare_pallas_params(params)       # resolves ragged-K probe eagerly

    fwd = jax.jit(encoder_forward)
    out = jax.block_until_ready(fwd(pp, x))
    assert out.shape == (batch, latent_dim), out.shape
    assert out.dtype == jnp.float32

    # Tight check vs a reference using the same bf16-rounded operands
    # (validates the kernel math; only accumulation order differs).
    ref_q = jax.block_until_ready(encoder_reference(params, x, quantize=True))
    assert jnp.allclose(out, ref_q, rtol=1e-2, atol=1e-2), float(
        jnp.max(jnp.abs(out - ref_q)))

    # Loose check vs the pure-f32 reference (difference = bf16 operand rounding).
    ref_f = jax.block_until_ready(encoder_reference(params, x, quantize=False))
    assert jnp.allclose(out, ref_f, rtol=5e-2, atol=5e-2), float(
        jnp.max(jnp.abs(out - ref_f)))

    # Exercise the large-K reduction kernel (tk divisor of K) and uneven M/N
    # grids, which the tiny encoder config above does not hit.
    k1, k2, k3 = jax.random.split(jax.random.PRNGKey(1), 3)
    km, kk, kn = 200, 5760, 320
    a = jax.random.normal(k1, (km, kk), jnp.float32)
    b = jax.random.normal(k2, (kk, kn), jnp.float32) / jnp.sqrt(float(kk))
    c = jax.random.normal(k3, (kn,), jnp.float32)
    y = jax.block_until_ready(matmul_bias_relu(a, b, c, out_dtype=jnp.float32))
    y_ref = jnp.maximum(
        jnp.dot(a.astype(jnp.bfloat16).astype(jnp.float32),
                b.astype(jnp.bfloat16).astype(jnp.float32),
                precision=lax.Precision.HIGHEST) + c, 0.0)
    assert jnp.allclose(y, y_ref, rtol=1e-2, atol=1e-2), float(
        jnp.max(jnp.abs(y - y_ref)))

    print("KERNEL_OK")
</pallas_src>

<mosaic_0001>
module attributes {stable_mosaic.version = 11 : i64} {
  func.func @_matmul_bias_relu_kernel(%arg0: i32, %arg1: i32, %arg2: memref<16x27xbf16, #tpu.memory_space<vmem>>, %arg3: memref<27x24xbf16, #tpu.memory_space<vmem>>, %arg4: memref<1x24xf32, #tpu.memory_space<vmem>>, %arg5: memref<16x24xf32, #tpu.memory_space<vmem>>) attributes {dimension_semantics = [#tpu.dimension_semantics<parallel>, #tpu.dimension_semantics<parallel>], iteration_bounds = array<i64: 2, 1>, scalar_prefetch = 0 : i64, scratch_operands = 0 : i64, tpu.core_type = #tpu.core_type<tc>, window_params = [{transform_indices = @transform_0, window_bounds = array<i64: 16, 27>}, {transform_indices = @transform_1, window_bounds = array<i64: 27, 24>}, {transform_indices = @transform_2, window_bounds = array<i64: 1, 24>}, {transform_indices = @transform_3, window_bounds = array<i64: 16, 24>}]} {
    %c0 = arith.constant 0 : index
    %c0_0 = arith.constant 0 : index
    %0 = vector.load %arg2[%c0, %c0_0] : memref<16x27xbf16, #tpu.memory_space<vmem>>, vector<16x27xbf16>
    %c0_1 = arith.constant 0 : index
    %c0_2 = arith.constant 0 : index
    %1 = vector.load %arg3[%c0_1, %c0_2] : memref<27x24xbf16, #tpu.memory_space<vmem>>, vector<27x24xbf16>
    %cst = arith.constant dense<0.000000e+00> : vector<16x24xf32>
    %2 = tpu.matmul %0, %1, %cst {dimension_numbers = #tpu.dot_dimension_numbers<[1], [0], [0], [1], [0, 0, 1, 1], [], []>} : vector<16x27xbf16>, vector<27x24xbf16>, vector<16x24xf32> -> vector<16x24xf32>
    %c0_3 = arith.constant 0 : index
    %c0_4 = arith.constant 0 : index
    %3 = vector.load %arg4[%c0_3, %c0_4] : memref<1x24xf32, #tpu.memory_space<vmem>>, vector<1x24xf32>
    %4 = vector.broadcast %3 : vector<1x24xf32> to vector<16x24xf32>
    %5 = arith.addf %2, %4 : vector<16x24xf32>
    %cst_5 = arith.constant 0.000000e+00 : f32
    %6 = vector.broadcast %cst_5 : f32 to vector<16x24xf32>
    %7 = arith.maximumf %5, %6 : vector<16x24xf32>
    %c0_6 = arith.constant 0 : index
    %c0_7 = arith.constant 0 : index
    %8 = vector.load %arg5[%c0_6, %c0_7] : memref<16x24xf32, #tpu.memory_space<vmem>>, vector<16x24xf32>
    tpu.vector_store %arg5[%c0_6, %c0_7], %7 {strides = array<i32>} : memref<16x24xf32, #tpu.memory_space<vmem>>, vector<16x24xf32>,
    return
  }
  func.func @transform_0(%arg0: i32, %arg1: i32) -> (i32, i32) {
    %c0_i32 = arith.constant 0 : i32
    %c0_i32_0 = arith.constant 0 : i32
    return %arg0, %c0_i32 : i32, i32
  }
  func.func @transform_1(%arg0: i32, %arg1: i32) -> (i32, i32) {
    %c0_i32 = arith.constant 0 : i32
    %c0_i32_0 = arith.constant 0 : i32
    return %c0_i32, %arg1 : i32, i32
  }
  func.func @transform_2(%arg0: i32, %arg1: i32) -> (i32, i32) {
    %c0_i32 = arith.constant 0 : i32
    %c0_i32_0 = arith.constant 0 : i32
    return %c0_i32, %arg1 : i32, i32
  }
  func.func @transform_3(%arg0: i32, %arg1: i32) -> (i32, i32) {
    %c0_i32 = arith.constant 0 : i32
    return %arg0, %arg1 : i32, i32
  }
}

module attributes {stable_mosaic.version = 11 : i64} {
  func.func @_matmul_bias_relu_kernel(%arg0: i32, %arg1: i32, %arg2: memref<1024x128xbf16, #tpu.memory_space<vmem>>, %arg3: memref<128x4xbf16, #tpu.memory_space<vmem>>, %arg4: memref<1x4xf32, #tpu.memory_space<vmem>>, %arg5: memref<1024x4xbf16, #tpu.memory_space<vmem>>) attributes {dimension_semantics = [#tpu.dimension_semantics<parallel>, #tpu.dimension_semantics<parallel>], iteration_bounds = array<i64: 2, 1>, scalar_prefetch = 0 : i64, scratch_operands = 0 : i64, tpu.core_type = #tpu.core_type<tc>, window_params = [{transform_indices = @transform_0, window_bounds = array<i64: 1024, 128>}, {transform_indices = @transform_1, window_bounds = array<i64: 128, 4>}, {transform_indices = @transform_2, window_bounds = array<i64: 1, 4>}, {transform_indices = @transform_3, window_bounds = array<i64: 1024, 4>}]} {
    %c0 = arith.constant 0 : index
    %c0_0 = arith.constant 0 : index
    %0 = vector.load %arg2[%c0, %c0_0] : memref<1024x128xbf16, #tpu.memory_space<vmem>>, vector<1024x128xbf16>
    %c0_1 = arith.constant 0 : index
    %c0_2 = arith.constant 0 : index
    %1 = vector.load %arg3[%c0_1, %c0_2] : memref<128x4xbf16, #tpu.memory_space<vmem>>, vector<128x4xbf16>
    %cst = arith.constant dense<0.000000e+00> : vector<1024x4xf32>
    %2 = tpu.matmul %0, %1, %cst {dimension_numbers = #tpu.dot_dimension_numbers<[1], [0], [0], [1], [0, 0, 1, 1], [], []>} : vector<1024x128xbf16>, vector<128x4xbf16>, vector<1024x4xf32> -> vector<1024x4xf32>
    %c0_3 = arith.constant 0 : index
    %c0_4 = arith.constant 0 : index
    %3 = vector.load %arg4[%c0_3, %c0_4] : memref<1x4xf32, #tpu.memory_space<vmem>>, vector<1x4xf32>
    %4 = vector.broadcast %3 : vector<1x4xf32> to vector<1024x4xf32>
    %5 = arith.addf %2, %4 : vector<1024x4xf32>
    %cst_5 = arith.constant 0.000000e+00 : f32
    %6 = vector.broadcast %cst_5 : f32 to vector<1024x4xf32>
    %7 = arith.maximumf %5, %6 : vector<1024x4xf32>
    %8 = arith.truncf %7 : vector<1024x4xf32> to vector<1024x4xbf16>
    %c0_6 = arith.constant 0 : index
    %c0_7 = arith.constant 0 : index
    %9 = vector.load %arg5[%c0_6, %c0_7] : memref<1024x4xbf16, #tpu.memory_space<vmem>>, vector<1024x4xbf16>
    tpu.vector_store %arg5[%c0_6, %c0_7], %8 {strides = array<i32>} : memref<1024x4xbf16, #tpu.memory_space<vmem>>, vector<1024x4xbf16>,
    return
  }
  func.func @transform_0(%arg0: i32, %arg1: i32) -> (i32, i32) {
    %c0_i32 = arith.constant 0 : i32
    %c0_i32_0 = arith.constant 0 : i32
    return %arg0, %c0_i32 : i32, i32
  }
  func.func @transform_1(%arg0: i32, %arg1: i32) -> (i32, i32) {
    %c0_i32 = arith.constant 0 : i32
    %c0_i32_0 = arith.constant 0 : i32
    return %c0_i32, %arg1 : i32, i32
  }
  func.func @transform_2(%arg0: i32, %arg1: i32) -> (i32, i32) {
    %c0_i32 = arith.constant 0 : i32
    %c0_i32_0 = arith.constant 0 : i32
    return %c0_i32, %arg1 : i32, i32
  }
  func.func @transform_3(%arg0: i32, %arg1: i32) -> (i32, i32) {
    %c0_i32 = arith.constant 0 : i32
    return %arg0, %arg1 : i32, i32
  }
}

module attributes {stable_mosaic.version = 11 : i64} {
  func.func @_matmul_bias_relu_kernel(%arg0: i32, %arg1: i32, %arg2: memref<256x128xbf16, #tpu.memory_space<vmem>>, %arg3: memref<128x8xbf16, #tpu.memory_space<vmem>>, %arg4: memref<1x8xf32, #tpu.memory_space<vmem>>, %arg5: memref<256x8xbf16, #tpu.memory_space<vmem>>) attributes {dimension_semantics = [#tpu.dimension_semantics<parallel>, #tpu.dimension_semantics<parallel>], iteration_bounds = array<i64: 2, 1>, scalar_prefetch = 0 : i64, scratch_operands = 0 : i64, tpu.core_type = #tpu.core_type<tc>, window_params = [{transform_indices = @transform_0, window_bounds = array<i64: 256, 128>}, {transform_indices = @transform_1, window_bounds = array<i64: 128, 8>}, {transform_indices = @transform_2, window_bounds = array<i64: 1, 8>}, {transform_indices = @transform_3, window_bounds = array<i64: 256, 8>}]} {
    %c0 = arith.constant 0 : index
    %c0_0 = arith.constant 0 : index
    %0 = vector.load %arg2[%c0, %c0_0] : memref<256x128xbf16, #tpu.memory_space<vmem>>, vector<256x128xbf16>
    %c0_1 = arith.constant 0 : index
    %c0_2 = arith.constant 0 : index
    %1 = vector.load %arg3[%c0_1, %c0_2] : memref<128x8xbf16, #tpu.memory_space<vmem>>, vector<128x8xbf16>
    %cst = arith.constant dense<0.000000e+00> : vector<256x8xf32>
    %2 = tpu.matmul %0, %1, %cst {dimension_numbers = #tpu.dot_dimension_numbers<[1], [0], [0], [1], [0, 0, 1, 1], [], []>} : vector<256x128xbf16>, vector<128x8xbf16>, vector<256x8xf32> -> vector<256x8xf32>
    %c0_3 = arith.constant 0 : index
    %c0_4 = arith.constant 0 : index
    %3 = vector.load %arg4[%c0_3, %c0_4] : memref<1x8xf32, #tpu.memory_space<vmem>>, vector<1x8xf32>
    %4 = vector.broadcast %3 : vector<1x8xf32> to vector<256x8xf32>
    %5 = arith.addf %2, %4 : vector<256x8xf32>
    %cst_5 = arith.constant 0.000000e+00 : f32
    %6 = vector.broadcast %cst_5 : f32 to vector<256x8xf32>
    %7 = arith.maximumf %5, %6 : vector<256x8xf32>
    %8 = arith.truncf %7 : vector<256x8xf32> to vector<256x8xbf16>
    %c0_6 = arith.constant 0 : index
    %c0_7 = arith.constant 0 : index
    %9 = vector.load %arg5[%c0_6, %c0_7] : memref<256x8xbf16, #tpu.memory_space<vmem>>, vector<256x8xbf16>
    tpu.vector_store %arg5[%c0_6, %c0_7], %8 {strides = array<i32>} : memref<256x8xbf16, #tpu.memory_space<vmem>>, vector<256x8xbf16>,
    return
  }
  func.func @transform_0(%arg0: i32, %arg1: i32) -> (i32, i32) {
    %c0_i32 = arith.constant 0 : i32
    %c0_i32_0 = arith.constant 0 : i32
    return %arg0, %c0_i32 : i32, i32
  }
  func.func @transform_1(%arg0: i32, %arg1: i32) -> (i32, i32) {
    %c0_i32 = arith.constant 0 : i32
    %c0_i32_0 = arith.constant 0 : i32
    return %c0_i32, %arg1 : i32, i32
  }
  func.func @transform_2(%arg0: i32, %arg1: i32) -> (i32, i32) {
    %c0_i32 = arith.constant 0 : i32
    %c0_i32_0 = arith.constant 0 : i32
    return %c0_i32, %arg1 : i32, i32
  }
  func.func @transform_3(%arg0: i32, %arg1: i32) -> (i32, i32) {
    %c0_i32 = arith.constant 0 : i32
    return %arg0, %arg1 : i32, i32
  }
}

module attributes {stable_mosaic.version = 11 : i64} {
  func.func @_matmul_bias_relu_kernel(%arg0: i32, %arg1: i32, %arg2: memref<64x128xbf16, #tpu.memory_space<vmem>>, %arg3: memref<128x16xbf16, #tpu.memory_space<vmem>>, %arg4: memref<1x16xf32, #tpu.memory_space<vmem>>, %arg5: memref<64x16xbf16, #tpu.memory_space<vmem>>) attributes {dimension_semantics = [#tpu.dimension_semantics<parallel>, #tpu.dimension_semantics<parallel>], iteration_bounds = array<i64: 2, 1>, scalar_prefetch = 0 : i64, scratch_operands = 0 : i64, tpu.core_type = #tpu.core_type<tc>, window_params = [{transform_indices = @transform_0, window_bounds = array<i64: 64, 128>}, {transform_indices = @transform_1, window_bounds = array<i64: 128, 16>}, {transform_indices = @transform_2, window_bounds = array<i64: 1, 16>}, {transform_indices = @transform_3, window_bounds = array<i64: 64, 16>}]} {
    %c0 = arith.constant 0 : index
    %c0_0 = arith.constant 0 : index
    %0 = vector.load %arg2[%c0, %c0_0] : memref<64x128xbf16, #tpu.memory_space<vmem>>, vector<64x128xbf16>
    %c0_1 = arith.constant 0 : index
    %c0_2 = arith.constant 0 : index
    %1 = vector.load %arg3[%c0_1, %c0_2] : memref<128x16xbf16, #tpu.memory_space<vmem>>, vector<128x16xbf16>
    %cst = arith.constant dense<0.000000e+00> : vector<64x16xf32>
    %2 = tpu.matmul %0, %1, %cst {dimension_numbers = #tpu.dot_dimension_numbers<[1], [0], [0], [1], [0, 0, 1, 1], [], []>} : vector<64x128xbf16>, vector<128x16xbf16>, vector<64x16xf32> -> vector<64x16xf32>
    %c0_3 = arith.constant 0 : index
    %c0_4 = arith.constant 0 : index
    %3 = vector.load %arg4[%c0_3, %c0_4] : memref<1x16xf32, #tpu.memory_space<vmem>>, vector<1x16xf32>
    %4 = vector.broadcast %3 : vector<1x16xf32> to vector<64x16xf32>
    %5 = arith.addf %2, %4 : vector<64x16xf32>
    %cst_5 = arith.constant 0.000000e+00 : f32
    %6 = vector.broadcast %cst_5 : f32 to vector<64x16xf32>
    %7 = arith.maximumf %5, %6 : vector<64x16xf32>
    %8 = arith.truncf %7 : vector<64x16xf32> to vector<64x16xbf16>
    %c0_6 = arith.constant 0 : index
    %c0_7 = arith.constant 0 : index
    %9 = vector.load %arg5[%c0_6, %c0_7] : memref<64x16xbf16, #tpu.memory_space<vmem>>, vector<64x16xbf16>
    tpu.vector_store %arg5[%c0_6, %c0_7], %8 {strides = array<i32>} : memref<64x16xbf16, #tpu.memory_space<vmem>>, vector<64x16xbf16>,
    return
  }
  func.func @transform_0(%arg0: i32, %arg1: i32) -> (i32, i32) {
    %c0_i32 = arith.constant 0 : i32
    %c0_i32_0 = arith.constant 0 : i32
    return %arg0, %c0_i32 : i32, i32
  }
  func.func @transform_1(%arg0: i32, %arg1: i32) -> (i32, i32) {
    %c0_i32 = arith.constant 0 : i32
    %c0_i32_0 = arith.constant 0 : i32
    return %c0_i32, %arg1 : i32, i32
  }
  func.func @transform_2(%arg0: i32, %arg1: i32) -> (i32, i32) {
    %c0_i32 = arith.constant 0 : i32
    %c0_i32_0 = arith.constant 0 : i32
    return %c0_i32, %arg1 : i32, i32
  }
  func.func @transform_3(%arg0: i32, %arg1: i32) -> (i32, i32) {
    %c0_i32 = arith.constant 0 : i32
    return %arg0, %arg1 : i32, i32
  }
}

module attributes {stable_mosaic.version = 11 : i64} {
  func.func @_matmul_bias_relu_kernel(%arg0: i32, %arg1: i32, %arg2: memref<64x256xbf16, #tpu.memory_space<vmem>>, %arg3: memref<256x16xbf16, #tpu.memory_space<vmem>>, %arg4: memref<1x16xf32, #tpu.memory_space<vmem>>, %arg5: memref<64x16xbf16, #tpu.memory_space<vmem>>) attributes {dimension_semantics = [#tpu.dimension_semantics<parallel>, #tpu.dimension_semantics<parallel>], iteration_bounds = array<i64: 2, 1>, scalar_prefetch = 0 : i64, scratch_operands = 0 : i64, tpu.core_type = #tpu.core_type<tc>, window_params = [{transform_indices = @transform_0, window_bounds = array<i64: 64, 256>}, {transform_indices = @transform_1, window_bounds = array<i64: 256, 16>}, {transform_indices = @transform_2, window_bounds = array<i64: 1, 16>}, {transform_indices = @transform_3, window_bounds = array<i64: 64, 16>}]} {
    %c0 = arith.constant 0 : index
    %c0_0 = arith.constant 0 : index
    %0 = vector.load %arg2[%c0, %c0_0] : memref<64x256xbf16, #tpu.memory_space<vmem>>, vector<64x256xbf16>
    %c0_1 = arith.constant 0 : index
    %c0_2 = arith.constant 0 : index
    %1 = vector.load %arg3[%c0_1, %c0_2] : memref<256x16xbf16, #tpu.memory_space<vmem>>, vector<256x16xbf16>
    %cst = arith.constant dense<0.000000e+00> : vector<64x16xf32>
    %2 = tpu.matmul %0, %1, %cst {dimension_numbers = #tpu.dot_dimension_numbers<[1], [0], [0], [1], [0, 0, 1, 1], [], []>} : vector<64x256xbf16>, vector<256x16xbf16>, vector<64x16xf32> -> vector<64x16xf32>
    %c0_3 = arith.constant 0 : index
    %c0_4 = arith.constant 0 : index
    %3 = vector.load %arg4[%c0_3, %c0_4] : memref<1x16xf32, #tpu.memory_space<vmem>>, vector<1x16xf32>
    %4 = vector.broadcast %3 : vector<1x16xf32> to vector<64x16xf32>
    %5 = arith.addf %2, %4 : vector<64x16xf32>
    %cst_5 = arith.constant 0.000000e+00 : f32
    %6 = vector.broadcast %cst_5 : f32 to vector<64x16xf32>
    %7 = arith.maximumf %5, %6 : vector<64x16xf32>
    %8 = arith.truncf %7 : vector<64x16xf32> to vector<64x16xbf16>
    %c0_6 = arith.constant 0 : index
    %c0_7 = arith.constant 0 : index
    %9 = vector.load %arg5[%c0_6, %c0_7] : memref<64x16xbf16, #tpu.memory_space<vmem>>, vector<64x16xbf16>
    tpu.vector_store %arg5[%c0_6, %c0_7], %8 {strides = array<i32>} : memref<64x16xbf16, #tpu.memory_space<vmem>>, vector<64x16xbf16>,
    return
  }
  func.func @transform_0(%arg0: i32, %arg1: i32) -> (i32, i32) {
    %c0_i32 = arith.constant 0 : i32
    %c0_i32_0 = arith.constant 0 : i32
    return %arg0, %c0_i32 : i32, i32
  }
  func.func @transform_1(%arg0: i32, %arg1: i32) -> (i32, i32) {
    %c0_i32 = arith.constant 0 : i32
    %c0_i32_0 = arith.constant 0 : i32
    return %c0_i32, %arg1 : i32, i32
  }
  func.func @transform_2(%arg0: i32, %arg1: i32) -> (i32, i32) {
    %c0_i32 = arith.constant 0 : i32
    %c0_i32_0 = arith.constant 0 : i32
    return %c0_i32, %arg1 : i32, i32
  }
  func.func @transform_3(%arg0: i32, %arg1: i32) -> (i32, i32) {
    %c0_i32 = arith.constant 0 : i32
    return %arg0, %arg1 : i32, i32
  }
}

module attributes {stable_mosaic.version = 11 : i64} {
  func.func @_matmul_bias_relu_kernel(%arg0: i32, %arg1: i32, %arg2: memref<16x256xbf16, #tpu.memory_space<vmem>>, %arg3: memref<256x32xbf16, #tpu.memory_space<vmem>>, %arg4: memref<1x32xf32, #tpu.memory_space<vmem>>, %arg5: memref<16x32xbf16, #tpu.memory_space<vmem>>) attributes {dimension_semantics = [#tpu.dimension_semantics<parallel>, #tpu.dimension_semantics<parallel>], iteration_bounds = array<i64: 2, 1>, scalar_prefetch = 0 : i64, scratch_operands = 0 : i64, tpu.core_type = #tpu.core_type<tc>, window_params = [{transform_indices = @transform_0, window_bounds = array<i64: 16, 256>}, {transform_indices = @transform_1, window_bounds = array<i64: 256, 32>}, {transform_indices = @transform_2, window_bounds = array<i64: 1, 32>}, {transform_indices = @transform_3, window_bounds = array<i64: 16, 32>}]} {
    %c0 = arith.constant 0 : index
    %c0_0 = arith.constant 0 : index
    %0 = vector.load %arg2[%c0, %c0_0] : memref<16x256xbf16, #tpu.memory_space<vmem>>, vector<16x256xbf16>
    %c0_1 = arith.constant 0 : index
    %c0_2 = arith.constant 0 : index
    %1 = vector.load %arg3[%c0_1, %c0_2] : memref<256x32xbf16, #tpu.memory_space<vmem>>, vector<256x32xbf16>
    %cst = arith.constant dense<0.000000e+00> : vector<16x32xf32>
    %2 = tpu.matmul %0, %1, %cst {dimension_numbers = #tpu.dot_dimension_numbers<[1], [0], [0], [1], [0, 0, 1, 1], [], []>} : vector<16x256xbf16>, vector<256x32xbf16>, vector<16x32xf32> -> vector<16x32xf32>
    %c0_3 = arith.constant 0 : index
    %c0_4 = arith.constant 0 : index
    %3 = vector.load %arg4[%c0_3, %c0_4] : memref<1x32xf32, #tpu.memory_space<vmem>>, vector<1x32xf32>
    %4 = vector.broadcast %3 : vector<1x32xf32> to vector<16x32xf32>
    %5 = arith.addf %2, %4 : vector<16x32xf32>
    %cst_5 = arith.constant 0.000000e+00 : f32
    %6 = vector.broadcast %cst_5 : f32 to vector<16x32xf32>
    %7 = arith.maximumf %5, %6 : vector<16x32xf32>
    %8 = arith.truncf %7 : vector<16x32xf32> to vector<16x32xbf16>
    %c0_6 = arith.constant 0 : index
    %c0_7 = arith.constant 0 : index
    %9 = vector.load %arg5[%c0_6, %c0_7] : memref<16x32xbf16, #tpu.memory_space<vmem>>, vector<16x32xbf16>
    tpu.vector_store %arg5[%c0_6, %c0_7], %8 {strides = array<i32>} : memref<16x32xbf16, #tpu.memory_space<vmem>>, vector<16x32xbf16>,
    return
  }
  func.func @transform_0(%arg0: i32, %arg1: i32) -> (i32, i32) {
    %c0_i32 = arith.constant 0 : i32
    %c0_i32_0 = arith.constant 0 : i32
    return %arg0, %c0_i32 : i32, i32
  }
  func.func @transform_1(%arg0: i32, %arg1: i32) -> (i32, i32) {
    %c0_i32 = arith.constant 0 : i32
    %c0_i32_0 = arith.constant 0 : i32
    return %c0_i32, %arg1 : i32, i32
  }
  func.func @transform_2(%arg0: i32, %arg1: i32) -> (i32, i32) {
    %c0_i32 = arith.constant 0 : i32
    %c0_i32_0 = arith.constant 0 : i32
    return %c0_i32, %arg1 : i32, i32
  }
  func.func @transform_3(%arg0: i32, %arg1: i32) -> (i32, i32) {
    %c0_i32 = arith.constant 0 : i32
    return %arg0, %arg1 : i32, i32
  }
}

module attributes {stable_mosaic.version = 11 : i64} {
  func.func @_matmul_bias_relu_kernel(%arg0: i32, %arg1: i32, %arg2: memref<16x384xbf16, #tpu.memory_space<vmem>>, %arg3: memref<384x32xbf16, #tpu.memory_space<vmem>>, %arg4: memref<1x32xf32, #tpu.memory_space<vmem>>, %arg5: memref<16x32xbf16, #tpu.memory_space<vmem>>) attributes {dimension_semantics = [#tpu.dimension_semantics<parallel>, #tpu.dimension_semantics<parallel>], iteration_bounds = array<i64: 2, 1>, scalar_prefetch = 0 : i64, scratch_operands = 0 : i64, tpu.core_type = #tpu.core_type<tc>, window_params = [{transform_indices = @transform_0, window_bounds = array<i64: 16, 384>}, {transform_indices = @transform_1, window_bounds = array<i64: 384, 32>}, {transform_indices = @transform_2, window_bounds = array<i64: 1, 32>}, {transform_indices = @transform_3, window_bounds = array<i64: 16, 32>}]} {
    %c0 = arith.constant 0 : index
    %c0_0 = arith.constant 0 : index
    %0 = vector.load %arg2[%c0, %c0_0] : memref<16x384xbf16, #tpu.memory_space<vmem>>, vector<16x384xbf16>
    %c0_1 = arith.constant 0 : index
    %c0_2 = arith.constant 0 : index
    %1 = vector.load %arg3[%c0_1, %c0_2] : memref<384x32xbf16, #tpu.memory_space<vmem>>, vector<384x32xbf16>
    %cst = arith.constant dense<0.000000e+00> : vector<16x32xf32>
    %2 = tpu.matmul %0, %1, %cst {dimension_numbers = #tpu.dot_dimension_numbers<[1], [0], [0], [1], [0, 0, 1, 1], [], []>} : vector<16x384xbf16>, vector<384x32xbf16>, vector<16x32xf32> -> vector<16x32xf32>
    %c0_3 = arith.constant 0 : index
    %c0_4 = arith.constant 0 : index
    %3 = vector.load %arg4[%c0_3, %c0_4] : memref<1x32xf32, #tpu.memory_space<vmem>>, vector<1x32xf32>
    %4 = vector.broadcast %3 : vector<1x32xf32> to vector<16x32xf32>
    %5 = arith.addf %2, %4 : vector<16x32xf32>
    %cst_5 = arith.constant 0.000000e+00 : f32
    %6 = vector.broadcast %cst_5 : f32 to vector<16x32xf32>
    %7 = arith.maximumf %5, %6 : vector<16x32xf32>
    %8 = arith.truncf %7 : vector<16x32xf32> to vector<16x32xbf16>
    %c0_6 = arith.constant 0 : index
    %c0_7 = arith.constant 0 : index
    %9 = vector.load %arg5[%c0_6, %c0_7] : memref<16x32xbf16, #tpu.memory_space<vmem>>, vector<16x32xbf16>
    tpu.vector_store %arg5[%c0_6, %c0_7], %8 {strides = array<i32>} : memref<16x32xbf16, #tpu.memory_space<vmem>>, vector<16x32xbf16>,
    return
  }
  func.func @transform_0(%arg0: i32, %arg1: i32) -> (i32, i32) {
    %c0_i32 = arith.constant 0 : i32
    %c0_i32_0 = arith.constant 0 : i32
    return %arg0, %c0_i32 : i32, i32
  }
  func.func @transform_1(%arg0: i32, %arg1: i32) -> (i32, i32) {
    %c0_i32 = arith.constant 0 : i32
    %c0_i32_0 = arith.constant 0 : i32
    return %c0_i32, %arg1 : i32, i32
  }
  func.func @transform_2(%arg0: i32, %arg1: i32) -> (i32, i32) {
    %c0_i32 = arith.constant 0 : i32
    %c0_i32_0 = arith.constant 0 : i32
    return %c0_i32, %arg1 : i32, i32
  }
  func.func @transform_3(%arg0: i32, %arg1: i32) -> (i32, i32) {
    %c0_i32 = arith.constant 0 : i32
    return %arg0, %arg1 : i32, i32
  }
}

module attributes {stable_mosaic.version = 11 : i64} {
  func.func @_matmul_bias_relu_kernel(%arg0: i32, %arg1: i32, %arg2: memref<8x384xbf16, #tpu.memory_space<vmem>>, %arg3: memref<384x64xbf16, #tpu.memory_space<vmem>>, %arg4: memref<1x64xf32, #tpu.memory_space<vmem>>, %arg5: memref<8x64xbf16, #tpu.memory_space<vmem>>) attributes {dimension_semantics = [#tpu.dimension_semantics<parallel>, #tpu.dimension_semantics<parallel>], iteration_bounds = array<i64: 1, 1>, scalar_prefetch = 0 : i64, scratch_operands = 0 : i64, tpu.core_type = #tpu.core_type<tc>, window_params = [{transform_indices = @transform_0, window_bounds = array<i64: 8, 384>}, {transform_indices = @transform_1, window_bounds = array<i64: 384, 64>}, {transform_indices = @transform_2, window_bounds = array<i64: 1, 64>}, {transform_indices = @transform_3, window_bounds = array<i64: 8, 64>}]} {
    %c0 = arith.constant 0 : index
    %c0_0 = arith.constant 0 : index
    %0 = vector.load %arg2[%c0, %c0_0] : memref<8x384xbf16, #tpu.memory_space<vmem>>, vector<8x384xbf16>
    %c0_1 = arith.constant 0 : index
    %c0_2 = arith.constant 0 : index
    %1 = vector.load %arg3[%c0_1, %c0_2] : memref<384x64xbf16, #tpu.memory_space<vmem>>, vector<384x64xbf16>
    %cst = arith.constant dense<0.000000e+00> : vector<8x64xf32>
    %2 = tpu.matmul %0, %1, %cst {dimension_numbers = #tpu.dot_dimension_numbers<[1], [0], [0], [1], [0, 0, 1, 1], [], []>} : vector<8x384xbf16>, vector<384x64xbf16>, vector<8x64xf32> -> vector<8x64xf32>
    %c0_3 = arith.constant 0 : index
    %c0_4 = arith.constant 0 : index
    %3 = vector.load %arg4[%c0_3, %c0_4] : memref<1x64xf32, #tpu.memory_space<vmem>>, vector<1x64xf32>
    %4 = vector.broadcast %3 : vector<1x64xf32> to vector<8x64xf32>
    %5 = arith.addf %2, %4 : vector<8x64xf32>
    %cst_5 = arith.constant 0.000000e+00 : f32
    %6 = vector.broadcast %cst_5 : f32 to vector<8x64xf32>
    %7 = arith.maximumf %5, %6 : vector<8x64xf32>
    %8 = arith.truncf %7 : vector<8x64xf32> to vector<8x64xbf16>
    %c0_6 = arith.constant 0 : index
    %c0_7 = arith.constant 0 : index
    %9 = vector.load %arg5[%c0_6, %c0_7] : memref<8x64xbf16, #tpu.memory_space<vmem>>, vector<8x64xbf16>
    tpu.vector_store %arg5[%c0_6, %c0_7], %8 {strides = array<i32>} : memref<8x64xbf16, #tpu.memory_space<vmem>>, vector<8x64xbf16>,
    return
  }
  func.func @transform_0(%arg0: i32, %arg1: i32) -> (i32, i32) {
    %c0_i32 = arith.constant 0 : i32
    %c0_i32_0 = arith.constant 0 : i32
    return %arg0, %c0_i32 : i32, i32
  }
  func.func @transform_1(%arg0: i32, %arg1: i32) -> (i32, i32) {
    %c0_i32 = arith.constant 0 : i32
    %c0_i32_0 = arith.constant 0 : i32
    return %c0_i32, %arg1 : i32, i32
  }
  func.func @transform_2(%arg0: i32, %arg1: i32) -> (i32, i32) {
    %c0_i32 = arith.constant 0 : i32
    %c0_i32_0 = arith.constant 0 : i32
    return %c0_i32, %arg1 : i32, i32
  }
  func.func @transform_3(%arg0: i32, %arg1: i32) -> (i32, i32) {
    %c0_i32 = arith.constant 0 : i32
    return %arg0, %arg1 : i32, i32
  }
}

module attributes {stable_mosaic.version = 11 : i64} {
  func.func @_matmul_bias_relu_kernel(%arg0: i32, %arg1: i32, %arg2: memref<8x640xbf16, #tpu.memory_space<vmem>>, %arg3: memref<640x64xbf16, #tpu.memory_space<vmem>>, %arg4: memref<1x64xf32, #tpu.memory_space<vmem>>, %arg5: memref<8x64xbf16, #tpu.memory_space<vmem>>) attributes {dimension_semantics = [#tpu.dimension_semantics<parallel>, #tpu.dimension_semantics<parallel>], iteration_bounds = array<i64: 1, 1>, scalar_prefetch = 0 : i64, scratch_operands = 0 : i64, tpu.core_type = #tpu.core_type<tc>, window_params = [{transform_indices = @transform_0, window_bounds = array<i64: 8, 640>}, {transform_indices = @transform_1, window_bounds = array<i64: 640, 64>}, {transform_indices = @transform_2, window_bounds = array<i64: 1, 64>}, {transform_indices = @transform_3, window_bounds = array<i64: 8, 64>}]} {
    %c0 = arith.constant 0 : index
    %c0_0 = arith.constant 0 : index
    %0 = vector.load %arg2[%c0, %c0_0] : memref<8x640xbf16, #tpu.memory_space<vmem>>, vector<8x640xbf16>
    %c0_1 = arith.constant 0 : index
    %c0_2 = arith.constant 0 : index
    %1 = vector.load %arg3[%c0_1, %c0_2] : memref<640x64xbf16, #tpu.memory_space<vmem>>, vector<640x64xbf16>
    %cst = arith.constant dense<0.000000e+00> : vector<8x64xf32>
    %2 = tpu.matmul %0, %1, %cst {dimension_numbers = #tpu.dot_dimension_numbers<[1], [0], [0], [1], [0, 0, 1, 1], [], []>} : vector<8x640xbf16>, vector<640x64xbf16>, vector<8x64xf32> -> vector<8x64xf32>
    %c0_3 = arith.constant 0 : index
    %c0_4 = arith.constant 0 : index
    %3 = vector.load %arg4[%c0_3, %c0_4] : memref<1x64xf32, #tpu.memory_space<vmem>>, vector<1x64xf32>
    %4 = vector.broadcast %3 : vector<1x64xf32> to vector<8x64xf32>
    %5 = arith.addf %2, %4 : vector<8x64xf32>
    %cst_5 = arith.constant 0.000000e+00 : f32
    %6 = vector.broadcast %cst_5 : f32 to vector<8x64xf32>
    %7 = arith.maximumf %5, %6 : vector<8x64xf32>
    %8 = arith.truncf %7 : vector<8x64xf32> to vector<8x64xbf16>
    %c0_6 = arith.constant 0 : index
    %c0_7 = arith.constant 0 : index
    %9 = vector.load %arg5[%c0_6, %c0_7] : memref<8x64xbf16, #tpu.memory_space<vmem>>, vector<8x64xbf16>
    tpu.vector_store %arg5[%c0_6, %c0_7], %8 {strides = array<i32>} : memref<8x64xbf16, #tpu.memory_space<vmem>>, vector<8x64xbf16>,
    return
  }
  func.func @transform_0(%arg0: i32, %arg1: i32) -> (i32, i32) {
    %c0_i32 = arith.constant 0 : i32
    %c0_i32_0 = arith.constant 0 : i32
    return %arg0, %c0_i32 : i32, i32
  }
  func.func @transform_1(%arg0: i32, %arg1: i32) -> (i32, i32) {
    %c0_i32 = arith.constant 0 : i32
    %c0_i32_0 = arith.constant 0 : i32
    return %c0_i32, %arg1 : i32, i32
  }
  func.func @transform_2(%arg0: i32, %arg1: i32) -> (i32, i32) {
    %c0_i32 = arith.constant 0 : i32
    %c0_i32_0 = arith.constant 0 : i32
    return %c0_i32, %arg1 : i32, i32
  }
  func.func @transform_3(%arg0: i32, %arg1: i32) -> (i32, i32) {
    %c0_i32 = arith.constant 0 : i32
    return %arg0, %arg1 : i32, i32
  }
}

module attributes {stable_mosaic.version = 11 : i64} {
  func.func @_matmul_bias_relu_kernel(%arg0: i32, %arg1: i32, %arg2: memref<2x256xbf16, #tpu.memory_space<vmem>>, %arg3: memref<256x32xbf16, #tpu.memory_space<vmem>>, %arg4: memref<1x32xf32, #tpu.memory_space<vmem>>, %arg5: memref<2x32xf32, #tpu.memory_space<vmem>>) attributes {dimension_semantics = [#tpu.dimension_semantics<parallel>, #tpu.dimension_semantics<parallel>], iteration_bounds = array<i64: 1, 1>, scalar_prefetch = 0 : i64, scratch_operands = 0 : i64, tpu.core_type = #tpu.core_type<tc>, window_params = [{transform_indices = @transform_0, window_bounds = array<i64: 2, 256>}, {transform_indices = @transform_1, window_bounds = array<i64: 256, 32>}, {transform_indices = @transform_2, window_bounds = array<i64: 1, 32>}, {transform_indices = @transform_3, window_bounds = array<i64: 2, 32>}]} {
    %c0 = arith.constant 0 : index
    %c0_0 = arith.constant 0 : index
    %0 = vector.load %arg2[%c0, %c0_0] : memref<2x256xbf16, #tpu.memory_space<vmem>>, vector<2x256xbf16>
    %c0_1 = arith.constant 0 : index
    %c0_2 = arith.constant 0 : index
    %1 = vector.load %arg3[%c0_1, %c0_2] : memref<256x32xbf16, #tpu.memory_space<vmem>>, vector<256x32xbf16>
    %cst = arith.constant dense<0.000000e+00> : vector<2x32xf32>
    %2 = tpu.matmul %0, %1, %cst {dimension_numbers = #tpu.dot_dimension_numbers<[1], [0], [0], [1], [0, 0, 1, 1], [], []>} : vector<2x256xbf16>, vector<256x32xbf16>, vector<2x32xf32> -> vector<2x32xf32>
    %c0_3 = arith.constant 0 : index
    %c0_4 = arith.constant 0 : index
    %3 = vector.load %arg4[%c0_3, %c0_4] : memref<1x32xf32, #tpu.memory_space<vmem>>, vector<1x32xf32>
    %4 = vector.broadcast %3 : vector<1x32xf32> to vector<2x32xf32>
    %5 = arith.addf %2, %4 : vector<2x32xf32>
    %cst_5 = arith.constant 0.000000e+00 : f32
    %6 = vector.broadcast %cst_5 : f32 to vector<2x32xf32>
    %7 = arith.maximumf %5, %6 : vector<2x32xf32>
    %c0_6 = arith.constant 0 : index
    %c0_7 = arith.constant 0 : index
    %8 = vector.load %arg5[%c0_6, %c0_7] : memref<2x32xf32, #tpu.memory_space<vmem>>, vector<2x32xf32>
    tpu.vector_store %arg5[%c0_6, %c0_7], %7 {strides = array<i32>} : memref<2x32xf32, #tpu.memory_space<vmem>>, vector<2x32xf32>,
    return
  }
  func.func @transform_0(%arg0: i32, %arg1: i32) -> (i32, i32) {
    %c0_i32 = arith.constant 0 : i32
    %c0_i32_0 = arith.constant 0 : i32
    return %arg0, %c0_i32 : i32, i32
  }
  func.func @transform_1(%arg0: i32, %arg1: i32) -> (i32, i32) {
    %c0_i32 = arith.constant 0 : i32
    %c0_i32_0 = arith.constant 0 : i32
    return %c0_i32, %arg1 : i32, i32
  }
  func.func @transform_2(%arg0: i32, %arg1: i32) -> (i32, i32) {
    %c0_i32 = arith.constant 0 : i32
    %c0_i32_0 = arith.constant 0 : i32
    return %c0_i32, %arg1 : i32, i32
  }
  func.func @transform_3(%arg0: i32, %arg1: i32) -> (i32, i32) {
    %c0_i32 = arith.constant 0 : i32
    return %arg0, %arg1 : i32, i32
  }
}

</mosaic_0001>

<bundles_post_ra>
// kernel: tpu_custom_call.1
= control target key start
LH: loop header
LB: loop body
LE: loop exit
PB: predicated region body
PF: predicated region fallthrough
CT: control target
= control target key end

     0   :  { %s520_s12 = smov 0   ;;  %s522_s13 = smov 0   ;;  %s562_s0 = inlined_call_operand.vmem [shape: bf16[32,27], index: 0, kind: input, shape index: {}]   ;;  %s563_s1 = inlined_call_operand.vmem [shape: bf16[27,24], index: 1, kind: input, shape index: {}]   ;;  %s564_s2 = inlined_call_operand.vmem [shape: f32[1,24], index: 2, kind: input, shape index: {}]   ;;  %s565_s3 = inlined_call_operand.vmem [shape: f32[32,24], index: 3, kind: output, shape index: {}]  }
   0x1   :  { %s524_s14 = smov 0  }
   0x2 LB: > { %s25_s15 = sadd.s32 1, %s491_s13  ;;  %p420_p0 = scmp.ge.s32.totalorder %s495_s14, 1  ;;  %s495_s14 = sphi %s524_s14, %s13_s14   ;;  %s491_s13 = sphi %s522_s13, %s567_s13   ;;  %s487_s12 = sphi %s520_s12, %s566_s12  }
   0x3   : > { %p27_p1 = scmp.ge.s32.totalorder %s25_s15, 2  ;;  %p169_p2 = scmp.lt.s32.totalorder %s495_s14, 3 }
   0x5   : > { %s569_s15 = smov (%p27_p1, %s25_s15), 0  ;;  %p170_p3 = pnand %p420_p0, %p169_p2 }
   0x6   : > { %s421_s18 = sshll.u32 (!%p170_p3), %s487_s12, 1 }
   0x7   : > { %173 = sbr.rel (%p170_p3) target bundleno = 226 (0xe2), region = 32  ;;  %p204_p4 = scmp.lt.s32.totalorder (!%p170_p3), %s421_s18, 3 }
   0xc   : > { %vm259_vm0 = vcmask 1044480   ;;  %v497_v0 = vmov 0.0   ;;  %v470_v1 = vld [vmem:[%s563_s1 + $0x8] sm:$0x3f]   ;;  %vm260_vm1 = vcmask 1045504   ;;  %v498_v2 = vmov 65535  }
   0xd   : > { %435 = vmatprep.subr.bf16.mxu0 %v497_v0  ;;  %v261_v3 = vsel %vm259_vm0, 4294967295, %v498_v2  ;;  %vm499_vm2 = vmmov 0   ;;  %s571_s18 = smov (!%p204_p4, %s421_s18), 3  ;;  %v471_v6 = vld [vmem:[%s563_s1] sm:$0xff]   ;;  %vm255_vm3 = vcmask 220160   ;;  %vm309_vm4 = vcmask 195584  }
   0xe   : > { %v262_v4 = vsel %vm260_vm1, %v261_v3, 0  ;;  %439 = vmatprep.mubr.msk.bf16.mxu0 %vm499_vm2, %v497_v0  ;;  %s422_s21 = sshll.u32 %s571_s18, 2  ;;  %v425_v8 = vld [vmem:[%s564_s2] ss:$0 sm:$0xff]  ;;  %s424_s27 = sshll.u32 %s571_s18, 3 }
   0xf   : > { %v264_v5 = vand.u32 %v470_v1, %v262_v4  ;;  %s207_s24 = scalar_lea.vmem %s562_s0, %s422_s21  ;;  %s223_s30 = scalar_lea.vmem %s565_s3, %s424_s27 }
  0x10   : > { %v472_v7 = vld [vmem:[%s207_s24] sm:$0xff]  }
  0x11   : > { %436 = vmatpush3.bf16.msra.mxu0 %v264_v5 }
  0x12   : > { %437 = vmatprep.subr.bf16.mxu0 %v497_v0 }
  0x15   : > { %438 = vmatpush3.bf16.msra.mxu0 %v471_v6 }
  0x18   : > { %440 = vmatmul.mubr.msk.bf16.vlgmr.msra.gmra.mxu0 %vm255_vm3, %v472_v7 }
  0xd8   : > { %v300_v9 = vpop.f32.mrf.mxu0 }
  0xd9   : > { %v301_v10 = vadd.f32 %v425_v8, %v300_v9 }
  0xda   : > { %v441_v11 = vpop.f32.mrf.mxu0 }
  0xdb   : > { %v307_v12 = vmax.f32 %v301_v10, 0.0 }
  0xdc   : > { %v303_v13 = vpop.f32.mrf.mxu0 }
  0xdd   : > { %310 = vst.msk [vmem:[%s223_s30] sm:$0xff] %vm309_vm4, %v307_v12  ;;  %v304_v14 = vadd.f32 %v425_v8, %v303_v13 }
  0xde   : > { %v442_v15 = vpop.f32.mrf.mxu0 }
  0xdf   : > { %v308_v16 = vmax.f32 %v304_v14, 0.0 }
  0xe1   : > { %311 = vst.msk [vmem:[%s223_s30 + $0x8] sm:$0xff] %vm309_vm4, %v308_v16 }
  0xe2 PF: > { %s13_s14 = sadd.s32 1, %s495_s14   ;;  %s566_s12 = smov %s491_s13 }
  0xe3   : > { %p10_p5 = scmp.ge.s32.totalorder %s13_s14, 4   ;;  %s567_s13 = smov %s569_s15 }
  0xe5   :  { %12 = sbr.rel (!%p10_p5) target bundleno = 2 (0x2), region = 68 }

// kernel: encoder_forward.11
= control target key start
LH: loop header
LB: loop body
LE: loop exit
PB: predicated region body
PF: predicated region fallthrough
CT: control target
= control target key end

     0   :  { %s2940_s12 = smov 0   ;;  %s2942_s13 = smov 0   ;;  %s3466_s0 = inlined_call_operand.vmem [shape: bf16[2048,128], index: 0, kind: input, shape index: {}]   ;;  %s3467_s1 = inlined_call_operand.vmem [shape: bf16[128,4], index: 1, kind: input, shape index: {}]   ;;  %s3468_s2 = inlined_call_operand.vmem [shape: f32[1,4], index: 2, kind: input, shape index: {}]   ;;  %s3469_s3 = inlined_call_operand.vmem [shape: bf16[2048,4], index: 3, kind: output, shape index: {}]  }
   0x1   :  { %s2944_s14 = smov 0  }
   0x2 LB: > { %s25_s15 = sadd.s32 1, %s2914_s13  ;;  %p2231_p0 = scmp.ge.s32.totalorder %s2918_s14, 1  ;;  %s2918_s14 = sphi %s2944_s14, %s13_s14   ;;  %s2914_s13 = sphi %s2942_s13, %s3471_s13   ;;  %s2910_s12 = sphi %s2940_s12, %s3470_s12  }
   0x3   : > { %p27_p1 = scmp.ge.s32.totalorder %s25_s15, 2  ;;  %p169_p2 = scmp.lt.s32.totalorder %s2918_s14, 3 }
   0x5   : > { %s3473_s15 = smov (%p27_p1, %s25_s15), 0  ;;  %p170_p3 = pnand %p2231_p0, %p169_p2 }
   0x6   : > { %s2232_s18 = sshll.u32 (!%p170_p3), %s2910_s12, 7 }
   0x7   : > { %173 = sbr.rel (%p170_p3) target bundleno = 372 (0x174), region = 32  ;;  %p204_p4 = scmp.lt.s32.totalorder (!%p170_p3), %s2232_s18, 255 }
   0xc   : > { %v2823_v0 = vld [vmem:[%s3467_s1 + $0x38] sm:$0xff]   ;;  %v2824_v1 = vld [vmem:[%s3467_s1 + $0x30] sm:$0xff]   ;;  %s3475_s18 = smov (!%p204_p4, %s2232_s18), 255  ;;  %v2825_v2 = vld [vmem:[%s3467_s1 + $0x28] sm:$0xff]   ;;  %vm1994_vm0 = vcmask 27648  }
   0xd   : > { %2639 = vmatprep.subr.bf16.mxu0 %v2823_v0  ;;  %2783 = vmatprep.subr.bf16.mxu1 %v2823_v0  ;;  %s2233_s23 = sshll.u32 %s3475_s18, 2  ;;  %v2826_v3 = vld [vmem:[%s3467_s1 + $0x20] sm:$0xff]   ;;  %v2827_v6 = vld [vmem:[%s3467_s1 + $0x18] sm:$0xff]   ;;  %v2828_v7 = vld [vmem:[%s3467_s1 + $0x10] sm:$0xff]  }
   0xe   : > { %2640 = vmatpush3.bf16.msra.mxu0 %v2823_v0  ;;  %2791 = vmatpush3.bf16.msra.mxu1 %v2823_v0  ;;  %s2975_s26 = scalar_lea.vmem %s3466_s0, %s2233_s23  ;;  %v2829_v8 = vld [vmem:[%s3467_s1 + $0x8] sm:$0xff]   ;;  %v2830_v9 = vld [vmem:[%s3467_s1] sm:$0xff]   ;;  %s3070_s17 = scalar_lea.vmem %s3469_s3, %s2233_s23 }
   0xf   : > { %2641 = vmatprep.subr.bf16.mxu0 %v2824_v1  ;;  %2784 = vmatprep.subr.bf16.mxu1 %v2824_v1  ;;  %v2831_v4 = vld [vmem:[%s2975_s26] sm:$0xff]   ;;  %v2833_v10 = vld [vmem:[%s2975_s26 + $0x8] sm:$0xff]   ;;  %v2835_v12 = vld [vmem:[%s2975_s26 + $0x10] sm:$0xff]  }
  0x10   : > { %v2832_v5 = vld [vmem:[%s2975_s26 + $0x100] sm:$0xff]   ;;  %2655 = vmatprep.mubr.bf16.mxu0 %v2831_v4  ;;  %v2834_v11 = vld [vmem:[%s2975_s26 + $0x108] sm:$0xff]   ;;  %v2836_v13 = vld [vmem:[%s2975_s26 + $0x110] sm:$0xff]  }
  0x11   : > { %2719 = vmatprep.mubr.bf16.mxu1 %v2832_v5  ;;  %v2837_v14 = vld [vmem:[%s2975_s26 + $0x18] sm:$0xff]   ;;  %v2839_v16 = vld [vmem:[%s2975_s26 + $0x20] sm:$0xff]   ;;  %v2841_v18 = vld [vmem:[%s2975_s26 + $0x28] sm:$0xff]  }
  0x12   : > { %2642 = vmatpush3.bf16.msra.mxu0 %v2824_v1  ;;  %2792 = vmatpush3.bf16.msra.mxu1 %v2824_v1  ;;  %v2838_v15 = vld [vmem:[%s2975_s26 + $0x118] sm:$0xff]   ;;  %v2840_v17 = vld [vmem:[%s2975_s26 + $0x120] sm:$0xff]   ;;  %v2842_v19 = vld [vmem:[%s2975_s26 + $0x128] sm:$0xff]  }
  0x13   : > { %2643 = vmatprep.subr.bf16.mxu0 %v2825_v2  ;;  %2785 = vmatprep.subr.bf16.mxu1 %v2825_v2  ;;  %v2843_v20 = vld [vmem:[%s2975_s26 + $0x30] sm:$0xff]   ;;  %v2845_v22 = vld [vmem:[%s2975_s26 + $0x38] sm:$0xff]   ;;  %v2847_v24 = vld [vmem:[%s2975_s26 + $0x40] sm:$0xff]  }
  0x14   : > { %v2844_v21 = vld [vmem:[%s2975_s26 + $0x130] sm:$0xff]   ;;  %v2846_v23 = vld [vmem:[%s2975_s26 + $0x138] sm:$0xff]   ;;  %v2848_v25 = vld [vmem:[%s2975_s26 + $0x140] sm:$0xff]  }
  0x15   : > { %v2849_v26 = vld [vmem:[%s2975_s26 + $0x48] sm:$0xff]   ;;  %v2851_v28 = vld [vmem:[%s2975_s26 + $0x50] sm:$0xff]   ;;  %v2853_v30 = vld [vmem:[%s2975_s26 + $0x58] sm:$0xff]  }
  0x16   : > { %2644 = vmatpush3.bf16.msra.mxu0 %v2825_v2  ;;  %2793 = vmatpush3.bf16.msra.mxu1 %v2825_v2  ;;  %v2850_v27 = vld [vmem:[%s2975_s26 + $0x148] sm:$0xff]   ;;  %v2852_v29 = vld [vmem:[%s2975_s26 + $0x150] sm:$0xff]   ;;  %v2854_v31 = vld [vmem:[%s2975_s26 + $0x158] sm:$0xff]  }
  0x17   : > { %2645 = vmatprep.subr.bf16.mxu0 %v2826_v3  ;;  %2786 = vmatprep.subr.bf16.mxu1 %v2826_v3  ;;  %v2855_v32 = vld [vmem:[%s2975_s26 + $0x60] sm:$0xff]   ;;  %v2857_v34 = vld [vmem:[%s2975_s26 + $0x68] sm:$0xff]   ;;  %v2859_v36 = vld [vmem:[%s2975_s26 + $0x70] sm:$0xff]  }
  0x18   : > { %v2856_v33 = vld [vmem:[%s2975_s26 + $0x160] sm:$0xff]   ;;  %v2858_v35 = vld [vmem:[%s2975_s26 + $0x168] sm:$0xff]   ;;  %v2860_v37 = vld [vmem:[%s2975_s26 + $0x170] sm:$0xff]  }
  0x19   : > { %v2861_v38 = vld [vmem:[%s2975_s26 + $0x78] sm:$0xff]   ;;  %v2863_v40 = vld [vmem:[%s2975_s26 + $0x80] sm:$0xff]   ;;  %v2865_v42 = vld [vmem:[%s2975_s26 + $0x88] sm:$0xff]  }
  0x1a   : > { %2646 = vmatpush3.bf16.msra.mxu0 %v2826_v3  ;;  %2794 = vmatpush3.bf16.msra.mxu1 %v2826_v3  ;;  %v2862_v39 = vld [vmem:[%s2975_s26 + $0x178] sm:$0xff]   ;;  %v2864_v41 = vld [vmem:[%s2975_s26 + $0x180] sm:$0xff]   ;;  %v2866_v43 = vld [vmem:[%s2975_s26 + $0x188] sm:$0xff]  }
  0x1b   : > { %2647 = vmatprep.subr.bf16.mxu0 %v2827_v6  ;;  %2787 = vmatprep.subr.bf16.mxu1 %v2827_v6  ;;  %v2867_v44 = vld [vmem:[%s2975_s26 + $0x90] sm:$0xff]   ;;  %v2869_v46 = vld [vmem:[%s2975_s26 + $0x98] sm:$0xff]   ;;  %v2871_v48 = vld [vmem:[%s2975_s26 + $0xa0] sm:$0xff]  }
  0x1c   : > { %v2868_v45 = vld [vmem:[%s2975_s26 + $0x190] sm:$0xff]   ;;  %v2870_v47 = vld [vmem:[%s2975_s26 + $0x198] sm:$0xff]   ;;  %v2872_v49 = vld [vmem:[%s2975_s26 + $0x1a0] sm:$0xff]  }
  0x1d   : > { %v2873_v50 = vld [vmem:[%s2975_s26 + $0xa8] sm:$0xff]   ;;  %v2875_v52 = vld [vmem:[%s2975_s26 + $0xb0] sm:$0xff]   ;;  %v2877_v54 = vld [vmem:[%s2975_s26 + $0xb8] sm:$0xff]  }
  0x1e   : > { %2648 = vmatpush3.bf16.msra.mxu0 %v2827_v6  ;;  %2795 = vmatpush3.bf16.msra.mxu1 %v2827_v6  ;;  %v2874_v51 = vld [vmem:[%s2975_s26 + $0x1a8] sm:$0xff]   ;;  %v2876_v53 = vld [vmem:[%s2975_s26 + $0x1b0] sm:$0xff]   ;;  %v2878_v55 = vld [vmem:[%s2975_s26 + $0x1b8] sm:$0xff]  }
  0x1f   : > { %2649 = vmatprep.subr.bf16.mxu0 %v2828_v7  ;;  %2788 = vmatprep.subr.bf16.mxu1 %v2828_v7  ;;  %v2879_v56 = vld [vmem:[%s2975_s26 + $0xc0] sm:$0xff]   ;;  %v2881_v58 = vld [vmem:[%s2975_s26 + $0xc8] sm:$0xff]   ;;  %v2883_v60 = vld [vmem:[%s2975_s26 + $0xd0] sm:$0xff]  }
  0x20   : > { %v2880_v57 = vld [vmem:[%s2975_s26 + $0x1c0] sm:$0xff]   ;;  %v2882_v59 = vld [vmem:[%s2975_s26 + $0x1c8] sm:$0xff]   ;;  %v2884_v61 = vld [vmem:[%s2975_s26 + $0x1d0] sm:$0xff]  }
  0x21   : > { %v2885_v62 = vld [vmem:[%s2975_s26 + $0xd8] sm:$0xff]   ;;  %v2887_v0 = vld [vmem:[%s2975_s26 + $0xe0] sm:$0xff]   ;;  %v2889_v2 = vld [vmem:[%s2975_s26 + $0xe8] sm:$0xff]  }
  0x22   : > { %2650 = vmatpush3.bf16.msra.mxu0 %v2828_v7  ;;  %2796 = vmatpush3.bf16.msra.mxu1 %v2828_v7  ;;  %v2886_v63 = vld [vmem:[%s2975_s26 + $0x1d8] sm:$0xff]   ;;  %v2888_v1 = vld [vmem:[%s2975_s26 + $0x1e0] sm:$0xff]   ;;  %v2890_v3 = vld [vmem:[%s2975_s26 + $0x1e8] sm:$0xff]  }
  0x23   : > { %2651 = vmatprep.subr.bf16.mxu0 %v2829_v8  ;;  %2789 = vmatprep.subr.bf16.mxu1 %v2829_v8  ;;  %v2891_v4 = vld [vmem:[%s2975_s26 + $0xf0] sm:$0xff]   ;;  %v2893_v6 = vld [vmem:[%s2975_s26 + $0xf8] sm:$0xff]  }
  0x24   : > { %v2892_v5 = vld [vmem:[%s2975_s26 + $0x1f0] sm:$0xff]   ;;  %v2894_v7 = vld [vmem:[%s2975_s26 + $0x1f8] sm:$0xff]  }
  0x26   : > { %2652 = vmatpush3.bf16.msra.mxu0 %v2829_v8  ;;  %2797 = vmatpush3.bf16.msra.mxu1 %v2829_v8  ;;  %v3059_v8 = vld [vmem:[%s3468_s2] ss:$0 sm:$0xff] }
  0x27   : > { %2653 = vmatprep.subr.bf16.mxu0 %v2830_v9  ;;  %2790 = vmatprep.subr.bf16.mxu1 %v2830_v9 }
  0x2a   : > { %2654 = vmatpush3.bf16.msra.mxu0 %v2830_v9  ;;  %2798 = vmatpush3.bf16.msra.mxu1 %v2830_v9 }
  0x2d   : > { %2656 = vmatmul.mubr.bf16.vlgmr.msra.gmra.mxu0 %v2833_v10  ;;  %2720 = vmatmul.mubr.bf16.vlgmr.msra.gmra.mxu1 %v2834_v11 }
  0x2e   : > { %2659 = vmatprep.mubr.bf16.mxu0 %v2835_v12  ;;  %2723 = vmatprep.mubr.bf16.mxu1 %v2836_v13 }
  0x35   : > { %2660 = vmatmul.mubr.bf16.gmra.mxu0 %v2837_v14  ;;  %2724 = vmatmul.mubr.bf16.gmra.mxu1 %v2838_v15 }
  0x36   : > { %2663 = vmatprep.mubr.bf16.mxu0 %v2839_v16  ;;  %2727 = vmatprep.mubr.bf16.mxu1 %v2840_v17 }
  0x3d   : > { %2664 = vmatmul.mubr.bf16.gmra.mxu0 %v2841_v18  ;;  %2728 = vmatmul.mubr.bf16.gmra.mxu1 %v2842_v19 }
  0x3e   : > { %2667 = vmatprep.mubr.bf16.mxu0 %v2843_v20  ;;  %2731 = vmatprep.mubr.bf16.mxu1 %v2844_v21 }
  0x45   : > { %2668 = vmatmul.mubr.bf16.gmra.mxu0 %v2845_v22  ;;  %2732 = vmatmul.mubr.bf16.gmra.mxu1 %v2846_v23 }
  0x46   : > { %2671 = vmatprep.mubr.bf16.mxu0 %v2847_v24  ;;  %2735 = vmatprep.mubr.bf16.mxu1 %v2848_v25 }
  0x4d   : > { %2672 = vmatmul.mubr.bf16.gmra.mxu0 %v2849_v26  ;;  %2736 = vmatmul.mubr.bf16.gmra.mxu1 %v2850_v27 }
  0x4e   : > { %2675 = vmatprep.mubr.bf16.mxu0 %v2851_v28  ;;  %2739 = vmatprep.mubr.bf16.mxu1 %v2852_v29 }
  0x55   : > { %2676 = vmatmul.mubr.bf16.gmra.mxu0 %v2853_v30  ;;  %2740 = vmatmul.mubr.bf16.gmra.mxu1 %v2854_v31 }
  0x56   : > { %2679 = vmatprep.mubr.bf16.mxu0 %v2855_v32  ;;  %2743 = vmatprep.mubr.bf16.mxu1 %v2856_v33 }
  0x5d   : > { %2680 = vmatmul.mubr.bf16.gmra.mxu0 %v2857_v34  ;;  %2744 = vmatmul.mubr.bf16.gmra.mxu1 %v2858_v35 }
  0x5e   : > { %2683 = vmatprep.mubr.bf16.mxu0 %v2859_v36  ;;  %2747 = vmatprep.mubr.bf16.mxu1 %v2860_v37 }
  0x65   : > { %2684 = vmatmul.mubr.bf16.gmra.mxu0 %v2861_v38  ;;  %2748 = vmatmul.mubr.bf16.gmra.mxu1 %v2862_v39 }
  0x66   : > { %2687 = vmatprep.mubr.bf16.mxu0 %v2863_v40  ;;  %2751 = vmatprep.mubr.bf16.mxu1 %v2864_v41 }
  0x6d   : > { %2688 = vmatmul.mubr.bf16.gmra.mxu0 %v2865_v42  ;;  %2752 = vmatmul.mubr.bf16.gmra.mxu1 %v2866_v43 }
  0x6e   : > { %2691 = vmatprep.mubr.bf16.mxu0 %v2867_v44  ;;  %2755 = vmatprep.mubr.bf16.mxu1 %v2868_v45 }
  0x75   : > { %2692 = vmatmul.mubr.bf16.gmra.mxu0 %v2869_v46  ;;  %2756 = vmatmul.mubr.bf16.gmra.mxu1 %v2870_v47 }
  0x76   : > { %2695 = vmatprep.mubr.bf16.mxu0 %v2871_v48  ;;  %2759 = vmatprep.mubr.bf16.mxu1 %v2872_v49 }
  0x7d   : > { %2696 = vmatmul.mubr.bf16.gmra.mxu0 %v2873_v50  ;;  %2760 = vmatmul.mubr.bf16.gmra.mxu1 %v2874_v51 }
  0x7e   : > { %2699 = vmatprep.mubr.bf16.mxu0 %v2875_v52  ;;  %2763 = vmatprep.mubr.bf16.mxu1 %v2876_v53 }
  0x85   : > { %2700 = vmatmul.mubr.bf16.gmra.mxu0 %v2877_v54  ;;  %2764 = vmatmul.mubr.bf16.gmra.mxu1 %v2878_v55 }
  0x86   : > { %2703 = vmatprep.mubr.bf16.mxu0 %v2879_v56  ;;  %2767 = vmatprep.mubr.bf16.mxu1 %v2880_v57 }
  0x8d   : > { %2704 = vmatmul.mubr.bf16.gmra.mxu0 %v2881_v58  ;;  %2768 = vmatmul.mubr.bf16.gmra.mxu1 %v2882_v59 }
  0x8e   : > { %2707 = vmatprep.mubr.bf16.mxu0 %v2883_v60  ;;  %2771 = vmatprep.mubr.bf16.mxu1 %v2884_v61 }
  0x95   : > { %2708 = vmatmul.mubr.bf16.gmra.mxu0 %v2885_v62  ;;  %2772 = vmatmul.mubr.bf16.gmra.mxu1 %v2886_v63 }
  0x96   : > { %2711 = vmatprep.mubr.bf16.mxu0 %v2887_v0  ;;  %2775 = vmatprep.mubr.bf16.mxu1 %v2888_v1 }
  0x9d   : > { %2712 = vmatmul.mubr.bf16.gmra.mxu0 %v2889_v2  ;;  %2776 = vmatmul.mubr.bf16.gmra.mxu1 %v2890_v3 }
  0x9e   : > { %2715 = vmatprep.mubr.bf16.mxu0 %v2891_v4  ;;  %2779 = vmatprep.mubr.bf16.mxu1 %v2892_v5 }
  0xa5   : > { %2716 = vmatmul.mubr.bf16.gmra.mxu0 %v2893_v6  ;;  %2780 = vmatmul.mubr.bf16.gmra.mxu1 %v2894_v7 }
  0xed   : > { %v2657_v9 = vpop.f32.mrf.mxu0  ;;  %v2721_v10 = vpop.f32.mrf.mxu1 }
  0xee   : > { %v852_v11 = vadd.f32 %v2657_v9, %v3059_v8  ;;  %v1108_v12 = vadd.f32 %v2721_v10, %v3059_v8 }
  0xef   : > { %v843_v13 = vpop.f32.mrf.mxu0  ;;  %v1099_v14 = vpop.f32.mrf.mxu1 }
  0xf0   : > { %v1356_v15 = vmax.f32 %v852_v11, 0.0  ;;  %v1420_v16 = vmax.f32 %v1108_v12, 0.0  ;;  %v844_v17 = vadd.f32 %v3059_v8, %v843_v13  ;;  %v1100_v18 = vadd.f32 %v3059_v8, %v1099_v14 }
  0xf1   : > { %v2658_v19 = vpop.f32.mrf.mxu0  ;;  %v2722_v20 = vpop.f32.mrf.mxu1 }
  0xf2   : > { %v2441_v21 = vpack.c.bf16 %v1356_v15, %v1356_v15  ;;  %v2505_v22 = vpack.c.bf16 %v1420_v16, %v1420_v16  ;;  %v1354_v23 = vmax.f32 %v844_v17, 0.0  ;;  %v1418_v24 = vmax.f32 %v1100_v18, 0.0 }
  0xf3   : > { %v855_v25 = vadd.f32 %v2658_v19, %v3059_v8  ;;  %v1111_v26 = vadd.f32 %v2722_v20, %v3059_v8  ;;  %v846_v27 = vpop.f32.mrf.mxu0  ;;  %v1102_v28 = vpop.f32.mrf.mxu1 }
  0xf4   : > { %1997 = vst.msk [vmem:[%s3070_s17 + $0x8] sm:$0xf] %vm1994_vm0, %v2441_v21  ;;  %2061 = vst.msk [vmem:[%s3070_s17 + $0x108] sm:$0xf] %vm1994_vm0, %v2505_v22  ;;  %v2439_v29 = vpack.c.bf16 %v1354_v23, %v1354_v23  ;;  %v2503_v30 = vpack.c.bf16 %v1418_v24, %v1418_v24  ;;  %v847_v31 = vadd.f32 %v3059_v8, %v846_v27 }
  0xf5   : > { %v1103_v32 = vadd.f32 %v3059_v8, %v1102_v28  ;;  %v1357_v33 = vmax.f32 %v855_v25, 0.0  ;;  %v1421_v34 = vmax.f32 %v1111_v26, 0.0  ;;  %v2661_v35 = vpop.f32.mrf.mxu0  ;;  %v2725_v36 = vpop.f32.mrf.mxu1 }
  0xf6   : > { %1995 = vst.msk [vmem:[%s3070_s17] sm:$0xf] %vm1994_vm0, %v2439_v29  ;;  %2059 = vst.msk [vmem:[%s3070_s17 + $0x100] sm:$0xf] %vm1994_vm0, %v2503_v30  ;;  %v1355_v37 = vmax.f32 %v847_v31, 0.0  ;;  %v868_v39 = vadd.f32 %v2661_v35, %v3059_v8  ;;  %v1124_v40 = vadd.f32 %v2725_v36, %v3059_v8 }
  0xf7   : > { %v1419_v38 = vmax.f32 %v1103_v32, 0.0  ;;  %v2442_v41 = vpack.c.bf16 %v1357_v33, %v1357_v33  ;;  %v2506_v42 = vpack.c.bf16 %v1421_v34, %v1421_v34  ;;  %v859_v43 = vpop.f32.mrf.mxu0  ;;  %v1115_v44 = vpop.f32.mrf.mxu1 }
  0xf8   : > { %v2440_v45 = vpack.c.bf16 %v1355_v37, %v1355_v37  ;;  %v1360_v47 = vmax.f32 %v868_v39, 0.0  ;;  %v1424_v48 = vmax.f32 %v1124_v40, 0.0  ;;  %v860_v49 = vadd.f32 %v3059_v8, %v859_v43 }
  0xf9   : > { %v2504_v46 = vpack.c.bf16 %v1419_v38, %v1419_v38  ;;  %1998 = vst.msk [vmem:[%s3070_s17 + $0xc] sm:$0xf] %vm1994_vm0, %v2442_v41  ;;  %2062 = vst.msk [vmem:[%s3070_s17 + $0x10c] sm:$0xf] %vm1994_vm0, %v2506_v42  ;;  %v1116_v50 = vadd.f32 %v3059_v8, %v1115_v44  ;;  %v2662_v51 = vpop.f32.mrf.mxu0  ;;  %v2726_v52 = vpop.f32.mrf.mxu1 }
  0xfa   : > { %1996 = vst.msk [vmem:[%s3070_s17 + $0x4] sm:$0xf] %vm1994_vm0, %v2440_v45  ;;  %v2445_v53 = vpack.c.bf16 %v1360_v47, %v1360_v47  ;;  %v2509_v54 = vpack.c.bf16 %v1424_v48, %v1424_v48  ;;  %v871_v55 = vadd.f32 %v2662_v51, %v3059_v8  ;;  %v1127_v56 = vadd.f32 %v2726_v52, %v3059_v8 }
  0xfb   : > { %2060 = vst.msk [vmem:[%s3070_s17 + $0x104] sm:$0xf] %vm1994_vm0, %v2504_v46  ;;  %v1358_v57 = vmax.f32 %v860_v49, 0.0  ;;  %v1422_v58 = vmax.f32 %v1116_v50, 0.0  ;;  %v862_v59 = vpop.f32.mrf.mxu0  ;;  %v1118_v60 = vpop.f32.mrf.mxu1 }
  0xfc   : > { %2001 = vst.msk [vmem:[%s3070_s17 + $0x18] sm:$0xf] %vm1994_vm0, %v2445_v53  ;;  %2065 = vst.msk [vmem:[%s3070_s17 + $0x118] sm:$0xf] %vm1994_vm0, %v2509_v54  ;;  %v1361_v61 = vmax.f32 %v871_v55, 0.0  ;;  %v1425_v62 = vmax.f32 %v1127_v56, 0.0  ;;  %v863_v63 = vadd.f32 %v3059_v8, %v862_v59  ;;  %v1119_v0 = vadd.f32 %v3059_v8, %v1118_v60 }
  0xfd   : > { %v2443_v1 = vpack.c.bf16 %v1358_v57, %v1358_v57  ;;  %v2507_v2 = vpack.c.bf16 %v1422_v58, %v1422_v58  ;;  %v2665_v3 = vpop.f32.mrf.mxu0  ;;  %v2729_v4 = vpop.f32.mrf.mxu1 }
  0xfe   : > { %v2446_v5 = vpack.c.bf16 %v1361_v61, %v1361_v61  ;;  %v2510_v6 = vpack.c.bf16 %v1425_v62, %v1425_v62  ;;  %v1359_v7 = vmax.f32 %v863_v63, 0.0  ;;  %v1423_v9 = vmax.f32 %v1119_v0, 0.0 }
  0xff   : > { %1999 = vst.msk [vmem:[%s3070_s17 + $0x10] sm:$0xf] %vm1994_vm0, %v2443_v1  ;;  %2063 = vst.msk [vmem:[%s3070_s17 + $0x110] sm:$0xf] %vm1994_vm0, %v2507_v2  ;;  %v884_v10 = vadd.f32 %v2665_v3, %v3059_v8  ;;  %v1140_v11 = vadd.f32 %v2729_v4, %v3059_v8  ;;  %v875_v12 = vpop.f32.mrf.mxu0  ;;  %v1131_v13 = vpop.f32.mrf.mxu1 }
 0x100   : > { %2002 = vst.msk [vmem:[%s3070_s17 + $0x1c] sm:$0xf] %vm1994_vm0, %v2446_v5  ;;  %2066 = vst.msk [vmem:[%s3070_s17 + $0x11c] sm:$0xf] %vm1994_vm0, %v2510_v6  ;;  %v2444_v14 = vpack.c.bf16 %v1359_v7, %v1359_v7  ;;  %v2508_v15 = vpack.c.bf16 %v1423_v9, %v1423_v9  ;;  %v876_v16 = vadd.f32 %v3059_v8, %v875_v12 }
 0x101   : > { %v1132_v17 = vadd.f32 %v3059_v8, %v1131_v13  ;;  %v1364_v18 = vmax.f32 %v884_v10, 0.0  ;;  %v1428_v19 = vmax.f32 %v1140_v11, 0.0  ;;  %v2666_v20 = vpop.f32.mrf.mxu0  ;;  %v2730_v21 = vpop.f32.mrf.mxu1 }
 0x102   : > { %2000 = vst.msk [vmem:[%s3070_s17 + $0x14] sm:$0xf] %vm1994_vm0, %v2444_v14  ;;  %2064 = vst.msk [vmem:[%s3070_s17 + $0x114] sm:$0xf] %vm1994_vm0, %v2508_v15  ;;  %v1362_v22 = vmax.f32 %v876_v16, 0.0  ;;  %v887_v24 = vadd.f32 %v2666_v20, %v3059_v8  ;;  %v1143_v25 = vadd.f32 %v2730_v21, %v3059_v8 }
 0x103   : > { %v1426_v23 = vmax.f32 %v1132_v17, 0.0  ;;  %v2449_v26 = vpack.c.bf16 %v1364_v18, %v1364_v18  ;;  %v2513_v27 = vpack.c.bf16 %v1428_v19, %v1428_v19  ;;  %v878_v28 = vpop.f32.mrf.mxu0  ;;  %v1134_v29 = vpop.f32.mrf.mxu1 }
 0x104   : > { %v2447_v30 = vpack.c.bf16 %v1362_v22, %v1362_v22  ;;  %v1365_v32 = vmax.f32 %v887_v24, 0.0  ;;  %v1429_v33 = vmax.f32 %v1143_v25, 0.0  ;;  %v879_v34 = vadd.f32 %v3059_v8, %v878_v28 }
 0x105   : > { %v2511_v31 = vpack.c.bf16 %v1426_v23, %v1426_v23  ;;  %2005 = vst.msk [vmem:[%s3070_s17 + $0x28] sm:$0xf] %vm1994_vm0, %v2449_v26  ;;  %2069 = vst.msk [vmem:[%s3070_s17 + $0x128] sm:$0xf] %vm1994_vm0, %v2513_v27  ;;  %v1135_v35 = vadd.f32 %v3059_v8, %v1134_v29  ;;  %v2669_v36 = vpop.f32.mrf.mxu0  ;;  %v2733_v37 = vpop.f32.mrf.mxu1 }
 0x106   : > { %2003 = vst.msk [vmem:[%s3070_s17 + $0x20] sm:$0xf] %vm1994_vm0, %v2447_v30  ;;  %v2450_v38 = vpack.c.bf16 %v1365_v32, %v1365_v32  ;;  %v2514_v39 = vpack.c.bf16 %v1429_v33, %v1429_v33  ;;  %v900_v40 = vadd.f32 %v2669_v36, %v3059_v8  ;;  %v1156_v41 = vadd.f32 %v2733_v37, %v3059_v8 }
 0x107   : > { %2067 = vst.msk [vmem:[%s3070_s17 + $0x120] sm:$0xf] %vm1994_vm0, %v2511_v31  ;;  %v1363_v42 = vmax.f32 %v879_v34, 0.0  ;;  %v1427_v43 = vmax.f32 %v1135_v35, 0.0  ;;  %v891_v44 = vpop.f32.mrf.mxu0  ;;  %v1147_v45 = vpop.f32.mrf.mxu1 }
 0x108   : > { %2006 = vst.msk [vmem:[%s3070_s17 + $0x2c] sm:$0xf] %vm1994_vm0, %v2450_v38  ;;  %2070 = vst.msk [vmem:[%s3070_s17 + $0x12c] sm:$0xf] %vm1994_vm0, %v2514_v39  ;;  %v1368_v46 = vmax.f32 %v900_v40, 0.0  ;;  %v1432_v47 = vmax.f32 %v1156_v41, 0.0  ;;  %v892_v48 = vadd.f32 %v3059_v8, %v891_v44  ;;  %v1148_v49 = vadd.f32 %v3059_v8, %v1147_v45 }
 0x109   : > { %v2448_v50 = vpack.c.bf16 %v1363_v42, %v1363_v42  ;;  %v2512_v51 = vpack.c.bf16 %v1427_v43, %v1427_v43  ;;  %v2670_v52 = vpop.f32.mrf.mxu0  ;;  %v2734_v53 = vpop.f32.mrf.mxu1 }
 0x10a   : > { %v2453_v54 = vpack.c.bf16 %v1368_v46, %v1368_v46  ;;  %v2517_v55 = vpack.c.bf16 %v1432_v47, %v1432_v47  ;;  %v1366_v56 = vmax.f32 %v892_v48, 0.0  ;;  %v1430_v57 = vmax.f32 %v1148_v49, 0.0 }
 0x10b   : > { %2004 = vst.msk [vmem:[%s3070_s17 + $0x24] sm:$0xf] %vm1994_vm0, %v2448_v50  ;;  %2068 = vst.msk [vmem:[%s3070_s17 + $0x124] sm:$0xf] %vm1994_vm0, %v2512_v51  ;;  %v903_v58 = vadd.f32 %v2670_v52, %v3059_v8  ;;  %v1159_v59 = vadd.f32 %v2734_v53, %v3059_v8  ;;  %v894_v60 = vpop.f32.mrf.mxu0  ;;  %v1150_v61 = vpop.f32.mrf.mxu1 }
 0x10c   : > { %2009 = vst.msk [vmem:[%s3070_s17 + $0x38] sm:$0xf] %vm1994_vm0, %v2453_v54  ;;  %2073 = vst.msk [vmem:[%s3070_s17 + $0x138] sm:$0xf] %vm1994_vm0, %v2517_v55  ;;  %v2451_v62 = vpack.c.bf16 %v1366_v56, %v1366_v56  ;;  %v2515_v63 = vpack.c.bf16 %v1430_v57, %v1430_v57  ;;  %v895_v0 = vadd.f32 %v3059_v8, %v894_v60 }
 0x10d   : > { %v1151_v1 = vadd.f32 %v3059_v8, %v1150_v61  ;;  %v1369_v2 = vmax.f32 %v903_v58, 0.0  ;;  %v1433_v3 = vmax.f32 %v1159_v59, 0.0  ;;  %v2673_v4 = vpop.f32.mrf.mxu0  ;;  %v2737_v5 = vpop.f32.mrf.mxu1 }
 0x10e   : > { %2007 = vst.msk [vmem:[%s3070_s17 + $0x30] sm:$0xf] %vm1994_vm0, %v2451_v62  ;;  %2071 = vst.msk [vmem:[%s3070_s17 + $0x130] sm:$0xf] %vm1994_vm0, %v2515_v63  ;;  %v1367_v6 = vmax.f32 %v895_v0, 0.0  ;;  %v916_v9 = vadd.f32 %v2673_v4, %v3059_v8  ;;  %v1172_v10 = vadd.f32 %v2737_v5, %v3059_v8 }
 0x10f   : > { %v1431_v7 = vmax.f32 %v1151_v1, 0.0  ;;  %v2454_v11 = vpack.c.bf16 %v1369_v2, %v1369_v2  ;;  %v2518_v12 = vpack.c.bf16 %v1433_v3, %v1433_v3  ;;  %v907_v13 = vpop.f32.mrf.mxu0  ;;  %v1163_v14 = vpop.f32.mrf.mxu1 }
 0x110   : > { %v2452_v15 = vpack.c.bf16 %v1367_v6, %v1367_v6  ;;  %v1372_v17 = vmax.f32 %v916_v9, 0.0  ;;  %v1436_v18 = vmax.f32 %v1172_v10, 0.0  ;;  %v908_v19 = vadd.f32 %v3059_v8, %v907_v13 }
 0x111   : > { %v2516_v16 = vpack.c.bf16 %v1431_v7, %v1431_v7  ;;  %2010 = vst.msk [vmem:[%s3070_s17 + $0x3c] sm:$0xf] %vm1994_vm0, %v2454_v11  ;;  %2074 = vst.msk [vmem:[%s3070_s17 + $0x13c] sm:$0xf] %vm1994_vm0, %v2518_v12  ;;  %v1164_v20 = vadd.f32 %v3059_v8, %v1163_v14  ;;  %v2674_v21 = vpop.f32.mrf.mxu0  ;;  %v2738_v22 = vpop.f32.mrf.mxu1 }
 0x112   : > { %2008 = vst.msk [vmem:[%s3070_s17 + $0x34] sm:$0xf] %vm1994_vm0, %v2452_v15  ;;  %v2457_v23 = vpack.c.bf16 %v1372_v17, %v1372_v17  ;;  %v2521_v24 = vpack.c.bf16 %v1436_v18, %v1436_v18  ;;  %v919_v25 = vadd.f32 %v2674_v21, %v3059_v8  ;;  %v1175_v26 = vadd.f32 %v2738_v22, %v3059_v8 }
 0x113   : > { %2072 = vst.msk [vmem:[%s3070_s17 + $0x134] sm:$0xf] %vm1994_vm0, %v2516_v16  ;;  %v1370_v27 = vmax.f32 %v908_v19, 0.0  ;;  %v1434_v28 = vmax.f32 %v1164_v20, 0.0  ;;  %v910_v29 = vpop.f32.mrf.mxu0  ;;  %v1166_v30 = vpop.f32.mrf.mxu1 }
 0x114   : > { %2013 = vst.msk [vmem:[%s3070_s17 + $0x48] sm:$0xf] %vm1994_vm0, %v2457_v23  ;;  %2077 = vst.msk [vmem:[%s3070_s17 + $0x148] sm:$0xf] %vm1994_vm0, %v2521_v24  ;;  %v1373_v31 = vmax.f32 %v919_v25, 0.0  ;;  %v1437_v32 = vmax.f32 %v1175_v26, 0.0  ;;  %v911_v33 = vadd.f32 %v3059_v8, %v910_v29  ;;  %v1167_v34 = vadd.f32 %v3059_v8, %v1166_v30 }
 0x115   : > { %v2455_v35 = vpack.c.bf16 %v1370_v27, %v1370_v27  ;;  %v2519_v36 = vpack.c.bf16 %v1434_v28, %v1434_v28  ;;  %v2677_v37 = vpop.f32.mrf.mxu0  ;;  %v2741_v38 = vpop.f32.mrf.mxu1 }
 0x116   : > { %v2458_v39 = vpack.c.bf16 %v1373_v31, %v1373_v31  ;;  %v2522_v40 = vpack.c.bf16 %v1437_v32, %v1437_v32  ;;  %v1371_v41 = vmax.f32 %v911_v33, 0.0  ;;  %v1435_v42 = vmax.f32 %v1167_v34, 0.0 }
 0x117   : > { %2011 = vst.msk [vmem:[%s3070_s17 + $0x40] sm:$0xf] %vm1994_vm0, %v2455_v35  ;;  %2075 = vst.msk [vmem:[%s3070_s17 + $0x140] sm:$0xf] %vm1994_vm0, %v2519_v36  ;;  %v932_v43 = vadd.f32 %v2677_v37, %v3059_v8  ;;  %v1188_v44 = vadd.f32 %v2741_v38, %v3059_v8  ;;  %v923_v45 = vpop.f32.mrf.mxu0  ;;  %v1179_v46 = vpop.f32.mrf.mxu1 }
 0x118   : > { %2014 = vst.msk [vmem:[%s3070_s17 + $0x4c] sm:$0xf] %vm1994_vm0, %v2458_v39  ;;  %2078 = vst.msk [vmem:[%s3070_s17 + $0x14c] sm:$0xf] %vm1994_vm0, %v2522_v40  ;;  %v2456_v47 = vpack.c.bf16 %v1371_v41, %v1371_v41  ;;  %v2520_v48 = vpack.c.bf16 %v1435_v42, %v1435_v42  ;;  %v924_v49 = vadd.f32 %v3059_v8, %v923_v45 }
 0x119   : > { %v1180_v50 = vadd.f32 %v3059_v8, %v1179_v46  ;;  %v1376_v51 = vmax.f32 %v932_v43, 0.0  ;;  %v1440_v52 = vmax.f32 %v1188_v44, 0.0  ;;  %v2678_v53 = vpop.f32.mrf.mxu0  ;;  %v2742_v54 = vpop.f32.mrf.mxu1 }
 0x11a   : > { %2012 = vst.msk [vmem:[%s3070_s17 + $0x44] sm:$0xf] %vm1994_vm0, %v2456_v47  ;;  %2076 = vst.msk [vmem:[%s3070_s17 + $0x144] sm:$0xf] %vm1994_vm0, %v2520_v48  ;;  %v1374_v55 = vmax.f32 %v924_v49, 0.0  ;;  %v935_v57 = vadd.f32 %v2678_v53, %v3059_v8  ;;  %v1191_v58 = vadd.f32 %v2742_v54, %v3059_v8 }
 0x11b   : > { %v1438_v56 = vmax.f32 %v1180_v50, 0.0  ;;  %v2461_v59 = vpack.c.bf16 %v1376_v51, %v1376_v51  ;;  %v2525_v60 = vpack.c.bf16 %v1440_v52, %v1440_v52  ;;  %v926_v61 = vpop.f32.mrf.mxu0  ;;  %v1182_v62 = vpop.f32.mrf.mxu1 }
 0x11c   : > { %v2459_v63 = vpack.c.bf16 %v1374_v55, %v1374_v55  ;;  %v1377_v1 = vmax.f32 %v935_v57, 0.0  ;;  %v1441_v2 = vmax.f32 %v1191_v58, 0.0  ;;  %v927_v3 = vadd.f32 %v3059_v8, %v926_v61 }
 0x11d   : > { %v2523_v0 = vpack.c.bf16 %v1438_v56, %v1438_v56  ;;  %2017 = vst.msk [vmem:[%s3070_s17 + $0x58] sm:$0xf] %vm1994_vm0, %v2461_v59  ;;  %2081 = vst.msk [vmem:[%s3070_s17 + $0x158] sm:$0xf] %vm1994_vm0, %v2525_v60  ;;  %v1183_v4 = vadd.f32 %v3059_v8, %v1182_v62  ;;  %v2681_v5 = vpop.f32.mrf.mxu0  ;;  %v2745_v6 = vpop.f32.mrf.mxu1 }
 0x11e   : > { %2015 = vst.msk [vmem:[%s3070_s17 + $0x50] sm:$0xf] %vm1994_vm0, %v2459_v63  ;;  %v2462_v7 = vpack.c.bf16 %v1377_v1, %v1377_v1  ;;  %v2526_v9 = vpack.c.bf16 %v1441_v2, %v1441_v2  ;;  %v948_v10 = vadd.f32 %v2681_v5, %v3059_v8  ;;  %v1204_v11 = vadd.f32 %v2745_v6, %v3059_v8 }
 0x11f   : > { %2079 = vst.msk [vmem:[%s3070_s17 + $0x150] sm:$0xf] %vm1994_vm0, %v2523_v0  ;;  %v1375_v12 = vmax.f32 %v927_v3, 0.0  ;;  %v1439_v13 = vmax.f32 %v1183_v4, 0.0  ;;  %v939_v14 = vpop.f32.mrf.mxu0  ;;  %v1195_v15 = vpop.f32.mrf.mxu1 }
 0x120   : > { %2018 = vst.msk [vmem:[%s3070_s17 + $0x5c] sm:$0xf] %vm1994_vm0, %v2462_v7  ;;  %2082 = vst.msk [vmem:[%s3070_s17 + $0x15c] sm:$0xf] %vm1994_vm0, %v2526_v9  ;;  %v1380_v16 = vmax.f32 %v948_v10, 0.0  ;;  %v1444_v17 = vmax.f32 %v1204_v11, 0.0  ;;  %v940_v18 = vadd.f32 %v3059_v8, %v939_v14  ;;  %v1196_v19 = vadd.f32 %v3059_v8, %v1195_v15 }
 0x121   : > { %v2460_v20 = vpack.c.bf16 %v1375_v12, %v1375_v12  ;;  %v2524_v21 = vpack.c.bf16 %v1439_v13, %v1439_v13  ;;  %v2682_v22 = vpop.f32.mrf.mxu0  ;;  %v2746_v23 = vpop.f32.mrf.mxu1 }
 0x122   : > { %v2465_v24 = vpack.c.bf16 %v1380_v16, %v1380_v16  ;;  %v2529_v25 = vpack.c.bf16 %v1444_v17, %v1444_v17  ;;  %v1378_v26 = vmax.f32 %v940_v18, 0.0  ;;  %v1442_v27 = vmax.f32 %v1196_v19, 0.0 }
 0x123   : > { %2016 = vst.msk [vmem:[%s3070_s17 + $0x54] sm:$0xf] %vm1994_vm0, %v2460_v20  ;;  %2080 = vst.msk [vmem:[%s3070_s17 + $0x154] sm:$0xf] %vm1994_vm0, %v2524_v21  ;;  %v951_v28 = vadd.f32 %v2682_v22, %v3059_v8  ;;  %v1207_v29 = vadd.f32 %v2746_v23, %v3059_v8  ;;  %v942_v30 = vpop.f32.mrf.mxu0  ;;  %v1198_v31 = vpop.f32.mrf.mxu1 }
 0x124   : > { %2021 = vst.msk [vmem:[%s3070_s17 + $0x68] sm:$0xf] %vm1994_vm0, %v2465_v24  ;;  %2085 = vst.msk [vmem:[%s3070_s17 + $0x168] sm:$0xf] %vm1994_vm0, %v2529_v25  ;;  %v2463_v32 = vpack.c.bf16 %v1378_v26, %v1378_v26  ;;  %v2527_v33 = vpack.c.bf16 %v1442_v27, %v1442_v27  ;;  %v943_v34 = vadd.f32 %v3059_v8, %v942_v30 }
 0x125   : > { %v1199_v35 = vadd.f32 %v3059_v8, %v1198_v31  ;;  %v1381_v36 = vmax.f32 %v951_v28, 0.0  ;;  %v1445_v37 = vmax.f32 %v1207_v29, 0.0  ;;  %v2685_v38 = vpop.f32.mrf.mxu0  ;;  %v2749_v39 = vpop.f32.mrf.mxu1 }
 0x126   : > { %2019 = vst.msk [vmem:[%s3070_s17 + $0x60] sm:$0xf] %vm1994_vm0, %v2463_v32  ;;  %2083 = vst.msk [vmem:[%s3070_s17 + $0x160] sm:$0xf] %vm1994_vm0, %v2527_v33  ;;  %v1379_v40 = vmax.f32 %v943_v34, 0.0  ;;  %v964_v42 = vadd.f32 %v2685_v38, %v3059_v8  ;;  %v1220_v43 = vadd.f32 %v2749_v39, %v3059_v8 }
 0x127   : > { %v1443_v41 = vmax.f32 %v1199_v35, 0.0  ;;  %v2466_v44 = vpack.c.bf16 %v1381_v36, %v1381_v36  ;;  %v2530_v45 = vpack.c.bf16 %v1445_v37, %v1445_v37  ;;  %v955_v46 = vpop.f32.mrf.mxu0  ;;  %v1211_v47 = vpop.f32.mrf.mxu1 }
 0x128   : > { %v2464_v48 = vpack.c.bf16 %v1379_v40, %v1379_v40  ;;  %v1384_v50 = vmax.f32 %v964_v42, 0.0  ;;  %v1448_v51 = vmax.f32 %v1220_v43, 0.0  ;;  %v956_v52 = vadd.f32 %v3059_v8, %v955_v46 }
 0x129   : > { %v2528_v49 = vpack.c.bf16 %v1443_v41, %v1443_v41  ;;  %2022 = vst.msk [vmem:[%s3070_s17 + $0x6c] sm:$0xf] %vm1994_vm0, %v2466_v44  ;;  %2086 = vst.msk [vmem:[%s3070_s17 + $0x16c] sm:$0xf] %vm1994_vm0, %v2530_v45  ;;  %v1212_v53 = vadd.f32 %v3059_v8, %v1211_v47  ;;  %v2686_v54 = vpop.f32.mrf.mxu0  ;;  %v2750_v55 = vpop.f32.mrf.mxu1 }
 0x12a   : > { %2020 = vst.msk [vmem:[%s3070_s17 + $0x64] sm:$0xf] %vm1994_vm0, %v2464_v48  ;;  %v2469_v56 = vpack.c.bf16 %v1384_v50, %v1384_v50  ;;  %v2533_v57 = vpack.c.bf16 %v1448_v51, %v1448_v51  ;;  %v967_v58 = vadd.f32 %v2686_v54, %v3059_v8  ;;  %v1223_v59 = vadd.f32 %v2750_v55, %v3059_v8 }
 0x12b   : > { %2084 = vst.msk [vmem:[%s3070_s17 + $0x164] sm:$0xf] %vm1994_vm0, %v2528_v49  ;;  %v1382_v60 = vmax.f32 %v956_v52, 0.0  ;;  %v1446_v61 = vmax.f32 %v1212_v53, 0.0  ;;  %v958_v62 = vpop.f32.mrf.mxu0  ;;  %v1214_v63 = vpop.f32.mrf.mxu1 }
 0x12c   : > { %2025 = vst.msk [vmem:[%s3070_s17 + $0x78] sm:$0xf] %vm1994_vm0, %v2469_v56  ;;  %2089 = vst.msk [vmem:[%s3070_s17 + $0x178] sm:$0xf] %vm1994_vm0, %v2533_v57  ;;  %v1385_v0 = vmax.f32 %v967_v58, 0.0  ;;  %v1449_v1 = vmax.f32 %v1223_v59, 0.0  ;;  %v959_v2 = vadd.f32 %v3059_v8, %v958_v62  ;;  %v1215_v3 = vadd.f32 %v3059_v8, %v1214_v63 }
 0x12d   : > { %v2467_v4 = vpack.c.bf16 %v1382_v60, %v1382_v60  ;;  %v2531_v5 = vpack.c.bf16 %v1446_v61, %v1446_v61  ;;  %v2689_v6 = vpop.f32.mrf.mxu0  ;;  %v2753_v7 = vpop.f32.mrf.mxu1 }
 0x12e   : > { %v2470_v9 = vpack.c.bf16 %v1385_v0, %v1385_v0  ;;  %v2534_v10 = vpack.c.bf16 %v1449_v1, %v1449_v1  ;;  %v1383_v11 = vmax.f32 %v959_v2, 0.0  ;;  %v1447_v12 = vmax.f32 %v1215_v3, 0.0 }
 0x12f   : > { %2023 = vst.msk [vmem:[%s3070_s17 + $0x70] sm:$0xf] %vm1994_vm0, %v2467_v4  ;;  %2087 = vst.msk [vmem:[%s3070_s17 + $0x170] sm:$0xf] %vm1994_vm0, %v2531_v5  ;;  %v980_v13 = vadd.f32 %v2689_v6, %v3059_v8  ;;  %v1236_v14 = vadd.f32 %v2753_v7, %v3059_v8  ;;  %v971_v15 = vpop.f32.mrf.mxu0  ;;  %v1227_v16 = vpop.f32.mrf.mxu1 }
 0x130   : > { %2026 = vst.msk [vmem:[%s3070_s17 + $0x7c] sm:$0xf] %vm1994_vm0, %v2470_v9  ;;  %2090 = vst.msk [vmem:[%s3070_s17 + $0x17c] sm:$0xf] %vm1994_vm0, %v2534_v10  ;;  %v2468_v17 = vpack.c.bf16 %v1383_v11, %v1383_v11  ;;  %v2532_v18 = vpack.c.bf16 %v1447_v12, %v1447_v12  ;;  %v972_v19 = vadd.f32 %v3059_v8, %v971_v15 }
 0x131   : > { %v1228_v20 = vadd.f32 %v3059_v8, %v1227_v16  ;;  %v1388_v21 = vmax.f32 %v980_v13, 0.0  ;;  %v1452_v22 = vmax.f32 %v1236_v14, 0.0  ;;  %v2690_v23 = vpop.f32.mrf.mxu0  ;;  %v2754_v24 = vpop.f32.mrf.mxu1 }
 0x132   : > { %2024 = vst.msk [vmem:[%s3070_s17 + $0x74] sm:$0xf] %vm1994_vm0, %v2468_v17  ;;  %2088 = vst.msk [vmem:[%s3070_s17 + $0x174] sm:$0xf] %vm1994_vm0, %v2532_v18  ;;  %v1386_v25 = vmax.f32 %v972_v19, 0.0  ;;  %v983_v27 = vadd.f32 %v2690_v23, %v3059_v8  ;;  %v1239_v28 = vadd.f32 %v2754_v24, %v3059_v8 }
 0x133   : > { %v1450_v26 = vmax.f32 %v1228_v20, 0.0  ;;  %v2473_v29 = vpack.c.bf16 %v1388_v21, %v1388_v21  ;;  %v2537_v30 = vpack.c.bf16 %v1452_v22, %v1452_v22  ;;  %v974_v31 = vpop.f32.mrf.mxu0  ;;  %v1230_v32 = vpop.f32.mrf.mxu1 }
 0x134   : > { %v2471_v33 = vpack.c.bf16 %v1386_v25, %v1386_v25  ;;  %v1389_v35 = vmax.f32 %v983_v27, 0.0  ;;  %v1453_v36 = vmax.f32 %v1239_v28, 0.0  ;;  %v975_v37 = vadd.f32 %v3059_v8, %v974_v31 }
 0x135   : > { %v2535_v34 = vpack.c.bf16 %v1450_v26, %v1450_v26  ;;  %2029 = vst.msk [vmem:[%s3070_s17 + $0x88] sm:$0xf] %vm1994_vm0, %v2473_v29  ;;  %2093 = vst.msk [vmem:[%s3070_s17 + $0x188] sm:$0xf] %vm1994_vm0, %v2537_v30  ;;  %v1231_v38 = vadd.f32 %v3059_v8, %v1230_v32  ;;  %v2693_v39 = vpop.f32.mrf.mxu0  ;;  %v2757_v40 = vpop.f32.mrf.mxu1 }
 0x136   : > { %2027 = vst.msk [vmem:[%s3070_s17 + $0x80] sm:$0xf] %vm1994_vm0, %v2471_v33  ;;  %v2474_v41 = vpack.c.bf16 %v1389_v35, %v1389_v35  ;;  %v2538_v42 = vpack.c.bf16 %v1453_v36, %v1453_v36  ;;  %v996_v43 = vadd.f32 %v2693_v39, %v3059_v8  ;;  %v1252_v44 = vadd.f32 %v2757_v40, %v3059_v8 }
 0x137   : > { %2091 = vst.msk [vmem:[%s3070_s17 + $0x180] sm:$0xf] %vm1994_vm0, %v2535_v34  ;;  %v1387_v45 = vmax.f32 %v975_v37, 0.0  ;;  %v1451_v46 = vmax.f32 %v1231_v38, 0.0  ;;  %v987_v47 = vpop.f32.mrf.mxu0  ;;  %v1243_v48 = vpop.f32.mrf.mxu1 }
 0x138   : > { %2030 = vst.msk [vmem:[%s3070_s17 + $0x8c] sm:$0xf] %vm1994_vm0, %v2474_v41  ;;  %2094 = vst.msk [vmem:[%s3070_s17 + $0x18c] sm:$0xf] %vm1994_vm0, %v2538_v42  ;;  %v1392_v49 = vmax.f32 %v996_v43, 0.0  ;;  %v1456_v50 = vmax.f32 %v1252_v44, 0.0  ;;  %v988_v51 = vadd.f32 %v3059_v8, %v987_v47  ;;  %v1244_v52 = vadd.f32 %v3059_v8, %v1243_v48 }
 0x139   : > { %v2472_v53 = vpack.c.bf16 %v1387_v45, %v1387_v45  ;;  %v2536_v54 = vpack.c.bf16 %v1451_v46, %v1451_v46  ;;  %v2694_v55 = vpop.f32.mrf.mxu0  ;;  %v2758_v56 = vpop.f32.mrf.mxu1 }
 0x13a   : > { %v2477_v57 = vpack.c.bf16 %v1392_v49, %v1392_v49  ;;  %v2541_v58 = vpack.c.bf16 %v1456_v50, %v1456_v50  ;;  %v1390_v59 = vmax.f32 %v988_v51, 0.0  ;;  %v1454_v60 = vmax.f32 %v1244_v52, 0.0 }
 0x13b   : > { %2028 = vst.msk [vmem:[%s3070_s17 + $0x84] sm:$0xf] %vm1994_vm0, %v2472_v53  ;;  %2092 = vst.msk [vmem:[%s3070_s17 + $0x184] sm:$0xf] %vm1994_vm0, %v2536_v54  ;;  %v999_v61 = vadd.f32 %v2694_v55, %v3059_v8  ;;  %v1255_v62 = vadd.f32 %v2758_v56, %v3059_v8  ;;  %v990_v63 = vpop.f32.mrf.mxu0  ;;  %v1246_v0 = vpop.f32.mrf.mxu1 }
 0x13c   : > { %2033 = vst.msk [vmem:[%s3070_s17 + $0x98] sm:$0xf] %vm1994_vm0, %v2477_v57  ;;  %2097 = vst.msk [vmem:[%s3070_s17 + $0x198] sm:$0xf] %vm1994_vm0, %v2541_v58  ;;  %v2475_v1 = vpack.c.bf16 %v1390_v59, %v1390_v59  ;;  %v2539_v2 = vpack.c.bf16 %v1454_v60, %v1454_v60  ;;  %v991_v3 = vadd.f32 %v3059_v8, %v990_v63 }
 0x13d   : > { %v1247_v4 = vadd.f32 %v3059_v8, %v1246_v0  ;;  %v1393_v5 = vmax.f32 %v999_v61, 0.0  ;;  %v1457_v6 = vmax.f32 %v1255_v62, 0.0  ;;  %v2697_v7 = vpop.f32.mrf.mxu0  ;;  %v2761_v9 = vpop.f32.mrf.mxu1 }
 0x13e   : > { %2031 = vst.msk [vmem:[%s3070_s17 + $0x90] sm:$0xf] %vm1994_vm0, %v2475_v1  ;;  %2095 = vst.msk [vmem:[%s3070_s17 + $0x190] sm:$0xf] %vm1994_vm0, %v2539_v2  ;;  %v1391_v10 = vmax.f32 %v991_v3, 0.0  ;;  %v1012_v12 = vadd.f32 %v2697_v7, %v3059_v8  ;;  %v1268_v13 = vadd.f32 %v2761_v9, %v3059_v8 }
 0x13f   : > { %v1455_v11 = vmax.f32 %v1247_v4, 0.0  ;;  %v2478_v14 = vpack.c.bf16 %v1393_v5, %v1393_v5  ;;  %v2542_v15 = vpack.c.bf16 %v1457_v6, %v1457_v6  ;;  %v1003_v16 = vpop.f32.mrf.mxu0  ;;  %v1259_v17 = vpop.f32.mrf.mxu1 }
 0x140   : > { %v2476_v18 = vpack.c.bf16 %v1391_v10, %v1391_v10  ;;  %v1396_v20 = vmax.f32 %v1012_v12, 0.0  ;;  %v1460_v21 = vmax.f32 %v1268_v13, 0.0  ;;  %v1004_v22 = vadd.f32 %v3059_v8, %v1003_v16 }
 0x141   : > { %v2540_v19 = vpack.c.bf16 %v1455_v11, %v1455_v11  ;;  %2034 = vst.msk [vmem:[%s3070_s17 + $0x9c] sm:$0xf] %vm1994_vm0, %v2478_v14  ;;  %2098 = vst.msk [vmem:[%s3070_s17 + $0x19c] sm:$0xf] %vm1994_vm0, %v2542_v15  ;;  %v1260_v23 = vadd.f32 %v3059_v8, %v1259_v17  ;;  %v2698_v24 = vpop.f32.mrf.mxu0  ;;  %v2762_v25 = vpop.f32.mrf.mxu1 }
 0x142   : > { %2032 = vst.msk [vmem:[%s3070_s17 + $0x94] sm:$0xf] %vm1994_vm0, %v2476_v18  ;;  %v2481_v26 = vpack.c.bf16 %v1396_v20, %v1396_v20  ;;  %v2545_v27 = vpack.c.bf16 %v1460_v21, %v1460_v21  ;;  %v1015_v28 = vadd.f32 %v2698_v24, %v3059_v8  ;;  %v1271_v29 = vadd.f32 %v2762_v25, %v3059_v8 }
 0x143   : > { %2096 = vst.msk [vmem:[%s3070_s17 + $0x194] sm:$0xf] %vm1994_vm0, %v2540_v19  ;;  %v1394_v30 = vmax.f32 %v1004_v22, 0.0  ;;  %v1458_v31 = vmax.f32 %v1260_v23, 0.0  ;;  %v1006_v32 = vpop.f32.mrf.mxu0  ;;  %v1262_v33 = vpop.f32.mrf.mxu1 }
 0x144   : > { %2037 = vst.msk [vmem:[%s3070_s17 + $0xa8] sm:$0xf] %vm1994_vm0, %v2481_v26  ;;  %2101 = vst.msk [vmem:[%s3070_s17 + $0x1a8] sm:$0xf] %vm1994_vm0, %v2545_v27  ;;  %v1397_v34 = vmax.f32 %v1015_v28, 0.0  ;;  %v1461_v35 = vmax.f32 %v1271_v29, 0.0  ;;  %v1007_v36 = vadd.f32 %v3059_v8, %v1006_v32  ;;  %v1263_v37 = vadd.f32 %v3059_v8, %v1262_v33 }
 0x145   : > { %v2479_v38 = vpack.c.bf16 %v1394_v30, %v1394_v30  ;;  %v2543_v39 = vpack.c.bf16 %v1458_v31, %v1458_v31  ;;  %v2701_v40 = vpop.f32.mrf.mxu0  ;;  %v2765_v41 = vpop.f32.mrf.mxu1 }
 0x146   : > { %v2482_v42 = vpack.c.bf16 %v1397_v34, %v1397_v34  ;;  %v2546_v43 = vpack.c.bf16 %v1461_v35, %v1461_v35  ;;  %v1395_v44 = vmax.f32 %v1007_v36, 0.0  ;;  %v1459_v45 = vmax.f32 %v1263_v37, 0.0 }
 0x147   : > { %2035 = vst.msk [vmem:[%s3070_s17 + $0xa0] sm:$0xf] %vm1994_vm0, %v2479_v38  ;;  %2099 = vst.msk [vmem:[%s3070_s17 + $0x1a0] sm:$0xf] %vm1994_vm0, %v2543_v39  ;;  %v1028_v46 = vadd.f32 %v2701_v40, %v3059_v8  ;;  %v1284_v47 = vadd.f32 %v2765_v41, %v3059_v8  ;;  %v1019_v48 = vpop.f32.mrf.mxu0  ;;  %v1275_v49 = vpop.f32.mrf.mxu1 }
 0x148   : > { %2038 = vst.msk [vmem:[%s3070_s17 + $0xac] sm:$0xf] %vm1994_vm0, %v2482_v42  ;;  %2102 = vst.msk [vmem:[%s3070_s17 + $0x1ac] sm:$0xf] %vm1994_vm0, %v2546_v43  ;;  %v2480_v50 = vpack.c.bf16 %v1395_v44, %v1395_v44  ;;  %v2544_v51 = vpack.c.bf16 %v1459_v45, %v1459_v45  ;;  %v1020_v52 = vadd.f32 %v3059_v8, %v1019_v48  ;;  %v3375_v45 = vld [vmem:[%s3468_s2] ss:$0 sm:$0xff] }
 0x149   : > { %v1276_v53 = vadd.f32 %v3059_v8, %v1275_v49  ;;  %v1400_v54 = vmax.f32 %v1028_v46, 0.0  ;;  %v1464_v55 = vmax.f32 %v1284_v47, 0.0  ;;  %v2702_v56 = vpop.f32.mrf.mxu0  ;;  %v2766_v57 = vpop.f32.mrf.mxu1 }
 0x14a   : > { %2036 = vst.msk [vmem:[%s3070_s17 + $0xa4] sm:$0xf] %vm1994_vm0, %v2480_v50  ;;  %2100 = vst.msk [vmem:[%s3070_s17 + $0x1a4] sm:$0xf] %vm1994_vm0, %v2544_v51  ;;  %v1398_v58 = vmax.f32 %v1020_v52, 0.0  ;;  %v1031_v60 = vadd.f32 %v2702_v56, %v3059_v8  ;;  %v1287_v61 = vadd.f32 %v2766_v57, %v3059_v8 }
 0x14b   : > { %v1462_v59 = vmax.f32 %v1276_v53, 0.0  ;;  %v2485_v62 = vpack.c.bf16 %v1400_v54, %v1400_v54  ;;  %v2549_v63 = vpack.c.bf16 %v1464_v55, %v1464_v55  ;;  %v1022_v0 = vpop.f32.mrf.mxu0  ;;  %v1278_v1 = vpop.f32.mrf.mxu1 }
 0x14c   : > { %v2483_v2 = vpack.c.bf16 %v1398_v58, %v1398_v58  ;;  %v1401_v4 = vmax.f32 %v1031_v60, 0.0  ;;  %v1465_v5 = vmax.f32 %v1287_v61, 0.0  ;;  %v1023_v6 = vadd.f32 %v3059_v8, %v1022_v0 }
 0x14d   : > { %v2547_v3 = vpack.c.bf16 %v1462_v59, %v1462_v59  ;;  %2041 = vst.msk [vmem:[%s3070_s17 + $0xb8] sm:$0xf] %vm1994_vm0, %v2485_v62  ;;  %2105 = vst.msk [vmem:[%s3070_s17 + $0x1b8] sm:$0xf] %vm1994_vm0, %v2549_v63  ;;  %v1279_v7 = vadd.f32 %v3059_v8, %v1278_v1  ;;  %v2705_v9 = vpop.f32.mrf.mxu0  ;;  %v2769_v10 = vpop.f32.mrf.mxu1 }
 0x14e   : > { %2039 = vst.msk [vmem:[%s3070_s17 + $0xb0] sm:$0xf] %vm1994_vm0, %v2483_v2  ;;  %v2486_v11 = vpack.c.bf16 %v1401_v4, %v1401_v4  ;;  %v2550_v12 = vpack.c.bf16 %v1465_v5, %v1465_v5  ;;  %v1044_v13 = vadd.f32 %v2705_v9, %v3059_v8  ;;  %v1300_v14 = vadd.f32 %v2769_v10, %v3059_v8 }
 0x14f   : > { %2103 = vst.msk [vmem:[%s3070_s17 + $0x1b0] sm:$0xf] %vm1994_vm0, %v2547_v3  ;;  %v1399_v15 = vmax.f32 %v1023_v6, 0.0  ;;  %v1463_v16 = vmax.f32 %v1279_v7, 0.0  ;;  %v1035_v17 = vpop.f32.mrf.mxu0  ;;  %v1291_v18 = vpop.f32.mrf.mxu1 }
 0x150   : > { %2042 = vst.msk [vmem:[%s3070_s17 + $0xbc] sm:$0xf] %vm1994_vm0, %v2486_v11  ;;  %2106 = vst.msk [vmem:[%s3070_s17 + $0x1bc] sm:$0xf] %vm1994_vm0, %v2550_v12  ;;  %v1404_v19 = vmax.f32 %v1044_v13, 0.0  ;;  %v1468_v20 = vmax.f32 %v1300_v14, 0.0  ;;  %v1036_v21 = vadd.f32 %v3059_v8, %v1035_v17  ;;  %v1292_v22 = vadd.f32 %v3059_v8, %v1291_v18 }
 0x151   : > { %v2484_v23 = vpack.c.bf16 %v1399_v15, %v1399_v15  ;;  %v2548_v24 = vpack.c.bf16 %v1463_v16, %v1463_v16  ;;  %v2706_v25 = vpop.f32.mrf.mxu0  ;;  %v2770_v26 = vpop.f32.mrf.mxu1 }
 0x152   : > { %v2489_v27 = vpack.c.bf16 %v1404_v19, %v1404_v19  ;;  %v2553_v28 = vpack.c.bf16 %v1468_v20, %v1468_v20  ;;  %v1402_v29 = vmax.f32 %v1036_v21, 0.0  ;;  %v1466_v30 = vmax.f32 %v1292_v22, 0.0 }
 0x153   : > { %2040 = vst.msk [vmem:[%s3070_s17 + $0xb4] sm:$0xf] %vm1994_vm0, %v2484_v23  ;;  %2104 = vst.msk [vmem:[%s3070_s17 + $0x1b4] sm:$0xf] %vm1994_vm0, %v2548_v24  ;;  %v1047_v31 = vadd.f32 %v2706_v25, %v3059_v8  ;;  %v1303_v32 = vadd.f32 %v2770_v26, %v3059_v8  ;;  %v1038_v33 = vpop.f32.mrf.mxu0  ;;  %v1294_v34 = vpop.f32.mrf.mxu1 }
 0x154   : > { %2045 = vst.msk [vmem:[%s3070_s17 + $0xc8] sm:$0xf] %vm1994_vm0, %v2489_v27  ;;  %2109 = vst.msk [vmem:[%s3070_s17 + $0x1c8] sm:$0xf] %vm1994_vm0, %v2553_v28  ;;  %v2487_v35 = vpack.c.bf16 %v1402_v29, %v1402_v29  ;;  %v2551_v36 = vpack.c.bf16 %v1466_v30, %v1466_v30  ;;  %v1039_v37 = vadd.f32 %v3059_v8, %v1038_v33 }
 0x155   : > { %v1295_v38 = vadd.f32 %v3059_v8, %v1294_v34  ;;  %v1405_v39 = vmax.f32 %v1047_v31, 0.0  ;;  %v1469_v40 = vmax.f32 %v1303_v32, 0.0  ;;  %v2709_v41 = vpop.f32.mrf.mxu0  ;;  %v2773_v42 = vpop.f32.mrf.mxu1 }
 0x156   : > { %2043 = vst.msk [vmem:[%s3070_s17 + $0xc0] sm:$0xf] %vm1994_vm0, %v2487_v35  ;;  %2107 = vst.msk [vmem:[%s3070_s17 + $0x1c0] sm:$0xf] %vm1994_vm0, %v2551_v36  ;;  %v1403_v43 = vmax.f32 %v1039_v37, 0.0  ;;  %v1060_v46 = vadd.f32 %v3375_v45, %v2709_v41  ;;  %v1316_v8 = vadd.f32 %v3375_v45, %v2773_v42 }
 0x157   : > { %v1467_v44 = vmax.f32 %v1295_v38, 0.0  ;;  %v2490_v47 = vpack.c.bf16 %v1405_v39, %v1405_v39  ;;  %v2554_v48 = vpack.c.bf16 %v1469_v40, %v1469_v40  ;;  %v1051_v49 = vpop.f32.mrf.mxu0  ;;  %v1307_v50 = vpop.f32.mrf.mxu1 }
 0x158   : > { %v2488_v51 = vpack.c.bf16 %v1403_v43, %v1403_v43  ;;  %v1408_v53 = vmax.f32 %v1060_v46, 0.0  ;;  %v1472_v54 = vmax.f32 %v1316_v8, 0.0  ;;  %v1052_v55 = vadd.f32 %v3375_v45, %v1051_v49 }
 0x159   : > { %v2552_v52 = vpack.c.bf16 %v1467_v44, %v1467_v44  ;;  %2046 = vst.msk [vmem:[%s3070_s17 + $0xcc] sm:$0xf] %vm1994_vm0, %v2490_v47  ;;  %2110 = vst.msk [vmem:[%s3070_s17 + $0x1cc] sm:$0xf] %vm1994_vm0, %v2554_v48  ;;  %v1308_v56 = vadd.f32 %v3375_v45, %v1307_v50  ;;  %v2710_v57 = vpop.f32.mrf.mxu0  ;;  %v2774_v58 = vpop.f32.mrf.mxu1 }
 0x15a   : > { %2044 = vst.msk [vmem:[%s3070_s17 + $0xc4] sm:$0xf] %vm1994_vm0, %v2488_v51  ;;  %v2493_v59 = vpack.c.bf16 %v1408_v53, %v1408_v53  ;;  %v2557_v60 = vpack.c.bf16 %v1472_v54, %v1472_v54  ;;  %v1063_v61 = vadd.f32 %v3375_v45, %v2710_v57  ;;  %v1319_v62 = vadd.f32 %v3375_v45, %v2774_v58 }
 0x15b   : > { %2108 = vst.msk [vmem:[%s3070_s17 + $0x1c4] sm:$0xf] %vm1994_vm0, %v2552_v52  ;;  %v1406_v63 = vmax.f32 %v1052_v55, 0.0  ;;  %v1470_v0 = vmax.f32 %v1308_v56, 0.0  ;;  %v1054_v1 = vpop.f32.mrf.mxu0  ;;  %v1310_v2 = vpop.f32.mrf.mxu1 }
 0x15c   : > { %2049 = vst.msk [vmem:[%s3070_s17 + $0xd8] sm:$0xf] %vm1994_vm0, %v2493_v59  ;;  %2113 = vst.msk [vmem:[%s3070_s17 + $0x1d8] sm:$0xf] %vm1994_vm0, %v2557_v60  ;;  %v1409_v3 = vmax.f32 %v1063_v61, 0.0  ;;  %v1473_v4 = vmax.f32 %v1319_v62, 0.0  ;;  %v1055_v5 = vadd.f32 %v3375_v45, %v1054_v1  ;;  %v1311_v6 = vadd.f32 %v3375_v45, %v1310_v2 }
 0x15d   : > { %v2491_v7 = vpack.c.bf16 %v1406_v63, %v1406_v63  ;;  %v2555_v9 = vpack.c.bf16 %v1470_v0, %v1470_v0  ;;  %v2713_v10 = vpop.f32.mrf.mxu0  ;;  %v2777_v11 = vpop.f32.mrf.mxu1 }
 0x15e   : > { %v2494_v12 = vpack.c.bf16 %v1409_v3, %v1409_v3  ;;  %v2558_v13 = vpack.c.bf16 %v1473_v4, %v1473_v4  ;;  %v1407_v14 = vmax.f32 %v1055_v5, 0.0  ;;  %v1471_v15 = vmax.f32 %v1311_v6, 0.0 }
 0x15f   : > { %2047 = vst.msk [vmem:[%s3070_s17 + $0xd0] sm:$0xf] %vm1994_vm0, %v2491_v7  ;;  %2111 = vst.msk [vmem:[%s3070_s17 + $0x1d0] sm:$0xf] %vm1994_vm0, %v2555_v9  ;;  %v1076_v16 = vadd.f32 %v3375_v45, %v2713_v10  ;;  %v1332_v17 = vadd.f32 %v3375_v45, %v2777_v11  ;;  %v1067_v18 = vpop.f32.mrf.mxu0  ;;  %v1323_v19 = vpop.f32.mrf.mxu1 }
 0x160   : > { %2050 = vst.msk [vmem:[%s3070_s17 + $0xdc] sm:$0xf] %vm1994_vm0, %v2494_v12  ;;  %2114 = vst.msk [vmem:[%s3070_s17 + $0x1dc] sm:$0xf] %vm1994_vm0, %v2558_v13  ;;  %v2492_v20 = vpack.c.bf16 %v1407_v14, %v1407_v14  ;;  %v2556_v21 = vpack.c.bf16 %v1471_v15, %v1471_v15  ;;  %v1068_v22 = vadd.f32 %v3375_v45, %v1067_v18 }
 0x161   : > { %v1324_v23 = vadd.f32 %v3375_v45, %v1323_v19  ;;  %v1412_v24 = vmax.f32 %v1076_v16, 0.0  ;;  %v1476_v25 = vmax.f32 %v1332_v17, 0.0  ;;  %v2714_v26 = vpop.f32.mrf.mxu0  ;;  %v2778_v27 = vpop.f32.mrf.mxu1 }
 0x162   : > { %2048 = vst.msk [vmem:[%s3070_s17 + $0xd4] sm:$0xf] %vm1994_vm0, %v2492_v20  ;;  %2112 = vst.msk [vmem:[%s3070_s17 + $0x1d4] sm:$0xf] %vm1994_vm0, %v2556_v21  ;;  %v1410_v28 = vmax.f32 %v1068_v22, 0.0  ;;  %v1079_v30 = vadd.f32 %v3375_v45, %v2714_v26  ;;  %v1335_v31 = vadd.f32 %v3375_v45, %v2778_v27 }
 0x163   : > { %v1474_v29 = vmax.f32 %v1324_v23, 0.0  ;;  %v2497_v32 = vpack.c.bf16 %v1412_v24, %v1412_v24  ;;  %v2561_v33 = vpack.c.bf16 %v1476_v25, %v1476_v25  ;;  %v1070_v34 = vpop.f32.mrf.mxu0  ;;  %v1326_v35 = vpop.f32.mrf.mxu1 }
 0x164   : > { %v2495_v36 = vpack.c.bf16 %v1410_v28, %v1410_v28  ;;  %v1413_v38 = vmax.f32 %v1079_v30, 0.0  ;;  %v1477_v39 = vmax.f32 %v1335_v31, 0.0  ;;  %v1071_v40 = vadd.f32 %v3375_v45, %v1070_v34 }
 0x165   : > { %v2559_v37 = vpack.c.bf16 %v1474_v29, %v1474_v29  ;;  %2053 = vst.msk [vmem:[%s3070_s17 + $0xe8] sm:$0xf] %vm1994_vm0, %v2497_v32  ;;  %2117 = vst.msk [vmem:[%s3070_s17 + $0x1e8] sm:$0xf] %vm1994_vm0, %v2561_v33  ;;  %v1327_v41 = vadd.f32 %v3375_v45, %v1326_v35  ;;  %v2717_v42 = vpop.f32.mrf.mxu0  ;;  %v2781_v43 = vpop.f32.mrf.mxu1 }
 0x166   : > { %2051 = vst.msk [vmem:[%s3070_s17 + $0xe0] sm:$0xf] %vm1994_vm0, %v2495_v36  ;;  %v2498_v44 = vpack.c.bf16 %v1413_v38, %v1413_v38  ;;  %v2562_v46 = vpack.c.bf16 %v1477_v39, %v1477_v39  ;;  %v1092_v8 = vadd.f32 %v3375_v45, %v2717_v42  ;;  %v1348_v47 = vadd.f32 %v3375_v45, %v2781_v43 }
 0x167   : > { %2115 = vst.msk [vmem:[%s3070_s17 + $0x1e0] sm:$0xf] %vm1994_vm0, %v2559_v37  ;;  %v1411_v48 = vmax.f32 %v1071_v40, 0.0  ;;  %v1475_v49 = vmax.f32 %v1327_v41, 0.0  ;;  %v1083_v50 = vpop.f32.mrf.mxu0  ;;  %v1339_v51 = vpop.f32.mrf.mxu1 }
 0x168   : > { %2054 = vst.msk [vmem:[%s3070_s17 + $0xec] sm:$0xf] %vm1994_vm0, %v2498_v44  ;;  %2118 = vst.msk [vmem:[%s3070_s17 + $0x1ec] sm:$0xf] %vm1994_vm0, %v2562_v46  ;;  %v1416_v52 = vmax.f32 %v1092_v8, 0.0  ;;  %v1480_v53 = vmax.f32 %v1348_v47, 0.0  ;;  %v1084_v54 = vadd.f32 %v3375_v45, %v1083_v50  ;;  %v1340_v55 = vadd.f32 %v3375_v45, %v1339_v51 }
 0x169   : > { %v2496_v56 = vpack.c.bf16 %v1411_v48, %v1411_v48  ;;  %v2560_v57 = vpack.c.bf16 %v1475_v49, %v1475_v49  ;;  %v2718_v58 = vpop.f32.mrf.mxu0  ;;  %v2782_v59 = vpop.f32.mrf.mxu1 }
 0x16a   : > { %v2501_v60 = vpack.c.bf16 %v1416_v52, %v1416_v52  ;;  %v2565_v61 = vpack.c.bf16 %v1480_v53, %v1480_v53  ;;  %v1414_v62 = vmax.f32 %v1084_v54, 0.0  ;;  %v1478_v63 = vmax.f32 %v1340_v55, 0.0 }
 0x16b   : > { %2052 = vst.msk [vmem:[%s3070_s17 + $0xe4] sm:$0xf] %vm1994_vm0, %v2496_v56  ;;  %2116 = vst.msk [vmem:[%s3070_s17 + $0x1e4] sm:$0xf] %vm1994_vm0, %v2560_v57  ;;  %v1095_v0 = vadd.f32 %v3375_v45, %v2718_v58  ;;  %v1351_v1 = vadd.f32 %v3375_v45, %v2782_v59  ;;  %v1086_v2 = vpop.f32.mrf.mxu0  ;;  %v1342_v3 = vpop.f32.mrf.mxu1 }
 0x16c   : > { %2057 = vst.msk [vmem:[%s3070_s17 + $0xf8] sm:$0xf] %vm1994_vm0, %v2501_v60  ;;  %2121 = vst.msk [vmem:[%s3070_s17 + $0x1f8] sm:$0xf] %vm1994_vm0, %v2565_v61  ;;  %v2499_v4 = vpack.c.bf16 %v1414_v62, %v1414_v62  ;;  %v2563_v5 = vpack.c.bf16 %v1478_v63, %v1478_v63  ;;  %v1087_v6 = vadd.f32 %v3375_v45, %v1086_v2 }
 0x16d   : > { %v1343_v7 = vadd.f32 %v3375_v45, %v1342_v3  ;;  %v1417_v9 = vmax.f32 %v1095_v0, 0.0  ;;  %v1481_v10 = vmax.f32 %v1351_v1, 0.0 }
 0x16e   : > { %2055 = vst.msk [vmem:[%s3070_s17 + $0xf0] sm:$0xf] %vm1994_vm0, %v2499_v4  ;;  %2119 = vst.msk [vmem:[%s3070_s17 + $0x1f0] sm:$0xf] %vm1994_vm0, %v2563_v5  ;;  %v1415_v11 = vmax.f32 %v1087_v6, 0.0 }
 0x16f   : > { %v1479_v12 = vmax.f32 %v1343_v7, 0.0  ;;  %v2502_v13 = vpack.c.bf16 %v1417_v9, %v1417_v9  ;;  %v2566_v14 = vpack.c.bf16 %v1481_v10, %v1481_v10 }
 0x170   : > { %v2500_v15 = vpack.c.bf16 %v1415_v11, %v1415_v11 }
 0x171   : > { %v2564_v16 = vpack.c.bf16 %v1479_v12, %v1479_v12  ;;  %2058 = vst.msk [vmem:[%s3070_s17 + $0xfc] sm:$0xf] %vm1994_vm0, %v2502_v13  ;;  %2122 = vst.msk [vmem:[%s3070_s17 + $0x1fc] sm:$0xf] %vm1994_vm0, %v2566_v14 }
 0x172   : > { %2056 = vst.msk [vmem:[%s3070_s17 + $0xf4] sm:$0xf] %vm1994_vm0, %v2500_v15 }
 0x173   : > { %2120 = vst.msk [vmem:[%s3070_s17 + $0x1f4] sm:$0xf] %vm1994_vm0, %v2564_v16 }
 0x174 PF: > { %s13_s14 = sadd.s32 1, %s2918_s14   ;;  %s3470_s12 = smov %s2914_s13 }
 0x175   : > { %p10_p5 = scmp.ge.s32.totalorder %s13_s14, 4   ;;  %s3471_s13 = smov %s3473_s15 }
 0x177   :  { %12 = sbr.rel (!%p10_p5) target bundleno = 2 (0x2), region = 68 }

// kernel: encoder_forward.13
= control target key start
LH: loop header
LB: loop body
LE: loop exit
PB: predicated region body
PF: predicated region fallthrough
CT: control target
= control target key end

     0   :  { %s1163_s12 = smov 0   ;;  %s1165_s13 = smov 0   ;;  %s1348_s0 = inlined_call_operand.vmem [shape: bf16[512,128], index: 0, kind: input, shape index: {}]   ;;  %s1349_s1 = inlined_call_operand.vmem [shape: bf16[128,8], index: 1, kind: input, shape index: {}]   ;;  %s1350_s2 = inlined_call_operand.vmem [shape: f32[1,8], index: 2, kind: input, shape index: {}]   ;;  %s1351_s3 = inlined_call_operand.vmem [shape: bf16[512,8], index: 3, kind: output, shape index: {}]  }
   0x1   :  { %s1167_s14 = smov 0  }
   0x2 LB: > { %s25_s15 = sadd.s32 1, %s1137_s13  ;;  %p887_p0 = scmp.ge.s32.totalorder %s1141_s14, 1  ;;  %s1141_s14 = sphi %s1167_s14, %s13_s14   ;;  %s1137_s13 = sphi %s1165_s13, %s1353_s13   ;;  %s1133_s12 = sphi %s1163_s12, %s1352_s12  }
   0x3   : > { %p27_p1 = scmp.ge.s32.totalorder %s25_s15, 2  ;;  %p169_p2 = scmp.lt.s32.totalorder %s1141_s14, 3 }
   0x5   : > { %s1355_s15 = smov (%p27_p1, %s25_s15), 0  ;;  %p170_p3 = pnand %p887_p0, %p169_p2 }
   0x6   : > { %s888_s18 = sshll.u32 (!%p170_p3), %s1133_s12, 5 }
   0x7   : > { %173 = sbr.rel (%p170_p3) target bundleno = 276 (0x114), region = 32  ;;  %p204_p4 = scmp.lt.s32.totalorder (!%p170_p3), %s888_s18, 63 }
   0xc   : > { %v1095_v0 = vld [vmem:[%s1349_s1 + $0x38] sm:$0xff]   ;;  %v1096_v1 = vld [vmem:[%s1349_s1 + $0x30] sm:$0xff]   ;;  %s1357_s18 = smov (!%p204_p4, %s888_s18), 63  ;;  %v1097_v2 = vld [vmem:[%s1349_s1 + $0x28] sm:$0xff]   ;;  %vm746_vm0 = vcmask 60416  }
   0xd   : > { %1007 = vmatprep.subr.bf16.mxu0 %v1095_v0  ;;  %1055 = vmatprep.subr.bf16.mxu1 %v1095_v0  ;;  %s889_s23 = sshll.u32 %s1357_s18, 2  ;;  %v1098_v3 = vld [vmem:[%s1349_s1 + $0x20] sm:$0xff]   ;;  %v1099_v6 = vld [vmem:[%s1349_s1 + $0x18] sm:$0xff]   ;;  %v1100_v7 = vld [vmem:[%s1349_s1 + $0x10] sm:$0xff]  }
   0xe   : > { %1008 = vmatpush3.bf16.msra.mxu0 %v1095_v0  ;;  %1063 = vmatpush3.bf16.msra.mxu1 %v1095_v0  ;;  %s1198_s26 = scalar_lea.vmem %s1348_s0, %s889_s23  ;;  %v1101_v8 = vld [vmem:[%s1349_s1 + $0x8] sm:$0xff]   ;;  %v1102_v9 = vld [vmem:[%s1349_s1] sm:$0xff]   ;;  %s1245_s17 = scalar_lea.vmem %s1351_s3, %s889_s23 }
   0xf   : > { %1009 = vmatprep.subr.bf16.mxu0 %v1096_v1  ;;  %1056 = vmatprep.subr.bf16.mxu1 %v1096_v1  ;;  %v1103_v4 = vld [vmem:[%s1198_s26] sm:$0xff]   ;;  %v1105_v10 = vld [vmem:[%s1198_s26 + $0x8] sm:$0xff]   ;;  %v1107_v12 = vld [vmem:[%s1198_s26 + $0x10] sm:$0xff]  }
  0x10   : > { %v1104_v5 = vld [vmem:[%s1198_s26 + $0x40] sm:$0xff]   ;;  %1023 = vmatprep.mubr.bf16.mxu0 %v1103_v4  ;;  %v1106_v11 = vld [vmem:[%s1198_s26 + $0x48] sm:$0xff]   ;;  %v1108_v13 = vld [vmem:[%s1198_s26 + $0x50] sm:$0xff]  }
  0x11   : > { %1039 = vmatprep.mubr.bf16.mxu1 %v1104_v5  ;;  %v1109_v14 = vld [vmem:[%s1198_s26 + $0x18] sm:$0xff]   ;;  %v1111_v16 = vld [vmem:[%s1198_s26 + $0x20] sm:$0xff]   ;;  %v1113_v18 = vld [vmem:[%s1198_s26 + $0x28] sm:$0xff]  }
  0x12   : > { %1010 = vmatpush3.bf16.msra.mxu0 %v1096_v1  ;;  %1064 = vmatpush3.bf16.msra.mxu1 %v1096_v1  ;;  %v1110_v15 = vld [vmem:[%s1198_s26 + $0x58] sm:$0xff]   ;;  %v1112_v17 = vld [vmem:[%s1198_s26 + $0x60] sm:$0xff]   ;;  %v1114_v19 = vld [vmem:[%s1198_s26 + $0x68] sm:$0xff]  }
  0x13   : > { %1011 = vmatprep.subr.bf16.mxu0 %v1097_v2  ;;  %1057 = vmatprep.subr.bf16.mxu1 %v1097_v2  ;;  %v1115_v20 = vld [vmem:[%s1198_s26 + $0x30] sm:$0xff]   ;;  %v1117_v22 = vld [vmem:[%s1198_s26 + $0x38] sm:$0xff]   ;;  %v1234_v24 = vld [vmem:[%s1350_s2] ss:$0 sm:$0xff] }
  0x14   : > { %v1116_v21 = vld [vmem:[%s1198_s26 + $0x70] sm:$0xff]   ;;  %v1118_v23 = vld [vmem:[%s1198_s26 + $0x78] sm:$0xff]  }
  0x16   : > { %1012 = vmatpush3.bf16.msra.mxu0 %v1097_v2  ;;  %1065 = vmatpush3.bf16.msra.mxu1 %v1097_v2 }
  0x17   : > { %1013 = vmatprep.subr.bf16.mxu0 %v1098_v3  ;;  %1058 = vmatprep.subr.bf16.mxu1 %v1098_v3 }
  0x1a   : > { %1014 = vmatpush3.bf16.msra.mxu0 %v1098_v3  ;;  %1066 = vmatpush3.bf16.msra.mxu1 %v1098_v3 }
  0x1b   : > { %1015 = vmatprep.subr.bf16.mxu0 %v1099_v6  ;;  %1059 = vmatprep.subr.bf16.mxu1 %v1099_v6 }
  0x1e   : > { %1016 = vmatpush3.bf16.msra.mxu0 %v1099_v6  ;;  %1067 = vmatpush3.bf16.msra.mxu1 %v1099_v6 }
  0x1f   : > { %1017 = vmatprep.subr.bf16.mxu0 %v1100_v7  ;;  %1060 = vmatprep.subr.bf16.mxu1 %v1100_v7 }
  0x22   : > { %1018 = vmatpush3.bf16.msra.mxu0 %v1100_v7  ;;  %1068 = vmatpush3.bf16.msra.mxu1 %v1100_v7 }
  0x23   : > { %1019 = vmatprep.subr.bf16.mxu0 %v1101_v8  ;;  %1061 = vmatprep.subr.bf16.mxu1 %v1101_v8 }
  0x26   : > { %1020 = vmatpush3.bf16.msra.mxu0 %v1101_v8  ;;  %1069 = vmatpush3.bf16.msra.mxu1 %v1101_v8 }
  0x27   : > { %1021 = vmatprep.subr.bf16.mxu0 %v1102_v9  ;;  %1062 = vmatprep.subr.bf16.mxu1 %v1102_v9 }
  0x2a   : > { %1022 = vmatpush3.bf16.msra.mxu0 %v1102_v9  ;;  %1070 = vmatpush3.bf16.msra.mxu1 %v1102_v9 }
  0x2d   : > { %1024 = vmatmul.mubr.bf16.vlgmr.msra.gmra.mxu0 %v1105_v10  ;;  %1040 = vmatmul.mubr.bf16.vlgmr.msra.gmra.mxu1 %v1106_v11 }
  0x2e   : > { %1027 = vmatprep.mubr.bf16.mxu0 %v1107_v12  ;;  %1043 = vmatprep.mubr.bf16.mxu1 %v1108_v13 }
  0x35   : > { %1028 = vmatmul.mubr.bf16.gmra.mxu0 %v1109_v14  ;;  %1044 = vmatmul.mubr.bf16.gmra.mxu1 %v1110_v15 }
  0x36   : > { %1031 = vmatprep.mubr.bf16.mxu0 %v1111_v16  ;;  %1047 = vmatprep.mubr.bf16.mxu1 %v1112_v17 }
  0x3d   : > { %1032 = vmatmul.mubr.bf16.gmra.mxu0 %v1113_v18  ;;  %1048 = vmatmul.mubr.bf16.gmra.mxu1 %v1114_v19 }
  0x3e   : > { %1035 = vmatprep.mubr.bf16.mxu0 %v1115_v20  ;;  %1051 = vmatprep.mubr.bf16.mxu1 %v1116_v21 }
  0x45   : > { %1036 = vmatmul.mubr.bf16.gmra.mxu0 %v1117_v22  ;;  %1052 = vmatmul.mubr.bf16.gmra.mxu1 %v1118_v23 }
  0xed   : > { %v1025_v25 = vpop.f32.mrf.mxu0  ;;  %v1041_v26 = vpop.f32.mrf.mxu1 }
  0xee   : > { %v468_v27 = vadd.f32 %v1025_v25, %v1234_v24  ;;  %v532_v28 = vadd.f32 %v1041_v26, %v1234_v24 }
  0xef   : > { %v459_v29 = vpop.f32.mrf.mxu0  ;;  %v523_v30 = vpop.f32.mrf.mxu1 }
  0xf0   : > { %v588_v31 = vmax.f32 %v468_v27, 0.0  ;;  %v604_v32 = vmax.f32 %v532_v28, 0.0  ;;  %v460_v33 = vadd.f32 %v1234_v24, %v459_v29  ;;  %v524_v34 = vadd.f32 %v1234_v24, %v523_v30 }
  0xf1   : > { %v1026_v35 = vpop.f32.mrf.mxu0  ;;  %v1042_v36 = vpop.f32.mrf.mxu1 }
  0xf2   : > { %v953_v37 = vpack.c.bf16 %v588_v31, %v588_v31  ;;  %v969_v38 = vpack.c.bf16 %v604_v32, %v604_v32  ;;  %v586_v39 = vmax.f32 %v460_v33, 0.0  ;;  %v602_v40 = vmax.f32 %v524_v34, 0.0 }
  0xf3   : > { %v471_v41 = vadd.f32 %v1026_v35, %v1234_v24  ;;  %v535_v42 = vadd.f32 %v1042_v36, %v1234_v24  ;;  %v462_v43 = vpop.f32.mrf.mxu0  ;;  %v526_v44 = vpop.f32.mrf.mxu1 }
  0xf4   : > { %749 = vst.msk [vmem:[%s1245_s17 + $0x8] sm:$0xf] %vm746_vm0, %v953_v37  ;;  %765 = vst.msk [vmem:[%s1245_s17 + $0x48] sm:$0xf] %vm746_vm0, %v969_v38  ;;  %v951_v45 = vpack.c.bf16 %v586_v39, %v586_v39  ;;  %v967_v46 = vpack.c.bf16 %v602_v40, %v602_v40  ;;  %v463_v47 = vadd.f32 %v1234_v24, %v462_v43 }
  0xf5   : > { %v527_v48 = vadd.f32 %v1234_v24, %v526_v44  ;;  %v589_v49 = vmax.f32 %v471_v41, 0.0  ;;  %v605_v50 = vmax.f32 %v535_v42, 0.0  ;;  %v1029_v51 = vpop.f32.mrf.mxu0  ;;  %v1045_v52 = vpop.f32.mrf.mxu1 }
  0xf6   : > { %747 = vst.msk [vmem:[%s1245_s17] sm:$0xf] %vm746_vm0, %v951_v45  ;;  %763 = vst.msk [vmem:[%s1245_s17 + $0x40] sm:$0xf] %vm746_vm0, %v967_v46  ;;  %v587_v53 = vmax.f32 %v463_v47, 0.0  ;;  %v484_v55 = vadd.f32 %v1029_v51, %v1234_v24  ;;  %v548_v56 = vadd.f32 %v1045_v52, %v1234_v24 }
  0xf7   : > { %v603_v54 = vmax.f32 %v527_v48, 0.0  ;;  %v954_v57 = vpack.c.bf16 %v589_v49, %v589_v49  ;;  %v970_v58 = vpack.c.bf16 %v605_v50, %v605_v50  ;;  %v475_v59 = vpop.f32.mrf.mxu0  ;;  %v539_v60 = vpop.f32.mrf.mxu1 }
  0xf8   : > { %v952_v61 = vpack.c.bf16 %v587_v53, %v587_v53  ;;  %v592_v63 = vmax.f32 %v484_v55, 0.0  ;;  %v608_v0 = vmax.f32 %v548_v56, 0.0  ;;  %v476_v1 = vadd.f32 %v1234_v24, %v475_v59 }
  0xf9   : > { %v968_v62 = vpack.c.bf16 %v603_v54, %v603_v54  ;;  %750 = vst.msk [vmem:[%s1245_s17 + $0xc] sm:$0xf] %vm746_vm0, %v954_v57  ;;  %766 = vst.msk [vmem:[%s1245_s17 + $0x4c] sm:$0xf] %vm746_vm0, %v970_v58  ;;  %v540_v2 = vadd.f32 %v1234_v24, %v539_v60  ;;  %v1030_v3 = vpop.f32.mrf.mxu0  ;;  %v1046_v4 = vpop.f32.mrf.mxu1 }
  0xfa   : > { %748 = vst.msk [vmem:[%s1245_s17 + $0x4] sm:$0xf] %vm746_vm0, %v952_v61  ;;  %v957_v5 = vpack.c.bf16 %v592_v63, %v592_v63  ;;  %v973_v6 = vpack.c.bf16 %v608_v0, %v608_v0  ;;  %v487_v7 = vadd.f32 %v1030_v3, %v1234_v24  ;;  %v551_v8 = vadd.f32 %v1046_v4, %v1234_v24 }
  0xfb   : > { %764 = vst.msk [vmem:[%s1245_s17 + $0x44] sm:$0xf] %vm746_vm0, %v968_v62  ;;  %v590_v9 = vmax.f32 %v476_v1, 0.0  ;;  %v606_v10 = vmax.f32 %v540_v2, 0.0  ;;  %v478_v11 = vpop.f32.mrf.mxu0  ;;  %v542_v12 = vpop.f32.mrf.mxu1 }
  0xfc   : > { %753 = vst.msk [vmem:[%s1245_s17 + $0x18] sm:$0xf] %vm746_vm0, %v957_v5  ;;  %769 = vst.msk [vmem:[%s1245_s17 + $0x58] sm:$0xf] %vm746_vm0, %v973_v6  ;;  %v593_v13 = vmax.f32 %v487_v7, 0.0  ;;  %v609_v14 = vmax.f32 %v551_v8, 0.0  ;;  %v479_v15 = vadd.f32 %v1234_v24, %v478_v11  ;;  %v543_v16 = vadd.f32 %v1234_v24, %v542_v12 }
  0xfd   : > { %v955_v17 = vpack.c.bf16 %v590_v9, %v590_v9  ;;  %v971_v18 = vpack.c.bf16 %v606_v10, %v606_v10  ;;  %v1033_v19 = vpop.f32.mrf.mxu0  ;;  %v1049_v20 = vpop.f32.mrf.mxu1 }
  0xfe   : > { %v958_v21 = vpack.c.bf16 %v593_v13, %v593_v13  ;;  %v974_v22 = vpack.c.bf16 %v609_v14, %v609_v14  ;;  %v591_v23 = vmax.f32 %v479_v15, 0.0  ;;  %v607_v25 = vmax.f32 %v543_v16, 0.0 }
  0xff   : > { %751 = vst.msk [vmem:[%s1245_s17 + $0x10] sm:$0xf] %vm746_vm0, %v955_v17  ;;  %767 = vst.msk [vmem:[%s1245_s17 + $0x50] sm:$0xf] %vm746_vm0, %v971_v18  ;;  %v500_v26 = vadd.f32 %v1033_v19, %v1234_v24  ;;  %v564_v27 = vadd.f32 %v1049_v20, %v1234_v24  ;;  %v491_v28 = vpop.f32.mrf.mxu0  ;;  %v555_v29 = vpop.f32.mrf.mxu1 }
 0x100   : > { %754 = vst.msk [vmem:[%s1245_s17 + $0x1c] sm:$0xf] %vm746_vm0, %v958_v21  ;;  %770 = vst.msk [vmem:[%s1245_s17 + $0x5c] sm:$0xf] %vm746_vm0, %v974_v22  ;;  %v956_v30 = vpack.c.bf16 %v591_v23, %v591_v23  ;;  %v972_v31 = vpack.c.bf16 %v607_v25, %v607_v25  ;;  %v492_v32 = vadd.f32 %v1234_v24, %v491_v28 }
 0x101   : > { %v556_v33 = vadd.f32 %v1234_v24, %v555_v29  ;;  %v596_v34 = vmax.f32 %v500_v26, 0.0  ;;  %v612_v35 = vmax.f32 %v564_v27, 0.0  ;;  %v1034_v36 = vpop.f32.mrf.mxu0  ;;  %v1050_v37 = vpop.f32.mrf.mxu1 }
 0x102   : > { %752 = vst.msk [vmem:[%s1245_s17 + $0x14] sm:$0xf] %vm746_vm0, %v956_v30  ;;  %768 = vst.msk [vmem:[%s1245_s17 + $0x54] sm:$0xf] %vm746_vm0, %v972_v31  ;;  %v594_v38 = vmax.f32 %v492_v32, 0.0  ;;  %v503_v40 = vadd.f32 %v1034_v36, %v1234_v24  ;;  %v567_v41 = vadd.f32 %v1050_v37, %v1234_v24 }
 0x103   : > { %v610_v39 = vmax.f32 %v556_v33, 0.0  ;;  %v961_v42 = vpack.c.bf16 %v596_v34, %v596_v34  ;;  %v977_v43 = vpack.c.bf16 %v612_v35, %v612_v35  ;;  %v494_v44 = vpop.f32.mrf.mxu0  ;;  %v558_v45 = vpop.f32.mrf.mxu1 }
 0x104   : > { %v959_v46 = vpack.c.bf16 %v594_v38, %v594_v38  ;;  %v597_v48 = vmax.f32 %v503_v40, 0.0  ;;  %v613_v49 = vmax.f32 %v567_v41, 0.0  ;;  %v495_v50 = vadd.f32 %v1234_v24, %v494_v44 }
 0x105   : > { %v975_v47 = vpack.c.bf16 %v610_v39, %v610_v39  ;;  %757 = vst.msk [vmem:[%s1245_s17 + $0x28] sm:$0xf] %vm746_vm0, %v961_v42  ;;  %773 = vst.msk [vmem:[%s1245_s17 + $0x68] sm:$0xf] %vm746_vm0, %v977_v43  ;;  %v559_v51 = vadd.f32 %v1234_v24, %v558_v45  ;;  %v1037_v52 = vpop.f32.mrf.mxu0  ;;  %v1053_v53 = vpop.f32.mrf.mxu1 }
 0x106   : > { %755 = vst.msk [vmem:[%s1245_s17 + $0x20] sm:$0xf] %vm746_vm0, %v959_v46  ;;  %v962_v54 = vpack.c.bf16 %v597_v48, %v597_v48  ;;  %v978_v55 = vpack.c.bf16 %v613_v49, %v613_v49  ;;  %v516_v56 = vadd.f32 %v1037_v52, %v1234_v24  ;;  %v580_v57 = vadd.f32 %v1053_v53, %v1234_v24 }
 0x107   : > { %771 = vst.msk [vmem:[%s1245_s17 + $0x60] sm:$0xf] %vm746_vm0, %v975_v47  ;;  %v595_v58 = vmax.f32 %v495_v50, 0.0  ;;  %v611_v59 = vmax.f32 %v559_v51, 0.0  ;;  %v507_v60 = vpop.f32.mrf.mxu0  ;;  %v571_v61 = vpop.f32.mrf.mxu1 }
 0x108   : > { %758 = vst.msk [vmem:[%s1245_s17 + $0x2c] sm:$0xf] %vm746_vm0, %v962_v54  ;;  %774 = vst.msk [vmem:[%s1245_s17 + $0x6c] sm:$0xf] %vm746_vm0, %v978_v55  ;;  %v600_v62 = vmax.f32 %v516_v56, 0.0  ;;  %v616_v63 = vmax.f32 %v580_v57, 0.0  ;;  %v508_v0 = vadd.f32 %v1234_v24, %v507_v60  ;;  %v572_v1 = vadd.f32 %v1234_v24, %v571_v61 }
 0x109   : > { %v960_v2 = vpack.c.bf16 %v595_v58, %v595_v58  ;;  %v976_v3 = vpack.c.bf16 %v611_v59, %v611_v59  ;;  %v1038_v4 = vpop.f32.mrf.mxu0  ;;  %v1054_v5 = vpop.f32.mrf.mxu1 }
 0x10a   : > { %v965_v6 = vpack.c.bf16 %v600_v62, %v600_v62  ;;  %v981_v7 = vpack.c.bf16 %v616_v63, %v616_v63  ;;  %v598_v8 = vmax.f32 %v508_v0, 0.0  ;;  %v614_v9 = vmax.f32 %v572_v1, 0.0 }
 0x10b   : > { %756 = vst.msk [vmem:[%s1245_s17 + $0x24] sm:$0xf] %vm746_vm0, %v960_v2  ;;  %772 = vst.msk [vmem:[%s1245_s17 + $0x64] sm:$0xf] %vm746_vm0, %v976_v3  ;;  %v519_v10 = vadd.f32 %v1038_v4, %v1234_v24  ;;  %v583_v11 = vadd.f32 %v1054_v5, %v1234_v24  ;;  %v510_v12 = vpop.f32.mrf.mxu0  ;;  %v574_v13 = vpop.f32.mrf.mxu1 }
 0x10c   : > { %761 = vst.msk [vmem:[%s1245_s17 + $0x38] sm:$0xf] %vm746_vm0, %v965_v6  ;;  %777 = vst.msk [vmem:[%s1245_s17 + $0x78] sm:$0xf] %vm746_vm0, %v981_v7  ;;  %v963_v14 = vpack.c.bf16 %v598_v8, %v598_v8  ;;  %v979_v15 = vpack.c.bf16 %v614_v9, %v614_v9  ;;  %v511_v16 = vadd.f32 %v1234_v24, %v510_v12 }
 0x10d   : > { %v575_v17 = vadd.f32 %v1234_v24, %v574_v13  ;;  %v601_v18 = vmax.f32 %v519_v10, 0.0  ;;  %v617_v19 = vmax.f32 %v583_v11, 0.0 }
 0x10e   : > { %759 = vst.msk [vmem:[%s1245_s17 + $0x30] sm:$0xf] %vm746_vm0, %v963_v14  ;;  %775 = vst.msk [vmem:[%s1245_s17 + $0x70] sm:$0xf] %vm746_vm0, %v979_v15  ;;  %v599_v20 = vmax.f32 %v511_v16, 0.0 }
 0x10f   : > { %v615_v21 = vmax.f32 %v575_v17, 0.0  ;;  %v966_v22 = vpack.c.bf16 %v601_v18, %v601_v18  ;;  %v982_v23 = vpack.c.bf16 %v617_v19, %v617_v19 }
 0x110   : > { %v964_v25 = vpack.c.bf16 %v599_v20, %v599_v20 }
 0x111   : > { %v980_v26 = vpack.c.bf16 %v615_v21, %v615_v21  ;;  %762 = vst.msk [vmem:[%s1245_s17 + $0x3c] sm:$0xf] %vm746_vm0, %v966_v22  ;;  %778 = vst.msk [vmem:[%s1245_s17 + $0x7c] sm:$0xf] %vm746_vm0, %v982_v23 }
 0x112   : > { %760 = vst.msk [vmem:[%s1245_s17 + $0x34] sm:$0xf] %vm746_vm0, %v964_v25 }
 0x113   : > { %776 = vst.msk [vmem:[%s1245_s17 + $0x74] sm:$0xf] %vm746_vm0, %v980_v26 }
 0x114 PF: > { %s13_s14 = sadd.s32 1, %s1141_s14   ;;  %s1352_s12 = smov %s1137_s13 }
 0x115   : > { %p10_p5 = scmp.ge.s32.totalorder %s13_s14, 4   ;;  %s1353_s13 = smov %s1355_s15 }
 0x117   :  { %12 = sbr.rel (!%p10_p5) target bundleno = 2 (0x2), region = 68 }

// kernel: encoder_forward.15
= control target key start
LH: loop header
LB: loop body
LE: loop exit
PB: predicated region body
PF: predicated region fallthrough
CT: control target
= control target key end

     0   :  { %s719_s12 = smov 0   ;;  %s721_s13 = smov 0   ;;  %s810_s0 = inlined_call_operand.vmem [shape: bf16[128,128], index: 0, kind: input, shape index: {}]   ;;  %s811_s1 = inlined_call_operand.vmem [shape: bf16[128,16], index: 1, kind: input, shape index: {}]   ;;  %s812_s2 = inlined_call_operand.vmem [shape: f32[1,16], index: 2, kind: input, shape index: {}]   ;;  %s813_s3 = inlined_call_operand.vmem [shape: bf16[128,16], index: 3, kind: output, shape index: {}]  }
   0x1   :  { %s723_s14 = smov 0  }
   0x2 LB: > { %s25_s15 = sadd.s32 1, %s693_s13  ;;  %p551_p0 = scmp.ge.s32.totalorder %s697_s14, 1  ;;  %s697_s14 = sphi %s723_s14, %s13_s14   ;;  %s693_s13 = sphi %s721_s13, %s815_s13   ;;  %s689_s12 = sphi %s719_s12, %s814_s12  }
   0x3   : > { %p27_p1 = scmp.ge.s32.totalorder %s25_s15, 2  ;;  %p169_p2 = scmp.lt.s32.totalorder %s697_s14, 3 }
   0x5   : > { %s817_s15 = smov (%p27_p1, %s25_s15), 0  ;;  %p170_p3 = pnand %p551_p0, %p169_p2 }
   0x6   : > { %s552_s18 = sshll.u32 (!%p170_p3), %s689_s12, 3 }
   0x7   : > { %173 = sbr.rel (%p170_p3) target bundleno = 252 (0xfc), region = 32  ;;  %p204_p4 = scmp.lt.s32.totalorder (!%p170_p3), %s552_s18, 15 }
   0xc   : > { %v663_v0 = vld [vmem:[%s811_s1 + $0x38] sm:$0xff]   ;;  %v664_v1 = vld [vmem:[%s811_s1 + $0x30] sm:$0xff]   ;;  %s819_s18 = smov (!%p204_p4, %s552_s18), 15  ;;  %v665_v2 = vld [vmem:[%s811_s1 + $0x28] sm:$0xff]   ;;  %vm434_vm0 = vcmask 125952  }
   0xd   : > { %599 = vmatprep.subr.bf16.mxu0 %v663_v0  ;;  %623 = vmatprep.subr.bf16.mxu1 %v663_v0  ;;  %s553_s23 = sshll.u32 %s819_s18, 2  ;;  %v666_v3 = vld [vmem:[%s811_s1 + $0x20] sm:$0xff]   ;;  %v667_v6 = vld [vmem:[%s811_s1 + $0x18] sm:$0xff]   ;;  %v668_v7 = vld [vmem:[%s811_s1 + $0x10] sm:$0xff]  }
   0xe   : > { %600 = vmatpush3.bf16.msra.mxu0 %v663_v0  ;;  %631 = vmatpush3.bf16.msra.mxu1 %v663_v0  ;;  %s754_s26 = scalar_lea.vmem %s810_s0, %s553_s23  ;;  %v669_v8 = vld [vmem:[%s811_s1 + $0x8] sm:$0xff]   ;;  %v670_v9 = vld [vmem:[%s811_s1] sm:$0xff]   ;;  %s783_s17 = scalar_lea.vmem %s813_s3, %s553_s23 }
   0xf   : > { %601 = vmatprep.subr.bf16.mxu0 %v664_v1  ;;  %624 = vmatprep.subr.bf16.mxu1 %v664_v1  ;;  %v671_v4 = vld [vmem:[%s754_s26] sm:$0xff]   ;;  %v672_v5 = vld [vmem:[%s754_s26 + $0x10] sm:$0xff]   ;;  %v673_v10 = vld [vmem:[%s754_s26 + $0x8] sm:$0xff]  }
  0x10   : > { %615 = vmatprep.mubr.bf16.mxu0 %v671_v4  ;;  %619 = vmatprep.mubr.bf16.mxu1 %v672_v5  ;;  %v674_v11 = vld [vmem:[%s754_s26 + $0x18] sm:$0xff]   ;;  %v556_v12 = vld [vmem:[%s812_s2] ss:$0 sm:$0xff] }
  0x12   : > { %602 = vmatpush3.bf16.msra.mxu0 %v664_v1  ;;  %632 = vmatpush3.bf16.msra.mxu1 %v664_v1 }
  0x13   : > { %603 = vmatprep.subr.bf16.mxu0 %v665_v2  ;;  %625 = vmatprep.subr.bf16.mxu1 %v665_v2 }
  0x16   : > { %604 = vmatpush3.bf16.msra.mxu0 %v665_v2  ;;  %633 = vmatpush3.bf16.msra.mxu1 %v665_v2 }
  0x17   : > { %605 = vmatprep.subr.bf16.mxu0 %v666_v3  ;;  %626 = vmatprep.subr.bf16.mxu1 %v666_v3 }
  0x1a   : > { %606 = vmatpush3.bf16.msra.mxu0 %v666_v3  ;;  %634 = vmatpush3.bf16.msra.mxu1 %v666_v3 }
  0x1b   : > { %607 = vmatprep.subr.bf16.mxu0 %v667_v6  ;;  %627 = vmatprep.subr.bf16.mxu1 %v667_v6 }
  0x1e   : > { %608 = vmatpush3.bf16.msra.mxu0 %v667_v6  ;;  %635 = vmatpush3.bf16.msra.mxu1 %v667_v6 }
  0x1f   : > { %609 = vmatprep.subr.bf16.mxu0 %v668_v7  ;;  %628 = vmatprep.subr.bf16.mxu1 %v668_v7 }
  0x22   : > { %610 = vmatpush3.bf16.msra.mxu0 %v668_v7  ;;  %636 = vmatpush3.bf16.msra.mxu1 %v668_v7 }
  0x23   : > { %611 = vmatprep.subr.bf16.mxu0 %v669_v8  ;;  %629 = vmatprep.subr.bf16.mxu1 %v669_v8 }
  0x26   : > { %612 = vmatpush3.bf16.msra.mxu0 %v669_v8  ;;  %637 = vmatpush3.bf16.msra.mxu1 %v669_v8 }
  0x27   : > { %613 = vmatprep.subr.bf16.mxu0 %v670_v9  ;;  %630 = vmatprep.subr.bf16.mxu1 %v670_v9 }
  0x2a   : > { %614 = vmatpush3.bf16.msra.mxu0 %v670_v9  ;;  %638 = vmatpush3.bf16.msra.mxu1 %v670_v9 }
  0x2d   : > { %616 = vmatmul.mubr.bf16.vlgmr.msra.gmra.mxu0 %v673_v10  ;;  %620 = vmatmul.mubr.bf16.vlgmr.msra.gmra.mxu1 %v674_v11 }
  0xed   : > { %v617_v13 = vpop.f32.mrf.mxu0  ;;  %v621_v14 = vpop.f32.mrf.mxu1 }
  0xee   : > { %v372_v15 = vadd.f32 %v617_v13, %v556_v12  ;;  %v388_v16 = vadd.f32 %v621_v14, %v556_v12 }
  0xef   : > { %v363_v17 = vpop.f32.mrf.mxu0  ;;  %v379_v18 = vpop.f32.mrf.mxu1 }
  0xf0   : > { %v396_v19 = vmax.f32 %v372_v15, 0.0  ;;  %v400_v20 = vmax.f32 %v388_v16, 0.0  ;;  %v364_v21 = vadd.f32 %v556_v12, %v363_v17  ;;  %v380_v22 = vadd.f32 %v556_v12, %v379_v18 }
  0xf1   : > { %v618_v23 = vpop.f32.mrf.mxu0  ;;  %v622_v24 = vpop.f32.mrf.mxu1 }
  0xf2   : > { %v581_v25 = vpack.c.bf16 %v396_v19, %v396_v19  ;;  %v585_v26 = vpack.c.bf16 %v400_v20, %v400_v20  ;;  %v394_v27 = vmax.f32 %v364_v21, 0.0  ;;  %v398_v28 = vmax.f32 %v380_v22, 0.0 }
  0xf3   : > { %v375_v29 = vadd.f32 %v618_v23, %v556_v12  ;;  %v391_v30 = vadd.f32 %v622_v24, %v556_v12  ;;  %v366_v31 = vpop.f32.mrf.mxu0  ;;  %v382_v32 = vpop.f32.mrf.mxu1 }
  0xf4   : > { %437 = vst.msk [vmem:[%s783_s17 + $0x8] sm:$0xf] %vm434_vm0, %v581_v25  ;;  %441 = vst.msk [vmem:[%s783_s17 + $0x18] sm:$0xf] %vm434_vm0, %v585_v26  ;;  %v579_v33 = vpack.c.bf16 %v394_v27, %v394_v27  ;;  %v583_v34 = vpack.c.bf16 %v398_v28, %v398_v28  ;;  %v367_v35 = vadd.f32 %v556_v12, %v366_v31 }
  0xf5   : > { %v383_v36 = vadd.f32 %v556_v12, %v382_v32  ;;  %v397_v37 = vmax.f32 %v375_v29, 0.0  ;;  %v401_v38 = vmax.f32 %v391_v30, 0.0 }
  0xf6   : > { %435 = vst.msk [vmem:[%s783_s17] sm:$0xf] %vm434_vm0, %v579_v33  ;;  %439 = vst.msk [vmem:[%s783_s17 + $0x10] sm:$0xf] %vm434_vm0, %v583_v34  ;;  %v395_v39 = vmax.f32 %v367_v35, 0.0 }
  0xf7   : > { %v399_v40 = vmax.f32 %v383_v36, 0.0  ;;  %v582_v41 = vpack.c.bf16 %v397_v37, %v397_v37  ;;  %v586_v42 = vpack.c.bf16 %v401_v38, %v401_v38 }
  0xf8   : > { %v580_v43 = vpack.c.bf16 %v395_v39, %v395_v39 }
  0xf9   : > { %v584_v44 = vpack.c.bf16 %v399_v40, %v399_v40  ;;  %438 = vst.msk [vmem:[%s783_s17 + $0xc] sm:$0xf] %vm434_vm0, %v582_v41  ;;  %442 = vst.msk [vmem:[%s783_s17 + $0x1c] sm:$0xf] %vm434_vm0, %v586_v42 }
  0xfa   : > { %436 = vst.msk [vmem:[%s783_s17 + $0x4] sm:$0xf] %vm434_vm0, %v580_v43 }
  0xfb   : > { %440 = vst.msk [vmem:[%s783_s17 + $0x14] sm:$0xf] %vm434_vm0, %v584_v44 }
  0xfc PF: > { %s13_s14 = sadd.s32 1, %s697_s14   ;;  %s814_s12 = smov %s693_s13 }
  0xfd   : > { %p10_p5 = scmp.ge.s32.totalorder %s13_s14, 4   ;;  %s815_s13 = smov %s817_s15 }
  0xff   :  { %12 = sbr.rel (!%p10_p5) target bundleno = 2 (0x2), region = 68 }

// kernel: encoder_forward.16
= control target key start
LH: loop header
LB: loop body
LE: loop exit
PB: predicated region body
PF: predicated region fallthrough
CT: control target
= control target key end

     0   :  { %s836_s12 = smov 0   ;;  %s838_s13 = smov 0   ;;  %s952_s0 = inlined_call_operand.vmem [shape: bf16[128,256], index: 0, kind: input, shape index: {}]   ;;  %s953_s1 = inlined_call_operand.vmem [shape: bf16[256,16], index: 1, kind: input, shape index: {}]   ;;  %s954_s2 = inlined_call_operand.vmem [shape: f32[1,16], index: 2, kind: input, shape index: {}]   ;;  %s955_s3 = inlined_call_operand.vmem [shape: bf16[128,16], index: 3, kind: output, shape index: {}]  }
   0x1   :  { %s840_s14 = smov 0  }
   0x2 LB: > { %s25_s15 = sadd.s32 1, %s810_s13  ;;  %p634_p0 = scmp.ge.s32.totalorder %s814_s14, 1  ;;  %s814_s14 = sphi %s840_s14, %s13_s14   ;;  %s810_s13 = sphi %s838_s13, %s957_s13   ;;  %s806_s12 = sphi %s836_s12, %s956_s12  }
   0x3   : > { %p27_p1 = scmp.ge.s32.totalorder %s25_s15, 2  ;;  %p170_p2 = scmp.lt.s32.totalorder %s814_s14, 3 }
   0x5   : > { %s959_s15 = smov (%p27_p1, %s25_s15), 0  ;;  %p171_p3 = pnand %p634_p0, %p170_p2 }
   0x6   : > { %s635_s18 = sshll.u32 (!%p171_p3), %s806_s12, 3 }
   0x7   : > { %174 = sbr.rel (%p171_p3) target bundleno = 261 (0x105), region = 32  ;;  %p206_p4 = scmp.lt.s32.totalorder (!%p171_p3), %s635_s18, 15 }
   0xc   : > { %v764_v0 = vld [vmem:[%s953_s1 + $0x78] sm:$0xff]   ;;  %v766_v2 = vld [vmem:[%s953_s1 + $0x70] sm:$0xff]   ;;  %v768_v4 = vld [vmem:[%s953_s1 + $0x68] sm:$0xff]   ;;  %s961_s18 = smov (!%p206_p4, %s635_s18), 15  ;;  %vm517_vm0 = vcmask 125952  }
   0xd   : > { %v765_v1 = vld [vmem:[%s953_s1 + $0x38] sm:$0xff]   ;;  %684 = vmatprep.subr.bf16.mxu0 %v764_v0  ;;  %724 = vmatprep.subr.bf16.mxu1 %v764_v0  ;;  %v767_v3 = vld [vmem:[%s953_s1 + $0x30] sm:$0xff]   ;;  %v769_v5 = vld [vmem:[%s953_s1 + $0x28] sm:$0xff]   ;;  %s675_s6 = sshll.u32 %s961_s18, 3  ;;  %s639_s5 = sshll.u32 %s961_s18, 2 }
   0xe   : > { %685 = vmatpush3.bf16.msra.mxu0 %v765_v1  ;;  %732 = vmatpush3.bf16.msra.mxu1 %v765_v1  ;;  %v770_v6 = vld [vmem:[%s953_s1 + $0x60] sm:$0xff]   ;;  %v772_v8 = vld [vmem:[%s953_s1 + $0x58] sm:$0xff]   ;;  %s887_s11 = scalar_lea.vmem %s952_s0, %s675_s6  ;;  %v774_v10 = vld [vmem:[%s953_s1 + $0x50] sm:$0xff]   ;;  %s925_s8 = scalar_lea.vmem %s955_s3, %s639_s5 }
   0xf   : > { %686 = vmatprep.subr.bf16.mxu0 %v766_v2  ;;  %725 = vmatprep.subr.bf16.mxu1 %v766_v2  ;;  %v771_v7 = vld [vmem:[%s953_s1 + $0x20] sm:$0xff]   ;;  %v773_v9 = vld [vmem:[%s953_s1 + $0x18] sm:$0xff]   ;;  %v775_v13 = vld [vmem:[%s953_s1 + $0x10] sm:$0xff]  }
  0x10   : > { %v782_v11 = vld [vmem:[%s887_s11 + $0x4] ss:$8 sps:$4 sm:$0xff]   ;;  %v780_v18 = vld [vmem:[%s887_s11] ss:$8 sps:$4 sm:$0xff]   ;;  %v786_v20 = vld [vmem:[%s887_s11 + $0x14] ss:$8 sps:$4 sm:$0xff]  }
  0x11   : > { %v785_v12 = vld [vmem:[%s887_s11 + $0x24] ss:$8 sps:$4 sm:$0xff]   ;;  %444 = vmatprep.mubr.bf16.mxu0 %v782_v11  ;;  %v783_v19 = vld [vmem:[%s887_s11 + $0x20] ss:$8 sps:$4 sm:$0xff]   ;;  %v788_v21 = vld [vmem:[%s887_s11 + $0x34] ss:$8 sps:$4 sm:$0xff]  }
  0x12   : > { %687 = vmatpush3.bf16.msra.mxu0 %v767_v3  ;;  %733 = vmatpush3.bf16.msra.mxu1 %v767_v3  ;;  %v776_v14 = vld [vmem:[%s953_s1 + $0x48] sm:$0xff]   ;;  %v778_v16 = vld [vmem:[%s953_s1 + $0x40] sm:$0xff]   ;;  %v790_v22 = vld [vmem:[%s887_s11 + $0x10] ss:$8 sps:$4 sm:$0xff]  }
  0x13   : > { %688 = vmatprep.subr.bf16.mxu0 %v768_v4  ;;  %726 = vmatprep.subr.bf16.mxu1 %v768_v4  ;;  %v777_v15 = vld [vmem:[%s953_s1 + $0x8] sm:$0xff]   ;;  %v779_v17 = vld [vmem:[%s953_s1] sm:$0xff]   ;;  %v791_v23 = vld [vmem:[%s887_s11 + $0x30] ss:$8 sps:$4 sm:$0xff]  }
  0x14   : > { %460 = vmatprep.mubr.bf16.mxu1 %v785_v12  ;;  %v640_v26 = vld [vmem:[%s954_s2] ss:$0 sm:$0xff] }
  0x16   : > { %689 = vmatpush3.bf16.msra.mxu0 %v769_v5  ;;  %734 = vmatpush3.bf16.msra.mxu1 %v769_v5 }
  0x17   : > { %690 = vmatprep.subr.bf16.mxu0 %v770_v6  ;;  %727 = vmatprep.subr.bf16.mxu1 %v770_v6 }
  0x1a   : > { %691 = vmatpush3.bf16.msra.mxu0 %v771_v7  ;;  %735 = vmatpush3.bf16.msra.mxu1 %v771_v7 }
  0x1b   : > { %692 = vmatprep.subr.bf16.mxu0 %v772_v8  ;;  %728 = vmatprep.subr.bf16.mxu1 %v772_v8 }
  0x1e   : > { %693 = vmatpush3.bf16.msra.mxu0 %v773_v9  ;;  %736 = vmatpush3.bf16.msra.mxu1 %v773_v9 }
  0x1f   : > { %694 = vmatprep.subr.bf16.mxu0 %v774_v10  ;;  %729 = vmatprep.subr.bf16.mxu1 %v774_v10 }
  0x22   : > { %695 = vmatpush3.bf16.msra.mxu0 %v775_v13  ;;  %737 = vmatpush3.bf16.msra.mxu1 %v775_v13 }
  0x23   : > { %696 = vmatprep.subr.bf16.mxu0 %v776_v14  ;;  %730 = vmatprep.subr.bf16.mxu1 %v776_v14 }
  0x26   : > { %697 = vmatpush3.bf16.msra.mxu0 %v777_v15  ;;  %738 = vmatpush3.bf16.msra.mxu1 %v777_v15 }
  0x27   : > { %698 = vmatprep.subr.bf16.mxu0 %v778_v16  ;;  %731 = vmatprep.subr.bf16.mxu1 %v778_v16 }
  0x2a   : > { %699 = vmatpush3.bf16.msra.mxu0 %v779_v17  ;;  %739 = vmatpush3.bf16.msra.mxu1 %v779_v17 }
  0x2d   : > { %445 = vmatmul.mubr.bf16.vlgmr.msra.gmra.mxu0 %v780_v18  ;;  %461 = vmatmul.mubr.bf16.vlgmr.msra.gmra.mxu1 %v783_v19 }
  0x2e   : > { %452 = vmatprep.mubr.bf16.mxu0 %v786_v20  ;;  %468 = vmatprep.mubr.bf16.mxu1 %v788_v21 }
  0x35   : > { %453 = vmatmul.mubr.bf16.gmra.mxu0 %v790_v22  ;;  %469 = vmatmul.mubr.bf16.gmra.mxu1 %v791_v23 }
  0xed   : > { %v700_v24 = vpop.f32.mrf.mxu0  ;;  %v712_v25 = vpop.f32.mrf.mxu1 }
  0xef   : > { %v701_v27 = vpop.f32.mrf.mxu0  ;;  %v713_v28 = vpop.f32.mrf.mxu1 }
  0xf0   : > { %v702_v29 = vadd.f32 %v701_v27, %v700_v24  ;;  %v714_v30 = vadd.f32 %v713_v28, %v712_v25 }
  0xf1   : > { %v703_v31 = vpop.f32.mrf.mxu0  ;;  %v715_v32 = vpop.f32.mrf.mxu1 }
  0xf2   : > { %v447_v33 = vadd.f32 %v702_v29, %v640_v26  ;;  %v463_v34 = vadd.f32 %v714_v30, %v640_v26 }
  0xf3   : > { %v704_v35 = vpop.f32.mrf.mxu0  ;;  %v716_v36 = vpop.f32.mrf.mxu1 }
  0xf4   : > { %v477_v37 = vmax.f32 %v447_v33, 0.0  ;;  %v481_v38 = vmax.f32 %v463_v34, 0.0  ;;  %v705_v39 = vadd.f32 %v704_v35, %v703_v31  ;;  %v717_v40 = vadd.f32 %v716_v36, %v715_v32 }
  0xf5   : > { %v706_v41 = vpop.f32.mrf.mxu0  ;;  %v718_v42 = vpop.f32.mrf.mxu1 }
  0xf6   : > { %v676_v43 = vpack.c.bf16 %v477_v37, %v477_v37  ;;  %v680_v44 = vpack.c.bf16 %v481_v38, %v481_v38  ;;  %v450_v45 = vadd.f32 %v705_v39, %v640_v26  ;;  %v466_v46 = vadd.f32 %v717_v40, %v640_v26 }
  0xf7   : > { %v707_v47 = vpop.f32.mrf.mxu0  ;;  %v719_v48 = vpop.f32.mrf.mxu1 }
  0xf8   : > { %518 = vst.msk [vmem:[%s925_s8] sm:$0xf] %vm517_vm0, %v676_v43  ;;  %522 = vst.msk [vmem:[%s925_s8 + $0x10] sm:$0xf] %vm517_vm0, %v680_v44  ;;  %v478_v49 = vmax.f32 %v450_v45, 0.0  ;;  %v482_v50 = vmax.f32 %v466_v46, 0.0  ;;  %v708_v51 = vadd.f32 %v707_v47, %v706_v41  ;;  %v720_v52 = vadd.f32 %v719_v48, %v718_v42 }
  0xf9   : > { %v709_v53 = vpop.f32.mrf.mxu0  ;;  %v721_v54 = vpop.f32.mrf.mxu1 }
  0xfa   : > { %v677_v55 = vpack.c.bf16 %v478_v49, %v478_v49  ;;  %v681_v56 = vpack.c.bf16 %v482_v50, %v482_v50  ;;  %v455_v57 = vadd.f32 %v708_v51, %v640_v26  ;;  %v471_v58 = vadd.f32 %v720_v52, %v640_v26 }
  0xfb   : > { %v710_v59 = vpop.f32.mrf.mxu0  ;;  %v722_v60 = vpop.f32.mrf.mxu1 }
  0xfc   : > { %519 = vst.msk [vmem:[%s925_s8 + $0x4] sm:$0xf] %vm517_vm0, %v677_v55  ;;  %523 = vst.msk [vmem:[%s925_s8 + $0x14] sm:$0xf] %vm517_vm0, %v681_v56  ;;  %v479_v61 = vmax.f32 %v455_v57, 0.0  ;;  %v483_v62 = vmax.f32 %v471_v58, 0.0  ;;  %v711_v63 = vadd.f32 %v710_v59, %v709_v53  ;;  %v723_v0 = vadd.f32 %v722_v60, %v721_v54 }
  0xfe   : > { %v678_v1 = vpack.c.bf16 %v479_v61, %v479_v61  ;;  %v682_v2 = vpack.c.bf16 %v483_v62, %v483_v62  ;;  %v458_v3 = vadd.f32 %v711_v63, %v640_v26  ;;  %v474_v4 = vadd.f32 %v723_v0, %v640_v26 }
 0x100   : > { %520 = vst.msk [vmem:[%s925_s8 + $0x8] sm:$0xf] %vm517_vm0, %v678_v1  ;;  %524 = vst.msk [vmem:[%s925_s8 + $0x18] sm:$0xf] %vm517_vm0, %v682_v2  ;;  %v480_v5 = vmax.f32 %v458_v3, 0.0  ;;  %v484_v6 = vmax.f32 %v474_v4, 0.0 }
 0x102   : > { %v679_v7 = vpack.c.bf16 %v480_v5, %v480_v5  ;;  %v683_v8 = vpack.c.bf16 %v484_v6, %v484_v6 }
 0x104   : > { %521 = vst.msk [vmem:[%s925_s8 + $0xc] sm:$0xf] %vm517_vm0, %v679_v7  ;;  %525 = vst.msk [vmem:[%s925_s8 + $0x1c] sm:$0xf] %vm517_vm0, %v683_v8 }
 0x105 PF: > { %s13_s14 = sadd.s32 1, %s814_s14   ;;  %s956_s12 = smov %s810_s13 }
 0x106   : > { %p10_p5 = scmp.ge.s32.totalorder %s13_s14, 4   ;;  %s957_s13 = smov %s959_s15 }
 0x108   :  { %12 = sbr.rel (!%p10_p5) target bundleno = 2 (0x2), region = 68 }

// kernel: encoder_forward.17
= control target key start
LH: loop header
LB: loop body
LE: loop exit
PB: predicated region body
PF: predicated region fallthrough
CT: control target
= control target key end

     0   :  { %s679_s12 = smov 0   ;;  %s681_s13 = smov 0   ;;  %s767_s0 = inlined_call_operand.vmem [shape: bf16[32,256], index: 0, kind: input, shape index: {}]   ;;  %s768_s1 = inlined_call_operand.vmem [shape: bf16[256,32], index: 1, kind: input, shape index: {}]   ;;  %s769_s2 = inlined_call_operand.vmem [shape: f32[1,32], index: 2, kind: input, shape index: {}]   ;;  %s770_s3 = inlined_call_operand.vmem [shape: bf16[32,32], index: 3, kind: output, shape index: {}]  }
   0x1   :  { %s683_s14 = smov 0  }
   0x2 LB: > { %s25_s15 = sadd.s32 1, %s653_s13  ;;  %p538_p0 = scmp.ge.s32.totalorder %s657_s14, 1  ;;  %s657_s14 = sphi %s683_s14, %s13_s14   ;;  %s653_s13 = sphi %s681_s13, %s772_s13   ;;  %s649_s12 = sphi %s679_s12, %s771_s12  }
   0x3   : > { %p27_p1 = scmp.ge.s32.totalorder %s25_s15, 2  ;;  %p170_p2 = scmp.lt.s32.totalorder %s657_s14, 3 }
   0x5   : > { %s774_s15 = smov (%p27_p1, %s25_s15), 0  ;;  %p171_p3 = pnand %p538_p0, %p170_p2 }
   0x6   : > { %s539_s18 = sshll.u32 (!%p171_p3), %s649_s12, 1 }
   0x7   : > { %174 = sbr.rel (%p171_p3) target bundleno = 253 (0xfd), region = 32  ;;  %p206_p4 = scmp.lt.s32.totalorder (!%p171_p3), %s539_s18, 3 }
   0xc   : > { %v616_v0 = vld [vmem:[%s768_s1 + $0x78] sm:$0xff]   ;;  %v618_v2 = vld [vmem:[%s768_s1 + $0x70] sm:$0xff]   ;;  %v620_v4 = vld [vmem:[%s768_s1 + $0x68] sm:$0xff]   ;;  %s776_s18 = smov (!%p206_p4, %s539_s18), 3  ;;  %vm427_vm0 = vcmask 257024  }
   0xd   : > { %v617_v1 = vld [vmem:[%s768_s1 + $0x38] sm:$0xff]   ;;  %570 = vmatprep.subr.bf16.mxu0 %v616_v0  ;;  %v619_v3 = vld [vmem:[%s768_s1 + $0x30] sm:$0xff]   ;;  %v621_v5 = vld [vmem:[%s768_s1 + $0x28] sm:$0xff]   ;;  %s567_s6 = sshll.u32 %s776_s18, 3  ;;  %s543_s5 = sshll.u32 %s776_s18, 2 }
   0xe   : > { %571 = vmatpush3.bf16.msra.mxu0 %v617_v1  ;;  %v622_v6 = vld [vmem:[%s768_s1 + $0x60] sm:$0xff]   ;;  %v624_v8 = vld [vmem:[%s768_s1 + $0x58] sm:$0xff]   ;;  %s210_s11 = scalar_lea.vmem %s767_s0, %s567_s6  ;;  %v626_v10 = vld [vmem:[%s768_s1 + $0x50] sm:$0xff]   ;;  %s226_s8 = scalar_lea.vmem %s770_s3, %s543_s5 }
   0xf   : > { %572 = vmatprep.subr.bf16.mxu0 %v618_v2  ;;  %v623_v7 = vld [vmem:[%s768_s1 + $0x20] sm:$0xff]   ;;  %v625_v9 = vld [vmem:[%s768_s1 + $0x18] sm:$0xff]   ;;  %v627_v12 = vld [vmem:[%s768_s1 + $0x10] sm:$0xff]  }
  0x10   : > { %v634_v11 = vld [vmem:[%s210_s11 + $0x4] ss:$8 sps:$4 sm:$0xff]   ;;  %v632_v17 = vld [vmem:[%s210_s11] ss:$8 sps:$4 sm:$0xff]  }
  0x11   : > { %408 = vmatprep.mubr.bf16.mxu0 %v634_v11  ;;  %v628_v13 = vld [vmem:[%s768_s1 + $0x48] sm:$0xff]   ;;  %v630_v15 = vld [vmem:[%s768_s1 + $0x40] sm:$0xff]  }
  0x12   : > { %573 = vmatpush3.bf16.msra.mxu0 %v619_v3  ;;  %v629_v14 = vld [vmem:[%s768_s1 + $0x8] sm:$0xff]   ;;  %v631_v16 = vld [vmem:[%s768_s1] sm:$0xff]  }
  0x13   : > { %574 = vmatprep.subr.bf16.mxu0 %v620_v4  ;;  %v544_v19 = vld [vmem:[%s769_s2] ss:$0 sm:$0xff] }
  0x16   : > { %575 = vmatpush3.bf16.msra.mxu0 %v621_v5 }
  0x17   : > { %576 = vmatprep.subr.bf16.mxu0 %v622_v6 }
  0x1a   : > { %577 = vmatpush3.bf16.msra.mxu0 %v623_v7 }
  0x1b   : > { %578 = vmatprep.subr.bf16.mxu0 %v624_v8 }
  0x1e   : > { %579 = vmatpush3.bf16.msra.mxu0 %v625_v9 }
  0x1f   : > { %580 = vmatprep.subr.bf16.mxu0 %v626_v10 }
  0x22   : > { %581 = vmatpush3.bf16.msra.mxu0 %v627_v12 }
  0x23   : > { %582 = vmatprep.subr.bf16.mxu0 %v628_v13 }
  0x26   : > { %583 = vmatpush3.bf16.msra.mxu0 %v629_v14 }
  0x27   : > { %584 = vmatprep.subr.bf16.mxu0 %v630_v15 }
  0x2a   : > { %585 = vmatpush3.bf16.msra.mxu0 %v631_v16 }
  0x2d   : > { %409 = vmatmul.mubr.bf16.vlgmr.msra.gmra.mxu0 %v632_v17 }
  0xed   : > { %v586_v18 = vpop.f32.mrf.mxu0 }
  0xef   : > { %v587_v20 = vpop.f32.mrf.mxu0 }
  0xf0   : > { %v588_v21 = vadd.f32 %v587_v20, %v586_v18 }
  0xf1   : > { %v589_v22 = vpop.f32.mrf.mxu0 }
  0xf2   : > { %v411_v23 = vadd.f32 %v588_v21, %v544_v19 }
  0xf3   : > { %v590_v24 = vpop.f32.mrf.mxu0 }
  0xf4   : > { %v417_v25 = vmax.f32 %v411_v23, 0.0  ;;  %v591_v26 = vadd.f32 %v590_v24, %v589_v22 }
  0xf6   : > { %v568_v27 = vpack.c.bf16 %v417_v25, %v417_v25  ;;  %v414_v28 = vadd.f32 %v591_v26, %v544_v19 }
  0xf8   : > { %428 = vst.msk [vmem:[%s226_s8] sm:$0xf] %vm427_vm0, %v568_v27  ;;  %v418_v29 = vmax.f32 %v414_v28, 0.0 }
  0xfa   : > { %v569_v30 = vpack.c.bf16 %v418_v29, %v418_v29 }
  0xfc   : > { %429 = vst.msk [vmem:[%s226_s8 + $0x4] sm:$0xf] %vm427_vm0, %v569_v30 }
  0xfd PF: > { %s13_s14 = sadd.s32 1, %s657_s14   ;;  %s771_s12 = smov %s653_s13 }
  0xfe   : > { %p10_p5 = scmp.ge.s32.totalorder %s13_s14, 4   ;;  %s772_s13 = smov %s774_s15 }
 0x100   :  { %12 = sbr.rel (!%p10_p5) target bundleno = 2 (0x2), region = 68 }

// kernel: encoder_forward.18
= control target key start
LH: loop header
LB: loop body
LE: loop exit
PB: predicated region body
PF: predicated region fallthrough
CT: control target
= control target key end

     0   :  { %s842_s12 = smov 0   ;;  %s844_s13 = smov 0   ;;  %s957_s0 = inlined_call_operand.vmem [shape: bf16[32,384], index: 0, kind: input, shape index: {}]   ;;  %s958_s1 = inlined_call_operand.vmem [shape: bf16[384,32], index: 1, kind: input, shape index: {}]   ;;  %s959_s2 = inlined_call_operand.vmem [shape: f32[1,32], index: 2, kind: input, shape index: {}]   ;;  %s960_s3 = inlined_call_operand.vmem [shape: bf16[32,32], index: 3, kind: output, shape index: {}]  }
   0x1   :  { %s846_s14 = smov 0  }
   0x2 LB: > { %s25_s15 = sadd.s32 1, %s814_s13  ;;  %p651_p0 = scmp.ge.s32.totalorder %s818_s14, 1  ;;  %s818_s14 = sphi %s846_s14, %s13_s14   ;;  %s814_s13 = sphi %s844_s13, %s962_s13   ;;  %s810_s12 = sphi %s842_s12, %s961_s12  }
   0x3   : > { %p27_p1 = scmp.ge.s32.totalorder %s25_s15, 2  ;;  %p170_p2 = scmp.lt.s32.totalorder %s818_s14, 3 }
   0x5   : > { %s964_s15 = smov (%p27_p1, %s25_s15), 0  ;;  %p171_p3 = pnand %p651_p0, %p170_p2 }
   0x6   : > { %s652_s5 = sshll.u32 (!%p171_p3), %s810_s12, 1 }
   0x7   : > { %174 = sbr.rel (%p171_p3) target bundleno = 255 (0xff), region = 32  ;;  %p206_p4 = scmp.lt.s32.totalorder (!%p171_p3), %s652_s5, 3 }
   0xc   : > { %v768_v0 = vld [vmem:[%s958_s1 + $0x78] sm:$0xff]   ;;  %v820_v1 = vmov 0.0   ;;  %v771_v4 = vld [vmem:[%s958_s1 + $0x70] sm:$0xff]   ;;  %vm821_vm0 = vmmov 0   ;;  %v774_v7 = vld [vmem:[%s958_s1 + $0x68] sm:$0xff]   ;;  %s966_s5 = smov (!%p206_p4, %s652_s5), 3 }
   0xd   : > { %721 = vmatprep.subr.bf16.mxu1 %v820_v1  ;;  %v769_v2 = vld [vmem:[%s958_s1 + $0x38] sm:$0xff]   ;;  %690 = vmatprep.subr.bf16.mxu0 %v768_v0  ;;  %v772_v5 = vld [vmem:[%s958_s1 + $0x30] sm:$0xff]   ;;  %v775_v8 = vld [vmem:[%s958_s1 + $0x28] sm:$0xff]   ;;  %s741_s27 = smul.u32 12, %s966_s5  ;;  %s655_s24 = sshll.u32 %s966_s5, 2  ;;  %vm540_vm1 = vcmask 257024  }
   0xe   : > { %v770_v3 = vld [vmem:[%s958_s1 + $0xb8] sm:$0xff]   ;;  %691 = vmatpush3.bf16.msra.mxu0 %v769_v2  ;;  %737 = vmatprep.mubr.msk.bf16.mxu1 %vm821_vm0, %v820_v1  ;;  %v773_v6 = vld [vmem:[%s958_s1 + $0xb0] sm:$0xff]   ;;  %v776_v9 = vld [vmem:[%s958_s1 + $0xa8] sm:$0xff]  }
   0xf   : > { %722 = vmatpush3.bf16.msra.mxu1 %v770_v3  ;;  %692 = vmatprep.subr.bf16.mxu0 %v771_v4  ;;  %v777_v10 = vld [vmem:[%s958_s1 + $0x60] sm:$0xff]   ;;  %v780_v13 = vld [vmem:[%s958_s1 + $0x58] sm:$0xff]   ;;  %v783_v16 = vld [vmem:[%s958_s1 + $0x50] sm:$0xff]   ;;  %s210_s10 = scalar_lea.vmem %s957_s0, %s741_s27  ;;  %s226_s27 = scalar_lea.vmem %s960_s3, %s655_s24 }
  0x10   : > { %723 = vmatprep.subr.bf16.mxu1 %v820_v1  ;;  %v778_v11 = vld [vmem:[%s958_s1 + $0x20] sm:$0xff]   ;;  %v781_v14 = vld [vmem:[%s958_s1 + $0x18] sm:$0xff]   ;;  %v784_v17 = vld [vmem:[%s958_s1 + $0x10] sm:$0xff]  }
  0x11   : > { %v779_v12 = vld [vmem:[%s958_s1 + $0xa0] sm:$0xff]   ;;  %v782_v15 = vld [vmem:[%s958_s1 + $0x98] sm:$0xff]   ;;  %v785_v18 = vld [vmem:[%s958_s1 + $0x90] sm:$0xff]  }
  0x12   : > { %693 = vmatpush3.bf16.msra.mxu0 %v772_v5  ;;  %v786_v19 = vld [vmem:[%s958_s1 + $0x48] sm:$0xff]   ;;  %v789_v22 = vld [vmem:[%s958_s1 + $0x40] sm:$0xff]  }
  0x13   : > { %724 = vmatpush3.bf16.msra.mxu1 %v773_v6  ;;  %694 = vmatprep.subr.bf16.mxu0 %v774_v7  ;;  %v787_v20 = vld [vmem:[%s958_s1 + $0x8] sm:$0xff]   ;;  %v794_v23 = vld [vmem:[%s210_s10 + $0x4] ss:$12 sps:$4 sm:$0xff]   ;;  %v656_v30 = vld [vmem:[%s959_s2] ss:$0 sm:$0xff] }
  0x14   : > { %725 = vmatprep.subr.bf16.mxu1 %v820_v1  ;;  %v788_v21 = vld [vmem:[%s958_s1 + $0x88] sm:$0xff]   ;;  %v790_v24 = vld [vmem:[%s958_s1] sm:$0xff]   ;;  %480 = vmatprep.mubr.bf16.mxu0 %v794_v23 }
  0x15   : > { %v791_v25 = vld [vmem:[%s958_s1 + $0x80] sm:$0xff]   ;;  %v795_v27 = vld [vmem:[%s210_s10 + $0x8] ss:$12 sps:$4 sm:$0xff]  }
  0x16   : > { %695 = vmatpush3.bf16.msra.mxu0 %v775_v8  ;;  %v792_v26 = vld [vmem:[%s210_s10] ss:$12 sps:$4 sm:$0xff]  }
  0x17   : > { %726 = vmatpush3.bf16.msra.mxu1 %v776_v9  ;;  %696 = vmatprep.subr.bf16.mxu0 %v777_v10 }
  0x18   : > { %727 = vmatprep.subr.bf16.mxu1 %v820_v1 }
  0x1a   : > { %697 = vmatpush3.bf16.msra.mxu0 %v778_v11 }
  0x1b   : > { %728 = vmatpush3.bf16.msra.mxu1 %v779_v12  ;;  %698 = vmatprep.subr.bf16.mxu0 %v780_v13 }
  0x1c   : > { %729 = vmatprep.subr.bf16.mxu1 %v820_v1 }
  0x1e   : > { %699 = vmatpush3.bf16.msra.mxu0 %v781_v14 }
  0x1f   : > { %730 = vmatpush3.bf16.msra.mxu1 %v782_v15  ;;  %700 = vmatprep.subr.bf16.mxu0 %v783_v16 }
  0x20   : > { %731 = vmatprep.subr.bf16.mxu1 %v820_v1 }
  0x22   : > { %701 = vmatpush3.bf16.msra.mxu0 %v784_v17 }
  0x23   : > { %732 = vmatpush3.bf16.msra.mxu1 %v785_v18  ;;  %702 = vmatprep.subr.bf16.mxu0 %v786_v19 }
  0x24   : > { %733 = vmatprep.subr.bf16.mxu1 %v820_v1 }
  0x26   : > { %703 = vmatpush3.bf16.msra.mxu0 %v787_v20 }
  0x27   : > { %734 = vmatpush3.bf16.msra.mxu1 %v788_v21  ;;  %704 = vmatprep.subr.bf16.mxu0 %v789_v22 }
  0x28   : > { %735 = vmatprep.subr.bf16.mxu1 %v820_v1 }
  0x2a   : > { %705 = vmatpush3.bf16.msra.mxu0 %v790_v24 }
  0x2b   : > { %736 = vmatpush3.bf16.msra.mxu1 %v791_v25 }
  0x2d   : > { %481 = vmatmul.mubr.bf16.vlgmr.msra.gmra.mxu0 %v792_v26 }
  0x2e   : > { %738 = vmatmul.mubr.bf16.vlgmr.msra.gmra.mxu1 %v795_v27 }
  0xed   : > { %v706_v28 = vpop.f32.mrf.mxu0 }
  0xee   : > { %v523_v29 = vpop.f32.mrf.mxu1 }
  0xef   : > { %v707_v31 = vpop.f32.mrf.mxu0 }
  0xf0   : > { %v708_v32 = vadd.f32 %v707_v31, %v706_v28  ;;  %v739_v33 = vpop.f32.mrf.mxu1 }
  0xf1   : > { %v709_v34 = vpop.f32.mrf.mxu0 }
  0xf2   : > { %v483_v35 = vadd.f32 %v708_v32, %v656_v30  ;;  %v526_v36 = vpop.f32.mrf.mxu1 }
  0xf3   : > { %v710_v37 = vpop.f32.mrf.mxu0 }
  0xf4   : > { %v524_v38 = vadd.f32 %v523_v29, %v483_v35  ;;  %v711_v39 = vadd.f32 %v710_v37, %v709_v34  ;;  %v740_v40 = vpop.f32.mrf.mxu1 }
  0xf6   : > { %v530_v41 = vmax.f32 %v524_v38, 0.0  ;;  %v486_v42 = vadd.f32 %v711_v39, %v656_v30 }
  0xf8   : > { %v688_v43 = vpack.c.bf16 %v530_v41, %v530_v41  ;;  %v527_v44 = vadd.f32 %v526_v36, %v486_v42 }
  0xfa   : > { %541 = vst.msk [vmem:[%s226_s27] sm:$0xf] %vm540_vm1, %v688_v43  ;;  %v531_v45 = vmax.f32 %v527_v44, 0.0 }
  0xfc   : > { %v689_v46 = vpack.c.bf16 %v531_v45, %v531_v45 }
  0xfe   : > { %542 = vst.msk [vmem:[%s226_s27 + $0x4] sm:$0xf] %vm540_vm1, %v689_v46 }
  0xff PF: > { %s13_s14 = sadd.s32 1, %s818_s14   ;;  %s961_s12 = smov %s814_s13 }
 0x100   : > { %p10_p5 = scmp.ge.s32.totalorder %s13_s14, 4   ;;  %s962_s13 = smov %s964_s15 }
 0x102   :  { %12 = sbr.rel (!%p10_p5) target bundleno = 2 (0x2), region = 68 }

// kernel: encoder_forward.19
= control target key start
LH: loop header
LB: loop body
LE: loop exit
PB: predicated region body
PF: predicated region fallthrough
CT: control target
= control target key end

     0   :  { %v423_v1 = vmov 0.0   ;;  %vm424_vm0 = vmmov 0   ;;  %vm309_vm1 = vcmask 519168   ;;  %s529_s1 = inlined_call_operand.vmem [shape: bf16[384,64], index: 1, kind: input, shape index: {}]   ;;  %s530_s0 = inlined_call_operand.vmem [shape: bf16[8,384], index: 0, kind: input, shape index: {}]   ;;  %s531_s2 = inlined_call_operand.vmem [shape: f32[1,64], index: 2, kind: input, shape index: {}]   ;;  %s532_s3 = inlined_call_operand.vmem [shape: bf16[8,64], index: 3, kind: output, shape index: {}]  }
   0x1   :  { %v396_v0 = vld [vmem:[%s529_s1 + $0x78] sm:$0xff]   ;;  %374 = vmatprep.subr.bf16.mxu1 %v423_v1  ;;  %390 = vmatprep.mubr.msk.bf16.mxu1 %vm424_vm0, %v423_v1  ;;  %v399_v4 = vld [vmem:[%s529_s1 + $0x70] sm:$0xff]   ;;  %v402_v7 = vld [vmem:[%s529_s1 + $0x68] sm:$0xff]  }
   0x2   :  { %v397_v2 = vld [vmem:[%s529_s1 + $0x38] sm:$0xff]   ;;  %343 = vmatprep.subr.bf16.mxu0 %v396_v0  ;;  %v400_v5 = vld [vmem:[%s529_s1 + $0x30] sm:$0xff]   ;;  %v403_v8 = vld [vmem:[%s529_s1 + $0x28] sm:$0xff]  }
   0x3   :  { %v398_v3 = vld [vmem:[%s529_s1 + $0xb8] sm:$0xff]   ;;  %344 = vmatpush3.bf16.msra.mxu0 %v397_v2  ;;  %v401_v6 = vld [vmem:[%s529_s1 + $0xb0] sm:$0xff]   ;;  %v404_v9 = vld [vmem:[%s529_s1 + $0xa8] sm:$0xff]  }
   0x4   :  { %375 = vmatpush3.bf16.msra.mxu1 %v398_v3  ;;  %345 = vmatprep.subr.bf16.mxu0 %v399_v4  ;;  %v405_v10 = vld [vmem:[%s529_s1 + $0x60] sm:$0xff]   ;;  %v408_v13 = vld [vmem:[%s529_s1 + $0x58] sm:$0xff]   ;;  %v411_v16 = vld [vmem:[%s529_s1 + $0x50] sm:$0xff]  }
   0x5   :  { %376 = vmatprep.subr.bf16.mxu1 %v423_v1  ;;  %v406_v11 = vld [vmem:[%s529_s1 + $0x20] sm:$0xff]   ;;  %v409_v14 = vld [vmem:[%s529_s1 + $0x18] sm:$0xff]   ;;  %v412_v17 = vld [vmem:[%s529_s1 + $0x10] sm:$0xff]  }
   0x6   :  { %v407_v12 = vld [vmem:[%s529_s1 + $0xa0] sm:$0xff]   ;;  %v410_v15 = vld [vmem:[%s529_s1 + $0x98] sm:$0xff]   ;;  %v413_v18 = vld [vmem:[%s529_s1 + $0x90] sm:$0xff]  }
   0x7   :  { %346 = vmatpush3.bf16.msra.mxu0 %v400_v5  ;;  %v414_v19 = vld [vmem:[%s529_s1 + $0x48] sm:$0xff]   ;;  %v417_v22 = vld [vmem:[%s529_s1 + $0x40] sm:$0xff]  }
   0x8   :  { %377 = vmatpush3.bf16.msra.mxu1 %v401_v6  ;;  %347 = vmatprep.subr.bf16.mxu0 %v402_v7  ;;  %v415_v20 = vld [vmem:[%s529_s1 + $0x8] sm:$0xff]   ;;  %v15_v23 = vld [vmem:[%s530_s0] sm:$0xff] }
   0x9   :  { %378 = vmatprep.subr.bf16.mxu1 %v423_v1  ;;  %v416_v21 = vld [vmem:[%s529_s1 + $0x88] sm:$0xff]   ;;  %v317_v24 = vcombine.high %v15_v23, %v15_v23  ;;  %v418_v25 = vld [vmem:[%s529_s1] sm:$0xff]   ;;  %v316_v27 = vcombine.low %v15_v23, %v15_v23 }
   0xa   :  { %v419_v26 = vld [vmem:[%s529_s1 + $0x80] sm:$0xff]   ;;  %v422_v28 = vld [vmem:[%s530_s0 + $0x8] ss:$0 sps:$4 sm:$0xff]  }
   0xb   :  { %348 = vmatpush3.bf16.msra.mxu0 %v403_v8  ;;  %259 = vmatprep.mubr.bf16.mxu0 %v317_v24  ;;  %v315_v31 = vld [vmem:[%s531_s2] ss:$0 sm:$0xff] }
   0xc   :  { %379 = vmatpush3.bf16.msra.mxu1 %v404_v9  ;;  %349 = vmatprep.subr.bf16.mxu0 %v405_v10 }
   0xd   :  { %380 = vmatprep.subr.bf16.mxu1 %v423_v1 }
   0xf   :  { %350 = vmatpush3.bf16.msra.mxu0 %v406_v11 }
  0x10   :  { %381 = vmatpush3.bf16.msra.mxu1 %v407_v12  ;;  %351 = vmatprep.subr.bf16.mxu0 %v408_v13 }
  0x11   :  { %382 = vmatprep.subr.bf16.mxu1 %v423_v1 }
  0x13   :  { %352 = vmatpush3.bf16.msra.mxu0 %v409_v14 }
  0x14   :  { %383 = vmatpush3.bf16.msra.mxu1 %v410_v15  ;;  %353 = vmatprep.subr.bf16.mxu0 %v411_v16 }
  0x15   :  { %384 = vmatprep.subr.bf16.mxu1 %v423_v1 }
  0x17   :  { %354 = vmatpush3.bf16.msra.mxu0 %v412_v17 }
  0x18   :  { %385 = vmatpush3.bf16.msra.mxu1 %v413_v18  ;;  %355 = vmatprep.subr.bf16.mxu0 %v414_v19 }
  0x19   :  { %386 = vmatprep.subr.bf16.mxu1 %v423_v1 }
  0x1b   :  { %356 = vmatpush3.bf16.msra.mxu0 %v415_v20 }
  0x1c   :  { %387 = vmatpush3.bf16.msra.mxu1 %v416_v21  ;;  %357 = vmatprep.subr.bf16.mxu0 %v417_v22 }
  0x1d   :  { %388 = vmatprep.subr.bf16.mxu1 %v423_v1 }
  0x1f   :  { %358 = vmatpush3.bf16.msra.mxu0 %v418_v25 }
  0x20   :  { %389 = vmatpush3.bf16.msra.mxu1 %v419_v26 }
  0x22   :  { %260 = vmatmul.mubr.bf16.vlgmr.msra.gmra.mxu0 %v316_v27 }
  0x23   :  { %391 = vmatmul.mubr.bf16.vlgmr.msra.gmra.mxu1 %v422_v28 }
  0xe2   :  { %v359_v29 = vpop.f32.mrf.mxu0 }
  0xe3   :  { %v301_v30 = vpop.f32.mrf.mxu1 }
  0xe4   :  { %v360_v32 = vpop.f32.mrf.mxu0 }
  0xe5   :  { %v361_v33 = vadd.f32 %v360_v32, %v359_v29  ;;  %v392_v34 = vpop.f32.mrf.mxu1 }
  0xe6   :  { %v362_v35 = vpop.f32.mrf.mxu0 }
  0xe7   :  { %v262_v36 = vadd.f32 %v361_v33, %v315_v31  ;;  %v304_v37 = vpop.f32.mrf.mxu1 }
  0xe8   :  { %v363_v38 = vpop.f32.mrf.mxu0 }
  0xe9   :  { %v302_v39 = vadd.f32 %v301_v30, %v262_v36  ;;  %v393_v40 = vpop.f32.mrf.mxu1 }
  0xeb   :  { %v307_v41 = vmax.f32 %v302_v39, 0.0 }
  0xed   :  { %v308_v42 = vpack.c.bf16 %v307_v41, %v307_v41 }
  0xef   :  { %310 = vst.msk [vmem:[%s532_s3] sm:$0xf] %vm309_vm1, %v308_v42 }

// kernel: encoder_forward.21
= control target key start
LH: loop header
LB: loop body
LE: loop exit
PB: predicated region body
PF: predicated region fallthrough
CT: control target
= control target key end

     0   :  { %v68_v9 = vlaneseq  ;;  %v314_v13 = vmov 1966171168   ;;  %s393_s0 = inlined_call_operand.vmem [shape: bf16[2,256], index: 0, kind: input, shape index: {}]   ;;  %s394_s1 = inlined_call_operand.vmem [shape: bf16[256,32], index: 1, kind: input, shape index: {}]   ;;  %s395_s2 = inlined_call_operand.vmem [shape: f32[1,32], index: 2, kind: input, shape index: {}]   ;;  %s396_s3 = inlined_call_operand.hbm [shape: f32[2,32], index: 3, kind: output, shape index: {}]  }
   0x1   :  { %v276_v0 = vld [vmem:[%s394_s1 + $0x78] sm:$0xff]   ;;  %v278_v2 = vld [vmem:[%s394_s1 + $0x70] sm:$0xff]   ;;  %v280_v4 = vld [vmem:[%s394_s1 + $0x68] sm:$0xff]   ;;  %v66_v14 = vunpack.c.l.s4 %v314_v13 }
   0x2   :  { %v277_v1 = vld [vmem:[%s394_s1 + $0x38] sm:$0xff]   ;;  %252 = vmatprep.subr.bf16.mxu0 %v276_v0  ;;  %v279_v3 = vld [vmem:[%s394_s1 + $0x30] sm:$0xff]   ;;  %v281_v5 = vld [vmem:[%s394_s1 + $0x28] sm:$0xff]   ;;  %v69_v15 = vshrl.u32 %v68_v9, 7 }
   0x3   :  { %253 = vmatpush3.bf16.msra.mxu0 %v277_v1  ;;  %v282_v6 = vld [vmem:[%s394_s1 + $0x60] sm:$0xff]   ;;  %v284_v8 = vld [vmem:[%s394_s1 + $0x58] sm:$0xff]   ;;  %v286_v11 = vld [vmem:[%s394_s1 + $0x50] sm:$0xff]  }
   0x4   :  { %254 = vmatprep.subr.bf16.mxu0 %v278_v2  ;;  %v283_v7 = vld [vmem:[%s394_s1 + $0x20] sm:$0xff]   ;;  %v285_v10 = vld [vmem:[%s394_s1 + $0x18] sm:$0xff]  }
   0x5   :  { %v235_v12 = vld.sshfl [vmem:[%s393_s0] sm:$0x11 pattern:$0x75316420] }
   0x7   :  { %255 = vmatpush3.bf16.msra.mxu0 %v279_v3 }
   0x8   :  { %256 = vmatprep.subr.bf16.mxu0 %v280_v4 }
   0xb   :  { %257 = vmatpush3.bf16.msra.mxu0 %v281_v5 }
   0xc   :  { %258 = vmatprep.subr.bf16.mxu0 %v282_v6 }
   0xf   :  { %259 = vmatpush3.bf16.msra.mxu0 %v283_v7 }
  0x10   :  { %260 = vmatprep.subr.bf16.mxu0 %v284_v8 }
  0x11   :  { %8 = vsyncpa [#allocation3], 0  ;;  %v287_v16 = vld [vmem:[%s394_s1 + $0x10] sm:$0xff]   ;;  %v64_v17 = vcombine.high %v235_v12, %v235_v12  ;;  %v67_v18 = vunpack.c.0.s8 %v66_v14  ;;  %v288_v19 = vld [vmem:[%s394_s1 + $0x48] sm:$0xff]   ;;  %s315_s20 = smov [#allocation2]   ;;  %vm218_vm0 = vcmask 254976  }
  0x12   :  { %v289_v21 = vld [vmem:[%s394_s1 + $0x8] sm:$0xff]   ;;  %v290_v23 = vld [vmem:[%s394_s1 + $0x40] sm:$0xff]   ;;  %s226_s21 = sshll.u32 %s315_s20, 4  ;;  %s227_s21 = int_to_ptr.vmem [resolvable:$true] %s226_s21 }
  0x13   :  { %261 = vmatpush3.bf16.msra.mxu0 %v285_v10  ;;  %v70_v20 = vsub.s32 %v67_v18, %v69_v15  ;;  %v291_v24 = vld [vmem:[%s394_s1] sm:$0xff]   ;;  %s292_s1 = scalar_lea.vmem %s227_s21, 32  ;;  %p297_p1 = scmp.lt.s32.totalorder %s227_s21, %s227_s21 }
  0x14   :  { %262 = vmatprep.subr.bf16.mxu0 %v286_v11  ;;  %v234_v27 = vld [vmem:[%s395_s2] ss:$0 sm:$0xff]  ;;  %p293_p0 = scmp.ne.s32.totalorder %s227_s21, %s292_s1  ;;  %p298_p2 = scmp.lt.s32.totalorder %s292_s1, %s292_s1 }
  0x15   :  { %v78_v22 = vrot.slane %v64_v17, %v70_v20  ;;  %v71_v25 = vrot.slane %v235_v12, %v70_v20 }
  0x16   :  { %p299_p3 = por %p298_p2, %p297_p1 }
  0x17   :  { %263 = vmatpush3.bf16.msra.mxu0 %v287_v16  ;;  %209 = vmatprep.mubr.bf16.mxu0 %v78_v22 }
  0x18   :  { %264 = vmatprep.subr.bf16.mxu0 %v288_v19  ;;  %p300_p4 = pnand %p299_p3, %p293_p0 }
  0x1b   :  { %265 = vmatpush3.bf16.msra.mxu0 %v289_v21 }
  0x1c   :  { %266 = vmatprep.subr.bf16.mxu0 %v290_v23 }
  0x1f   :  { %267 = vmatpush3.bf16.msra.mxu0 %v291_v24 }
  0x22   :  { %210 = vmatmul.mubr.bf16.vlgmr.msra.gmra.mxu0 %v71_v25 }
  0xe2   :  { %v268_v26 = vpop.f32.mrf.mxu0 }
  0xe4   :  { %v269_v28 = vpop.f32.mrf.mxu0 }
  0xe5   :  { %v270_v29 = vadd.f32 %v269_v28, %v268_v26 }
  0xe6   :  { %v271_v30 = vpop.f32.mrf.mxu0 }
  0xe7   :  { %v212_v31 = vadd.f32 %v270_v29, %v234_v27 }
  0xe8   :  { %v272_v32 = vpop.f32.mrf.mxu0 }
  0xe9   :  { %v217_v33 = vmax.f32 %v212_v31, 0.0 }
  0xeb   :  { %219 = vst.msk [vmem:[#allocation2] sm:$0x3] %vm218_vm0, %v217_v33 }
  0xec   :  { %303 = shalt.err (!%p300_p4)
}
  0xed   :  { %229 = dma.vmem_to_hbm [thread:$0]  %s227_s21, 32, %s396_s3, [#allocation3]  }
  0xee   :  { %312 = dma.done.wait [#allocation3], 32  }
  0xef   :  { %313 = vsyncadd [#allocation3], 4294967264 }
  0xf0   :  { %233 = vsyncpa [#allocation3], 1 }

// kernel: encoder_forward.20
= control target key start
LH: loop header
LB: loop body
LE: loop exit
PB: predicated region body
PF: predicated region fallthrough
CT: control target
= control target key end

     0   :  { %v657_v35 = vmov 0.0   ;;  %vm658_vm0 = vmmov 0   ;;  %vm485_vm1 = vcmask 519168   ;;  %s814_s1 = inlined_call_operand.vmem [shape: bf16[640,64], index: 1, kind: input, shape index: {}]   ;;  %s815_s0 = inlined_call_operand.vmem [shape: bf16[8,640], index: 0, kind: input, shape index: {}]   ;;  %s816_s2 = inlined_call_operand.vmem [shape: f32[1,64], index: 2, kind: input, shape index: {}]   ;;  %s817_s3 = inlined_call_operand.vmem [shape: bf16[8,64], index: 3, kind: output, shape index: {}]  }
   0x1   :  { %v612_v0 = vld [vmem:[%s814_s1 + $0x78] sm:$0xff]   ;;  %v616_v4 = vld [vmem:[%s814_s1 + $0x70] sm:$0xff]   ;;  %v620_v8 = vld [vmem:[%s814_s1 + $0x68] sm:$0xff]  }
   0x2   :  { %v613_v1 = vld [vmem:[%s814_s1 + $0x38] sm:$0xff]   ;;  %537 = vmatprep.subr.bf16.mxu0 %v612_v0  ;;  %v617_v5 = vld [vmem:[%s814_s1 + $0x30] sm:$0xff]   ;;  %v621_v9 = vld [vmem:[%s814_s1 + $0x28] sm:$0xff]  }
   0x3   :  { %v614_v2 = vld [vmem:[%s814_s1 + $0xf8] sm:$0xff]   ;;  %538 = vmatpush3.bf16.msra.mxu0 %v613_v1  ;;  %v618_v6 = vld [vmem:[%s814_s1 + $0xf0] sm:$0xff]   ;;  %v622_v10 = vld [vmem:[%s814_s1 + $0xe8] sm:$0xff]  }
   0x4   :  { %v615_v3 = vld [vmem:[%s814_s1 + $0xb8] sm:$0xff]   ;;  %559 = vmatprep.subr.bf16.mxu1 %v614_v2  ;;  %539 = vmatprep.subr.bf16.mxu0 %v616_v4  ;;  %v619_v7 = vld [vmem:[%s814_s1 + $0xb0] sm:$0xff]   ;;  %v623_v11 = vld [vmem:[%s814_s1 + $0xa8] sm:$0xff]  }
   0x5   :  { %560 = vmatpush3.bf16.msra.mxu1 %v615_v3  ;;  %v624_v12 = vld [vmem:[%s814_s1 + $0x60] sm:$0xff]   ;;  %v628_v16 = vld [vmem:[%s814_s1 + $0x58] sm:$0xff]   ;;  %v632_v20 = vld [vmem:[%s814_s1 + $0x50] sm:$0xff]  }
   0x6   :  { %561 = vmatprep.subr.bf16.mxu1 %v618_v6  ;;  %v625_v13 = vld [vmem:[%s814_s1 + $0x20] sm:$0xff]   ;;  %v629_v17 = vld [vmem:[%s814_s1 + $0x18] sm:$0xff]   ;;  %v633_v21 = vld [vmem:[%s814_s1 + $0x10] sm:$0xff]  }
   0x7   :  { %540 = vmatpush3.bf16.msra.mxu0 %v617_v5  ;;  %v626_v14 = vld [vmem:[%s814_s1 + $0xe0] sm:$0xff]   ;;  %v630_v18 = vld [vmem:[%s814_s1 + $0xd8] sm:$0xff]   ;;  %v634_v22 = vld [vmem:[%s814_s1 + $0xd0] sm:$0xff]  }
   0x8   :  { %541 = vmatprep.subr.bf16.mxu0 %v620_v8  ;;  %v627_v15 = vld [vmem:[%s814_s1 + $0xa0] sm:$0xff]   ;;  %v631_v19 = vld [vmem:[%s814_s1 + $0x98] sm:$0xff]   ;;  %v635_v23 = vld [vmem:[%s814_s1 + $0x90] sm:$0xff]  }
   0x9   :  { %562 = vmatpush3.bf16.msra.mxu1 %v619_v7  ;;  %v636_v24 = vld [vmem:[%s814_s1 + $0x48] sm:$0xff]   ;;  %v640_v28 = vld [vmem:[%s814_s1 + $0x40] sm:$0xff]   ;;  %v649_v39 = vld [vmem:[%s814_s1 + $0x138] sm:$0xff]  }
   0xa   :  { %563 = vmatprep.subr.bf16.mxu1 %v622_v10  ;;  %v637_v25 = vld [vmem:[%s814_s1 + $0x8] sm:$0xff]   ;;  %v641_v29 = vld [vmem:[%s814_s1] sm:$0xff]   ;;  %v650_v40 = vld [vmem:[%s814_s1 + $0x130] sm:$0xff]  }
   0xb   :  { %542 = vmatpush3.bf16.msra.mxu0 %v621_v9  ;;  %v638_v26 = vld [vmem:[%s814_s1 + $0xc8] sm:$0xff]   ;;  %v642_v30 = vld [vmem:[%s814_s1 + $0xc0] sm:$0xff]   ;;  %v653_v43 = vld [vmem:[%s814_s1 + $0x118] sm:$0xff]  }
   0xc   :  { %543 = vmatprep.subr.bf16.mxu0 %v624_v12  ;;  %v639_v27 = vld [vmem:[%s814_s1 + $0x88] sm:$0xff]   ;;  %v15_v31 = vld [vmem:[%s815_s0] sm:$0xff]  ;;  %v654_v44 = vld [vmem:[%s814_s1 + $0x110] sm:$0xff]  }
   0xd   :  { %564 = vmatpush3.bf16.msra.mxu1 %v623_v11  ;;  %v492_v32 = vcombine.low %v15_v31, %v15_v31  ;;  %v493_v33 = vcombine.high %v15_v31, %v15_v31  ;;  %v646_v34 = vld [vmem:[%s814_s1 + $0x80] sm:$0xff]   ;;  %v16_v36 = vld [vmem:[%s815_s0 + $0x8] sm:$0xff]  ;;  %v645_v47 = vld [vmem:[%s815_s0 + $0x10] ss:$0 sps:$4 sm:$0xff]  }
   0xe   :  { %565 = vmatprep.subr.bf16.mxu1 %v626_v14  ;;  %v494_v37 = vcombine.low %v16_v36, %v16_v36  ;;  %v495_v38 = vcombine.high %v16_v36, %v16_v36  ;;  %v651_v41 = vld [vmem:[%s814_s1 + $0x128] sm:$0xff]   ;;  %v652_v42 = vld [vmem:[%s814_s1 + $0x120] sm:$0xff]  }
   0xf   :  { %544 = vmatpush3.bf16.msra.mxu0 %v625_v13  ;;  %395 = vmatprep.mubr.bf16.mxu0 %v493_v33  ;;  %v655_v45 = vld [vmem:[%s814_s1 + $0x108] sm:$0xff]   ;;  %v656_v46 = vld [vmem:[%s814_s1 + $0x100] sm:$0xff]  }
  0x10   :  { %545 = vmatprep.subr.bf16.mxu0 %v628_v16  ;;  %435 = vmatprep.mubr.bf16.mxu1 %v495_v38  ;;  %v491_v57 = vld [vmem:[%s816_s2] ss:$0 sm:$0xff] }
  0x11   :  { %566 = vmatpush3.bf16.msra.mxu1 %v627_v15 }
  0x12   :  { %567 = vmatprep.subr.bf16.mxu1 %v630_v18 }
  0x13   :  { %546 = vmatpush3.bf16.msra.mxu0 %v629_v17 }
  0x14   :  { %547 = vmatprep.subr.bf16.mxu0 %v632_v20 }
  0x15   :  { %568 = vmatpush3.bf16.msra.mxu1 %v631_v19 }
  0x16   :  { %569 = vmatprep.subr.bf16.mxu1 %v634_v22 }
  0x17   :  { %548 = vmatpush3.bf16.msra.mxu0 %v633_v21 }
  0x18   :  { %549 = vmatprep.subr.bf16.mxu0 %v636_v24 }
  0x19   :  { %570 = vmatpush3.bf16.msra.mxu1 %v635_v23 }
  0x1a   :  { %571 = vmatprep.subr.bf16.mxu1 %v638_v26 }
  0x1b   :  { %550 = vmatpush3.bf16.msra.mxu0 %v637_v25 }
  0x1c   :  { %551 = vmatprep.subr.bf16.mxu0 %v640_v28 }
  0x1d   :  { %572 = vmatpush3.bf16.msra.mxu1 %v639_v27 }
  0x1e   :  { %573 = vmatprep.subr.bf16.mxu1 %v642_v30 }
  0x1f   :  { %552 = vmatpush3.bf16.msra.mxu0 %v641_v29 }
  0x20   :  { %590 = vmatprep.subr.bf16.mxu0 %v657_v35 }
  0x21   :  { %574 = vmatpush3.bf16.msra.mxu1 %v646_v34 }
  0x22   :  { %396 = vmatmul.mubr.bf16.vlgmr.msra.gmra.mxu0 %v492_v32 }
  0x23   :  { %591 = vmatpush3.bf16.msra.mxu0 %v649_v39  ;;  %606 = vmatprep.mubr.msk.bf16.mxu0 %vm658_vm0, %v657_v35 }
  0x24   :  { %436 = vmatmul.mubr.bf16.vlgmr.msra.gmra.mxu1 %v494_v37  ;;  %592 = vmatprep.subr.bf16.mxu0 %v657_v35 }
  0x27   :  { %593 = vmatpush3.bf16.msra.mxu0 %v650_v40 }
  0x28   :  { %594 = vmatprep.subr.bf16.mxu0 %v657_v35 }
  0x2b   :  { %595 = vmatpush3.bf16.msra.mxu0 %v651_v41 }
  0x2c   :  { %596 = vmatprep.subr.bf16.mxu0 %v657_v35 }
  0x2f   :  { %597 = vmatpush3.bf16.msra.mxu0 %v652_v42 }
  0x30   :  { %598 = vmatprep.subr.bf16.mxu0 %v657_v35 }
  0x33   :  { %599 = vmatpush3.bf16.msra.mxu0 %v653_v43 }
  0x34   :  { %600 = vmatprep.subr.bf16.mxu0 %v657_v35 }
  0x37   :  { %601 = vmatpush3.bf16.msra.mxu0 %v654_v44 }
  0x38   :  { %602 = vmatprep.subr.bf16.mxu0 %v657_v35 }
  0x3b   :  { %603 = vmatpush3.bf16.msra.mxu0 %v655_v45 }
  0x3c   :  { %604 = vmatprep.subr.bf16.mxu0 %v657_v35 }
  0x3f   :  { %605 = vmatpush3.bf16.msra.mxu0 %v656_v46 }
  0x42   :  { %607 = vmatmul.mubr.bf16.vlgmr.msra.gmra.mxu0 %v645_v47 }
  0xe2   :  { %v553_v48 = vpop.f32.mrf.mxu0 }
  0xe4   :  { %v554_v49 = vpop.f32.mrf.mxu0  ;;  %v575_v50 = vpop.f32.mrf.mxu1 }
  0xe5   :  { %v555_v56 = vadd.f32 %v554_v49, %v553_v48 }
  0xe6   :  { %v556_v51 = vpop.f32.mrf.mxu0  ;;  %v576_v52 = vpop.f32.mrf.mxu1 }
  0xe7   :  { %v398_v58 = vadd.f32 %v555_v56, %v491_v57  ;;  %v577_v59 = vadd.f32 %v576_v52, %v575_v50 }
  0xe8   :  { %v557_v53 = vpop.f32.mrf.mxu0  ;;  %v578_v54 = vpop.f32.mrf.mxu1 }
  0xe9   :  { %v438_v60 = vadd.f32 %v577_v59, %v398_v58 }
  0xea   :  { %v579_v55 = vpop.f32.mrf.mxu1 }
 0x102   :  { %v477_v61 = vpop.f32.mrf.mxu0 }
 0x103   :  { %v478_v62 = vadd.f32 %v477_v61, %v438_v60 }
 0x104   :  { %v608_v63 = vpop.f32.mrf.mxu0 }
 0x105   :  { %v483_v0 = vmax.f32 %v478_v62, 0.0 }
 0x106   :  { %v480_v1 = vpop.f32.mrf.mxu0 }
 0x107   :  { %v484_v2 = vpack.c.bf16 %v483_v0, %v483_v0 }
 0x108   :  { %v609_v3 = vpop.f32.mrf.mxu0 }
 0x109   :  { %486 = vst.msk [vmem:[%s817_s3] sm:$0xf] %vm485_vm1, %v484_v2 }

</bundles_post_ra>
